<compile_context>
chip_gen: v7x
topology: tpu7x:2x2x1
jax: 0.10.0
libtpu: 0.0.40
codegen_flags: <defaults>
</compile_context>

<pallas_src>
import functools

import numpy as np
import jax
import jax.numpy as jnp
from jax.experimental import pallas as pl
from jax.experimental.pallas import tpu as pltpu

HIDDEN = 32


# ----------------------------------------------------------------------------
# Parameter construction (deterministic; mimics nn.Linear default init,
# stored as (fan_in, fan_out) so y = x @ W + b).
# ----------------------------------------------------------------------------
def make_mlp_params(key, layer_dims):
    wb = []
    for fi, fo in layer_dims:
        key, kw, kb = jax.random.split(key, 3)
        bound = 1.0 / np.sqrt(fi)
        W = jax.random.uniform(kw, (fi, fo), jnp.float32, -bound, bound)
        b = jax.random.uniform(kb, (1, fo), jnp.float32, -bound, bound)
        wb.append((W, b))
    return key, wb


def make_hetnet_params(seed=0, hidden=HIDDEN):
    d = hidden
    key = jax.random.PRNGKey(seed)
    archs = {
        "fy": [(2 * d, d), (d, d), (d, 1)],   # begin=False, final=True (no act on last)
        "fz": [(d + 1, d), (d, d), (d, d)],   # middle=True
        "gz": [(d, d), (d, d), (d, d)],
        "fv": [(d + 1, d), (d, d), (d, d)],   # middle=True
        "gv": [(d, d), (d, d), (d, d)],
        "uf": [(d + 1, d), (d, d), (d, d)],   # middle=True
        "ug": [(d, d), (d, d), (d, d)],
        "v":  [(1, d), (d, d), (d, d)],       # begin=True
        "c":  [(d, d), (d, d), (d, d)],
    }
    params = {}
    for name, layers in archs.items():
        key, wb = make_mlp_params(key, layers)
        params[name] = wb
    return params


# ----------------------------------------------------------------------------
# Constant "structure" matrices: every mean / tile of the original module is a
# tiny matmul against one of these (rows ordered x-branch first, y-branch
# second; within a branch n-major, feature-minor).
# ----------------------------------------------------------------------------
def _structure_mats(Ns, Nq, Dx, Dy):
    Dxy = Dx + Dy
    Rxy = Ns * Dxy          # support rows (x branch then y branch)
    Rq = Nq * Dx            # query rows
    Ryq = Nq * Dy           # output rows

    A_v = np.zeros((Dxy, Rxy), np.float32)    # mean over support set n  (dense_v out)
    T_vc = np.zeros((Rxy, Dxy), np.float32)   # tile vs_bar/cs_bar back over n
    A_uf = np.zeros((Ns, Rxy), np.float32)    # mean over feature d  +  branch sum
    T_us = np.zeros((Rxy, Ns), np.float32)    # tile u_s over feature d
    A_fv = np.zeros((Dxy, Rxy), np.float32)   # mean over support set n (per branch)
    for n in range(Ns):
        for d in range(Dx):
            r = n * Dx + d
            A_v[d, r] = 1.0 / Ns
            T_vc[r, d] = 1.0
            A_uf[n, r] = 1.0 / Dx
            T_us[r, n] = 1.0
            A_fv[d, r] = 1.0 / Ns
        for d in range(Dy):
            r = Ns * Dx + n * Dy + d
            A_v[Dx + d, r] = 1.0 / Ns
            T_vc[r, Dx + d] = 1.0
            A_uf[n, r] = 1.0 / Dy
            T_us[r, n] = 1.0
            A_fv[Dx + d, r] = 1.0 / Ns

    T_z = np.zeros((Rq, Dxy), np.float32)     # tile in_xs over queries q
    A_z = np.zeros((Nq, Rq), np.float32)      # mean over query feature d
    T_zy = np.zeros((Ryq, Nq), np.float32)    # tile z over output feature d'
    T_py = np.zeros((Ryq, Dxy), np.float32)   # tile in_ys over queries q
    for q in range(Nq):
        for d in range(Dx):
            r = q * Dx + d
            T_z[r, d] = 1.0
            A_z[q, r] = 1.0 / Dx
        for d in range(Dy):
            r = q * Dy + d
            T_zy[r, q] = 1.0
            T_py[r, Dx + d] = 1.0

    return dict(A_v=A_v, T_vc=T_vc, A_uf=A_uf, T_us=T_us, A_fv=A_fv,
                T_z=T_z, A_z=A_z, T_zy=T_zy, T_py=T_py)


def _prep_consts(params, Ns, Nq, Dx, Dy):
    """Structure matrices + weights, with first layers pre-split so no (H+1)/(2H)
    concat ever has to be materialized."""
    c = _structure_mats(Ns, Nq, Dx, Dy)

    def flat(wb):
        out = []
        for W, b in wb:
            out += [W, b]
        return out

    for name in ("v", "c", "ug", "gv", "gz"):
        c[name] = flat(params[name])
    for name in ("uf", "fv", "fz"):                 # input = [scalar | H-vector]
        W0, b0 = params[name][0]
        c[name] = [W0[0:1, :], W0[1:, :], b0] + flat(params[name][1:])
    W0, b0 = params["fy"][0]                        # input = [z (H) | p_ys (H)]
    H = W0.shape[0] // 2
    c["fy"] = [W0[:H, :], W0[H:, :], b0] + flat(params["fy"][1:])
    return c


# ----------------------------------------------------------------------------
# Fused Pallas kernel: entire HetNet forward for one batch element.
# ----------------------------------------------------------------------------
def _hetnet_kernel(*refs, treedef):
    o_ref = refs[-1]
    sxy_ref, que_ref = refs[0], refs[1]
    c = jax.tree_util.tree_unflatten(treedef, refs[2:-1])

    def dot(a, b):
        return jnp.dot(a, b, preferred_element_type=jnp.float32)

    def mlp_tail(h, wb_refs, last_act=True):
        n = len(wb_refs) // 2
        for i in range(n):
            h = dot(h, wb_refs[2 * i][...]) + wb_refs[2 * i + 1][...]
            if i < n - 1 or last_act:
                h = jnp.maximum(h, 0.0)                      # ReLU (acti='relu')
        return h

    x_col = sxy_ref[...]            # (Ns*(Dx+Dy), 1): sup_x rows then sup_y rows
    q_col = que_ref[...]            # (Nq*Dx, 1)

    # dense_v on every scalar support feature (x and y branches fused), then
    # mean over the support set and dense_c  ->  [vs_bar ; cs_bar]  (Dx+Dy, H)
    h = jnp.maximum(x_col * c["v"][0][...] + c["v"][1][...], 0.0)
    h = mlp_tail(h, c["v"][2:])
    vc_bar = mlp_tail(dot(c["A_v"][...], h), c["c"])

    # dense_uf on [scalar | tiled vs/cs_bar]; mean over features + branch sum;
    # dense_ug  ->  u_s  (Ns, H)
    h = (x_col * c["uf"][0][...]
         + dot(dot(c["T_vc"][...], vc_bar), c["uf"][1][...])
         + c["uf"][2][...])
    h = mlp_tail(jnp.maximum(h, 0.0), c["uf"][3:])
    u_s = mlp_tail(dot(c["A_uf"][...], h), c["ug"])

    # dense_fv on [scalar | tiled u_s]; mean over support set per branch;
    # dense_gv  ->  [in_xs ; in_ys]  (Dx+Dy, H).  Dropout = identity (eval).
    h = (x_col * c["fv"][0][...]
         + dot(dot(c["T_us"][...], u_s), c["fv"][1][...])
         + c["fv"][2][...])
    h = mlp_tail(jnp.maximum(h, 0.0), c["fv"][3:])
    in_xy = mlp_tail(dot(c["A_fv"][...], h), c["gv"])

    # dense_fz on [query scalar | tiled in_xs]; mean over query features;
    # dense_gz  ->  z  (Nq, H)
    h = (q_col * c["fz"][0][...]
         + dot(dot(c["T_z"][...], in_xy), c["fz"][1][...])
         + c["fz"][2][...])
    h = mlp_tail(jnp.maximum(h, 0.0), c["fz"][3:])
    z = mlp_tail(dot(c["A_z"][...], h), c["gz"])

    # dense_fy on [tiled z | tiled in_ys]  ->  (Nq*Dy, 1), no final activation
    h = (dot(dot(c["T_zy"][...], z), c["fy"][0][...])
         + dot(dot(c["T_py"][...], in_xy), c["fy"][1][...])
         + c["fy"][2][...])
    y = mlp_tail(jnp.maximum(h, 0.0), c["fy"][3:], last_act=False)

    o_ref[...] = y.astype(o_ref.dtype)


def hetnet_pallas(consts, sxy_col, que_col, ry):
    B, rxy, _ = sxy_col.shape
    rq = que_col.shape[1]
    leaves, treedef = jax.tree_util.tree_flatten(consts)

    in_specs = [
        pl.BlockSpec((None, rxy, 1), lambda b: (b, 0, 0)),   # per-batch support cols
        pl.BlockSpec((None, rq, 1), lambda b: (b, 0, 0)),    # per-batch query cols
    ]
    # All weights / structure matrices are small, 2-D and grid-invariant.
    in_specs += [pl.BlockSpec(leaf.shape, lambda b: (0, 0)) for leaf in leaves]
    out_spec = pl.BlockSpec((None, ry, 1), lambda b: (b, 0, 0))

    kernel = functools.partial(_hetnet_kernel, treedef=treedef)
    return pl.pallas_call(
        kernel,
        out_shape=jax.ShapeDtypeStruct((B, ry, 1), jnp.float32),
        grid=(B,),
        in_specs=in_specs,
        out_specs=out_spec,
        compiler_params=pltpu.CompilerParams(
            dimension_semantics=("parallel",)),   # batch shards across TCs on v7x
    )(sxy_col, que_col, *leaves)


def hetnet_forward(params, que_x, sup_x, sup_y):
    B = sup_x.shape[0]
    sup_x = sup_x.reshape(B, sup_x.shape[1], -1)
    sup_y = sup_y.reshape(B, sup_y.shape[1], -1)
    que_x = que_x.reshape(B, que_x.shape[1], -1)
    Ns, Dx = sup_x.shape[1], sup_x.shape[2]
    Dy = sup_y.shape[2]
    Nq = que_x.shape[1]

    consts = _prep_consts(params, Ns, Nq, Dx, Dy)
    sxy_col = jnp.concatenate(
        [sup_x.reshape(B, Ns * Dx), sup_y.reshape(B, Ns * Dy)], axis=1
    )[..., None].astype(jnp.float32)
    que_col = que_x.reshape(B, Nq * Dx, 1).astype(jnp.float32)

    y = hetnet_pallas(consts, sxy_col, que_col, Nq * Dy)   # (B, Nq*Dy, 1)
    # Mirrors torch `y.view(B, Ns, -1, 2)`.
    # TODO(synk): inherited from the PyTorch module -- silently assumes
    # Nq*Dy is divisible by Ns*2 (it scrambles data otherwise).
    return y.reshape(B, Ns, -1, 2)


# ----------------------------------------------------------------------------
# Pure-JAX reference (mirrors the torch forward 1:1) for correctness checking.
# ----------------------------------------------------------------------------
def _mlp_ref(x, wb, last_act=True):
    n = len(wb)
    for i, (W, b) in enumerate(wb):
        x = jnp.dot(x, W, precision=jax.lax.Precision.HIGHEST) + b
        if i < n - 1 or last_act:
            x = jnp.maximum(x, 0.0)
    return x


def hetnet_reference(params, que_x, sup_x, sup_y):
    def dense(name, x):
        return _mlp_ref(x, params[name], last_act=(name != "fy"))

    B = sup_x.shape[0]
    sup_x = sup_x.reshape(B, sup_x.shape[1], -1)
    sup_y = sup_y.reshape(B, sup_y.shape[1], -1)
    que_x = que_x.reshape(B, que_x.shape[1], -1)
    Ns, Dx = sup_x.shape[1], sup_x.shape[2]
    Dy = sup_y.shape[2]
    Nq = que_x.shape[1]
    H = HIDDEN

    vs_bar = dense("c", dense("v", sup_x[..., None]).mean(axis=1))
    cs_bar = dense("c", dense("v", sup_y[..., None]).mean(axis=1))
    vs_bar = jnp.broadcast_to(vs_bar[:, None], (B, Ns, Dx, H))
    cs_bar = jnp.broadcast_to(cs_bar[:, None], (B, Ns, Dy, H))

    u_xs = dense("uf", jnp.concatenate([sup_x[..., None], vs_bar], -1)).mean(axis=2)
    u_ys = dense("uf", jnp.concatenate([sup_y[..., None], cs_bar], -1)).mean(axis=2)
    u_s = dense("ug", u_xs + u_ys)[:, :, None, :]
    u_xs = jnp.broadcast_to(u_s, (B, Ns, Dx, H))
    u_ys = jnp.broadcast_to(u_s, (B, Ns, Dy, H))

    in_xs = dense("gv", dense("fv", jnp.concatenate([sup_x[..., None], u_xs], -1)).mean(axis=1))
    in_ys = dense("gv", dense("fv", jnp.concatenate([sup_y[..., None], u_ys], -1)).mean(axis=1))

    p_xs = jnp.broadcast_to(in_xs[:, None], (B, Nq, Dx, H))
    p_ys = jnp.broadcast_to(in_ys[:, None], (B, Nq, Dy, H))

    z = dense("fz", jnp.concatenate([que_x[..., None], p_xs], -1)).mean(axis=2)
    z = dense("gz", z)
    z = jnp.broadcast_to(z[:, :, None, :], (B, Nq, Dy, H))

    y = dense("fy", jnp.concatenate([z, p_ys], -1))
    return y.reshape(B, Ns, -1, 2)


if __name__ == "__main__":
    params = make_hetnet_params(seed=0)

    key = jax.random.PRNGKey(0)
    k1, k2, k3 = jax.random.split(key, 3)
    # que_x: (B=2, Nq=4, 2, 4) -> viewed to (2, 4, 8)
    # sup_x: (B=2, Ns=4, 2, 4) -> viewed to (2, 4, 8)
    # sup_y: (B=2, Ns=4, 2, 2) -> viewed to (2, 4, 4)
    que_x = jax.random.normal(k1, (2, 4, 2, 4), jnp.float32)
    sup_x = jax.random.normal(k2, (2, 4, 2, 4), jnp.float32)
    sup_y = jax.random.normal(k3, (2, 4, 2, 2), jnp.float32)

    fwd = jax.jit(functools.partial(hetnet_forward, params))
    y = jax.block_until_ready(fwd(que_x, sup_x, sup_y))

    y_ref = hetnet_reference(params, que_x, sup_x, sup_y)

    assert y.shape == (2, 4, 2, 2), y.shape
    assert bool(jnp.all(jnp.isfinite(y)))
    np.testing.assert_allclose(np.asarray(y), np.asarray(y_ref), rtol=5e-2, atol=5e-2)
    print("KERNEL_OK")
</pallas_src>

<mosaic_0001>
module attributes {stable_mosaic.version = 11 : i64} {
  func.func @_hetnet_kernel(%arg0: i32, %arg1: memref<1x48x1xf32, #tpu.memory_space<vmem>>, %arg2: memref<1x32x1xf32, #tpu.memory_space<vmem>>, %arg3: memref<12x48xf32, #tpu.memory_space<vmem>>, %arg4: memref<4x48xf32, #tpu.memory_space<vmem>>, %arg5: memref<12x48xf32, #tpu.memory_space<vmem>>, %arg6: memref<4x32xf32, #tpu.memory_space<vmem>>, %arg7: memref<16x12xf32, #tpu.memory_space<vmem>>, %arg8: memref<48x4xf32, #tpu.memory_space<vmem>>, %arg9: memref<48x12xf32, #tpu.memory_space<vmem>>, %arg10: memref<32x12xf32, #tpu.memory_space<vmem>>, %arg11: memref<16x4xf32, #tpu.memory_space<vmem>>, %arg12: memref<32x32xf32, #tpu.memory_space<vmem>>, %arg13: memref<1x32xf32, #tpu.memory_space<vmem>>, %arg14: memref<32x32xf32, #tpu.memory_space<vmem>>, %arg15: memref<1x32xf32, #tpu.memory_space<vmem>>, %arg16: memref<32x32xf32, #tpu.memory_space<vmem>>, %arg17: memref<1x32xf32, #tpu.memory_space<vmem>>, %arg18: memref<1x32xf32, #tpu.memory_space<vmem>>, %arg19: memref<32x32xf32, #tpu.memory_space<vmem>>, %arg20: memref<1x32xf32, #tpu.memory_space<vmem>>, %arg21: memref<32x32xf32, #tpu.memory_space<vmem>>, %arg22: memref<1x32xf32, #tpu.memory_space<vmem>>, %arg23: memref<32x32xf32, #tpu.memory_space<vmem>>, %arg24: memref<1x32xf32, #tpu.memory_space<vmem>>, %arg25: memref<32x32xf32, #tpu.memory_space<vmem>>, %arg26: memref<32x32xf32, #tpu.memory_space<vmem>>, %arg27: memref<1x32xf32, #tpu.memory_space<vmem>>, %arg28: memref<32x32xf32, #tpu.memory_space<vmem>>, %arg29: memref<1x32xf32, #tpu.memory_space<vmem>>, %arg30: memref<32x1xf32, #tpu.memory_space<vmem>>, %arg31: memref<1x1xf32, #tpu.memory_space<vmem>>, %arg32: memref<1x32xf32, #tpu.memory_space<vmem>>, %arg33: memref<32x32xf32, #tpu.memory_space<vmem>>, %arg34: memref<1x32xf32, #tpu.memory_space<vmem>>, %arg35: memref<32x32xf32, #tpu.memory_space<vmem>>, %arg36: memref<1x32xf32, #tpu.memory_space<vmem>>, %arg37: memref<32x32xf32, #tpu.memory_space<vmem>>, %arg38: memref<1x32xf32, #tpu.memory_space<vmem>>, %arg39: memref<32x32xf32, #tpu.memory_space<vmem>>, %arg40: memref<1x32xf32, #tpu.memory_space<vmem>>, %arg41: memref<32x32xf32, #tpu.memory_space<vmem>>, %arg42: memref<1x32xf32, #tpu.memory_space<vmem>>, %arg43: memref<32x32xf32, #tpu.memory_space<vmem>>, %arg44: memref<1x32xf32, #tpu.memory_space<vmem>>, %arg45: memref<32x32xf32, #tpu.memory_space<vmem>>, %arg46: memref<1x32xf32, #tpu.memory_space<vmem>>, %arg47: memref<32x32xf32, #tpu.memory_space<vmem>>, %arg48: memref<1x32xf32, #tpu.memory_space<vmem>>, %arg49: memref<32x32xf32, #tpu.memory_space<vmem>>, %arg50: memref<1x32xf32, #tpu.memory_space<vmem>>, %arg51: memref<1x32xf32, #tpu.memory_space<vmem>>, %arg52: memref<32x32xf32, #tpu.memory_space<vmem>>, %arg53: memref<1x32xf32, #tpu.memory_space<vmem>>, %arg54: memref<32x32xf32, #tpu.memory_space<vmem>>, %arg55: memref<1x32xf32, #tpu.memory_space<vmem>>, %arg56: memref<32x32xf32, #tpu.memory_space<vmem>>, %arg57: memref<1x32xf32, #tpu.memory_space<vmem>>, %arg58: memref<32x32xf32, #tpu.memory_space<vmem>>, %arg59: memref<1x32xf32, #tpu.memory_space<vmem>>, %arg60: memref<32x32xf32, #tpu.memory_space<vmem>>, %arg61: memref<1x32xf32, #tpu.memory_space<vmem>>, %arg62: memref<32x32xf32, #tpu.memory_space<vmem>>, %arg63: memref<1x32xf32, #tpu.memory_space<vmem>>, %arg64: memref<1x32xf32, #tpu.memory_space<vmem>>, %arg65: memref<1x32xf32, #tpu.memory_space<vmem>>, %arg66: memref<32x32xf32, #tpu.memory_space<vmem>>, %arg67: memref<1x32xf32, #tpu.memory_space<vmem>>, %arg68: memref<32x32xf32, #tpu.memory_space<vmem>>, %arg69: memref<1x32xf32, #tpu.memory_space<vmem>>, %arg70: memref<1x16x1xf32, #tpu.memory_space<vmem>>) attributes {dimension_semantics = [#tpu.dimension_semantics<parallel>], iteration_bounds = array<i64: 2>, scalar_prefetch = 0 : i64, scratch_operands = 0 : i64, tpu.core_type = #tpu.core_type<tc>, window_params = [{transform_indices = @transform_0, window_bounds = array<i64: 1, 48, 1>}, {transform_indices = @transform_1, window_bounds = array<i64: 1, 32, 1>}, {pipeline_mode = #tpu.pipeline_mode<synchronous>, transform_indices = @transform_2, window_bounds = array<i64: 12, 48>}, {pipeline_mode = #tpu.pipeline_mode<synchronous>, transform_indices = @transform_3, window_bounds = array<i64: 4, 48>}, {pipeline_mode = #tpu.pipeline_mode<synchronous>, transform_indices = @transform_4, window_bounds = array<i64: 12, 48>}, {pipeline_mode = #tpu.pipeline_mode<synchronous>, transform_indices = @transform_5, window_bounds = array<i64: 4, 32>}, {pipeline_mode = #tpu.pipeline_mode<synchronous>, transform_indices = @transform_6, window_bounds = array<i64: 16, 12>}, {pipeline_mode = #tpu.pipeline_mode<synchronous>, transform_indices = @transform_7, window_bounds = array<i64: 48, 4>}, {pipeline_mode = #tpu.pipeline_mode<synchronous>, transform_indices = @transform_8, window_bounds = array<i64: 48, 12>}, {pipeline_mode = #tpu.pipeline_mode<synchronous>, transform_indices = @transform_9, window_bounds = array<i64: 32, 12>}, {pipeline_mode = #tpu.pipeline_mode<synchronous>, transform_indices = @transform_10, window_bounds = array<i64: 16, 4>}, {pipeline_mode = #tpu.pipeline_mode<synchronous>, transform_indices = @transform_11, window_bounds = array<i64: 32, 32>}, {pipeline_mode = #tpu.pipeline_mode<synchronous>, transform_indices = @transform_12, window_bounds = array<i64: 1, 32>}, {pipeline_mode = #tpu.pipeline_mode<synchronous>, transform_indices = @transform_13, window_bounds = array<i64: 32, 32>}, {pipeline_mode = #tpu.pipeline_mode<synchronous>, transform_indices = @transform_14, window_bounds = array<i64: 1, 32>}, {pipeline_mode = #tpu.pipeline_mode<synchronous>, transform_indices = @transform_15, window_bounds = array<i64: 32, 32>}, {pipeline_mode = #tpu.pipeline_mode<synchronous>, transform_indices = @transform_16, window_bounds = array<i64: 1, 32>}, {pipeline_mode = #tpu.pipeline_mode<synchronous>, transform_indices = @transform_17, window_bounds = array<i64: 1, 32>}, {pipeline_mode = #tpu.pipeline_mode<synchronous>, transform_indices = @transform_18, window_bounds = array<i64: 32, 32>}, {pipeline_mode = #tpu.pipeline_mode<synchronous>, transform_indices = @transform_19, window_bounds = array<i64: 1, 32>}, {pipeline_mode = #tpu.pipeline_mode<synchronous>, transform_indices = @transform_20, window_bounds = array<i64: 32, 32>}, {pipeline_mode = #tpu.pipeline_mode<synchronous>, transform_indices = @transform_21, window_bounds = array<i64: 1, 32>}, {pipeline_mode = #tpu.pipeline_mode<synchronous>, transform_indices = @transform_22, window_bounds = array<i64: 32, 32>}, {pipeline_mode = #tpu.pipeline_mode<synchronous>, transform_indices = @transform_23, window_bounds = array<i64: 1, 32>}, {pipeline_mode = #tpu.pipeline_mode<synchronous>, transform_indices = @transform_24, window_bounds = array<i64: 32, 32>}, {pipeline_mode = #tpu.pipeline_mode<synchronous>, transform_indices = @transform_25, window_bounds = array<i64: 32, 32>}, {pipeline_mode = #tpu.pipeline_mode<synchronous>, transform_indices = @transform_26, window_bounds = array<i64: 1, 32>}, {pipeline_mode = #tpu.pipeline_mode<synchronous>, transform_indices = @transform_27, window_bounds = array<i64: 32, 32>}, {pipeline_mode = #tpu.pipeline_mode<synchronous>, transform_indices = @transform_28, window_bounds = array<i64: 1, 32>}, {pipeline_mode = #tpu.pipeline_mode<synchronous>, transform_indices = @transform_29, window_bounds = array<i64: 32, 1>}, {pipeline_mode = #tpu.pipeline_mode<synchronous>, transform_indices = @transform_30, window_bounds = array<i64: 1, 1>}, {pipeline_mode = #tpu.pipeline_mode<synchronous>, transform_indices = @transform_31, window_bounds = array<i64: 1, 32>}, {pipeline_mode = #tpu.pipeline_mode<synchronous>, transform_indices = @transform_32, window_bounds = array<i64: 32, 32>}, {pipeline_mode = #tpu.pipeline_mode<synchronous>, transform_indices = @transform_33, window_bounds = array<i64: 1, 32>}, {pipeline_mode = #tpu.pipeline_mode<synchronous>, transform_indices = @transform_34, window_bounds = array<i64: 32, 32>}, {pipeline_mode = #tpu.pipeline_mode<synchronous>, transform_indices = @transform_35, window_bounds = array<i64: 1, 32>}, {pipeline_mode = #tpu.pipeline_mode<synchronous>, transform_indices = @transform_36, window_bounds = array<i64: 32, 32>}, {pipeline_mode = #tpu.pipeline_mode<synchronous>, transform_indices = @transform_37, window_bounds = array<i64: 1, 32>}, {pipeline_mode = #tpu.pipeline_mode<synchronous>, transform_indices = @transform_38, window_bounds = array<i64: 32, 32>}, {pipeline_mode = #tpu.pipeline_mode<synchronous>, transform_indices = @transform_39, window_bounds = array<i64: 1, 32>}, {pipeline_mode = #tpu.pipeline_mode<synchronous>, transform_indices = @transform_40, window_bounds = array<i64: 32, 32>}, {pipeline_mode = #tpu.pipeline_mode<synchronous>, transform_indices = @transform_41, window_bounds = array<i64: 1, 32>}, {pipeline_mode = #tpu.pipeline_mode<synchronous>, transform_indices = @transform_42, window_bounds = array<i64: 32, 32>}, {pipeline_mode = #tpu.pipeline_mode<synchronous>, transform_indices = @transform_43, window_bounds = array<i64: 1, 32>}, {pipeline_mode = #tpu.pipeline_mode<synchronous>, transform_indices = @transform_44, window_bounds = array<i64: 32, 32>}, {pipeline_mode = #tpu.pipeline_mode<synchronous>, transform_indices = @transform_45, window_bounds = array<i64: 1, 32>}, {pipeline_mode = #tpu.pipeline_mode<synchronous>, transform_indices = @transform_46, window_bounds = array<i64: 32, 32>}, {pipeline_mode = #tpu.pipeline_mode<synchronous>, transform_indices = @transform_47, window_bounds = array<i64: 1, 32>}, {pipeline_mode = #tpu.pipeline_mode<synchronous>, transform_indices = @transform_48, window_bounds = array<i64: 32, 32>}, {pipeline_mode = #tpu.pipeline_mode<synchronous>, transform_indices = @transform_49, window_bounds = array<i64: 1, 32>}, {pipeline_mode = #tpu.pipeline_mode<synchronous>, transform_indices = @transform_50, window_bounds = array<i64: 1, 32>}, {pipeline_mode = #tpu.pipeline_mode<synchronous>, transform_indices = @transform_51, window_bounds = array<i64: 32, 32>}, {pipeline_mode = #tpu.pipeline_mode<synchronous>, transform_indices = @transform_52, window_bounds = array<i64: 1, 32>}, {pipeline_mode = #tpu.pipeline_mode<synchronous>, transform_indices = @transform_53, window_bounds = array<i64: 32, 32>}, {pipeline_mode = #tpu.pipeline_mode<synchronous>, transform_indices = @transform_54, window_bounds = array<i64: 1, 32>}, {pipeline_mode = #tpu.pipeline_mode<synchronous>, transform_indices = @transform_55, window_bounds = array<i64: 32, 32>}, {pipeline_mode = #tpu.pipeline_mode<synchronous>, transform_indices = @transform_56, window_bounds = array<i64: 1, 32>}, {pipeline_mode = #tpu.pipeline_mode<synchronous>, transform_indices = @transform_57, window_bounds = array<i64: 32, 32>}, {pipeline_mode = #tpu.pipeline_mode<synchronous>, transform_indices = @transform_58, window_bounds = array<i64: 1, 32>}, {pipeline_mode = #tpu.pipeline_mode<synchronous>, transform_indices = @transform_59, window_bounds = array<i64: 32, 32>}, {pipeline_mode = #tpu.pipeline_mode<synchronous>, transform_indices = @transform_60, window_bounds = array<i64: 1, 32>}, {pipeline_mode = #tpu.pipeline_mode<synchronous>, transform_indices = @transform_61, window_bounds = array<i64: 32, 32>}, {pipeline_mode = #tpu.pipeline_mode<synchronous>, transform_indices = @transform_62, window_bounds = array<i64: 1, 32>}, {pipeline_mode = #tpu.pipeline_mode<synchronous>, transform_indices = @transform_63, window_bounds = array<i64: 1, 32>}, {pipeline_mode = #tpu.pipeline_mode<synchronous>, transform_indices = @transform_64, window_bounds = array<i64: 1, 32>}, {pipeline_mode = #tpu.pipeline_mode<synchronous>, transform_indices = @transform_65, window_bounds = array<i64: 32, 32>}, {pipeline_mode = #tpu.pipeline_mode<synchronous>, transform_indices = @transform_66, window_bounds = array<i64: 1, 32>}, {pipeline_mode = #tpu.pipeline_mode<synchronous>, transform_indices = @transform_67, window_bounds = array<i64: 32, 32>}, {pipeline_mode = #tpu.pipeline_mode<synchronous>, transform_indices = @transform_68, window_bounds = array<i64: 1, 32>}, {transform_indices = @transform_69, window_bounds = array<i64: 1, 16, 1>}]} {
    %c0 = arith.constant 0 : index
    %c0_0 = arith.constant 0 : index
    %c0_1 = arith.constant 0 : index
    %0 = vector.load %arg1[%c0, %c0_0, %c0_1] : memref<1x48x1xf32, #tpu.memory_space<vmem>>, vector<1x48x1xf32>
    %1 = vector.shape_cast %0 : vector<1x48x1xf32> to vector<48x1xf32>
    %c0_2 = arith.constant 0 : index
    %c0_3 = arith.constant 0 : index
    %c0_4 = arith.constant 0 : index
    %2 = vector.load %arg2[%c0_2, %c0_3, %c0_4] : memref<1x32x1xf32, #tpu.memory_space<vmem>>, vector<1x32x1xf32>
    %3 = vector.shape_cast %2 : vector<1x32x1xf32> to vector<32x1xf32>
    %c0_5 = arith.constant 0 : index
    %c0_6 = arith.constant 0 : index
    %4 = vector.load %arg64[%c0_5, %c0_6] : memref<1x32xf32, #tpu.memory_space<vmem>>, vector<1x32xf32>
    %5 = vector.broadcast %1 : vector<48x1xf32> to vector<48x32xf32>
    %6 = vector.broadcast %4 : vector<1x32xf32> to vector<48x32xf32>
    %7 = arith.mulf %5, %6 : vector<48x32xf32>
    %c0_7 = arith.constant 0 : index
    %c0_8 = arith.constant 0 : index
    %8 = vector.load %arg65[%c0_7, %c0_8] : memref<1x32xf32, #tpu.memory_space<vmem>>, vector<1x32xf32>
    %9 = vector.broadcast %8 : vector<1x32xf32> to vector<48x32xf32>
    %10 = arith.addf %7, %9 : vector<48x32xf32>
    %cst = arith.constant 0.000000e+00 : f32
    %11 = vector.broadcast %cst : f32 to vector<48x32xf32>
    %12 = arith.maximumf %10, %11 : vector<48x32xf32>
    %c0_9 = arith.constant 0 : index
    %c0_10 = arith.constant 0 : index
    %13 = vector.load %arg66[%c0_9, %c0_10] : memref<32x32xf32, #tpu.memory_space<vmem>>, vector<32x32xf32>
    %cst_11 = arith.constant dense<0.000000e+00> : vector<48x32xf32>
    %14 = tpu.matmul %12, %13, %cst_11 {dimension_numbers = #tpu.dot_dimension_numbers<[1], [0], [0], [1], [0, 0, 1, 1], [], []>} : vector<48x32xf32>, vector<32x32xf32>, vector<48x32xf32> -> vector<48x32xf32>
    %c0_12 = arith.constant 0 : index
    %c0_13 = arith.constant 0 : index
    %15 = vector.load %arg67[%c0_12, %c0_13] : memref<1x32xf32, #tpu.memory_space<vmem>>, vector<1x32xf32>
    %16 = vector.broadcast %15 : vector<1x32xf32> to vector<48x32xf32>
    %17 = arith.addf %14, %16 : vector<48x32xf32>
    %cst_14 = arith.constant 0.000000e+00 : f32
    %18 = vector.broadcast %cst_14 : f32 to vector<48x32xf32>
    %19 = arith.maximumf %17, %18 : vector<48x32xf32>
    %c0_15 = arith.constant 0 : index
    %c0_16 = arith.constant 0 : index
    %20 = vector.load %arg68[%c0_15, %c0_16] : memref<32x32xf32, #tpu.memory_space<vmem>>, vector<32x32xf32>
    %cst_17 = arith.constant dense<0.000000e+00> : vector<48x32xf32>
    %21 = tpu.matmul %19, %20, %cst_17 {dimension_numbers = #tpu.dot_dimension_numbers<[1], [0], [0], [1], [0, 0, 1, 1], [], []>} : vector<48x32xf32>, vector<32x32xf32>, vector<48x32xf32> -> vector<48x32xf32>
    %c0_18 = arith.constant 0 : index
    %c0_19 = arith.constant 0 : index
    %22 = vector.load %arg69[%c0_18, %c0_19] : memref<1x32xf32, #tpu.memory_space<vmem>>, vector<1x32xf32>
    %23 = vector.broadcast %22 : vector<1x32xf32> to vector<48x32xf32>
    %24 = arith.addf %21, %23 : vector<48x32xf32>
    %cst_20 = arith.constant 0.000000e+00 : f32
    %25 = vector.broadcast %cst_20 : f32 to vector<48x32xf32>
    %26 = arith.maximumf %24, %25 : vector<48x32xf32>
    %c0_21 = arith.constant 0 : index
    %c0_22 = arith.constant 0 : index
    %27 = vector.load %arg5[%c0_21, %c0_22] : memref<12x48xf32, #tpu.memory_space<vmem>>, vector<12x48xf32>
    %cst_23 = arith.constant dense<0.000000e+00> : vector<12x32xf32>
    %28 = tpu.matmul %27, %26, %cst_23 {dimension_numbers = #tpu.dot_dimension_numbers<[1], [0], [0], [1], [0, 0, 1, 1], [], []>} : vector<12x48xf32>, vector<48x32xf32>, vector<12x32xf32> -> vector<12x32xf32>
    %c0_24 = arith.constant 0 : index
    %c0_25 = arith.constant 0 : index
    %29 = vector.load %arg12[%c0_24, %c0_25] : memref<32x32xf32, #tpu.memory_space<vmem>>, vector<32x32xf32>
    %cst_26 = arith.constant dense<0.000000e+00> : vector<12x32xf32>
    %30 = tpu.matmul %28, %29, %cst_26 {dimension_numbers = #tpu.dot_dimension_numbers<[1], [0], [0], [1], [0, 0, 1, 1], [], []>} : vector<12x32xf32>, vector<32x32xf32>, vector<12x32xf32> -> vector<12x32xf32>
    %c0_27 = arith.constant 0 : index
    %c0_28 = arith.constant 0 : index
    %31 = vector.load %arg13[%c0_27, %c0_28] : memref<1x32xf32, #tpu.memory_space<vmem>>, vector<1x32xf32>
    %32 = vector.broadcast %31 : vector<1x32xf32> to vector<12x32xf32>
    %33 = arith.addf %30, %32 : vector<12x32xf32>
    %cst_29 = arith.constant 0.000000e+00 : f32
    %34 = vector.broadcast %cst_29 : f32 to vector<12x32xf32>
    %35 = arith.maximumf %33, %34 : vector<12x32xf32>
    %c0_30 = arith.constant 0 : index
    %c0_31 = arith.constant 0 : index
    %36 = vector.load %arg14[%c0_30, %c0_31] : memref<32x32xf32, #tpu.memory_space<vmem>>, vector<32x32xf32>
    %cst_32 = arith.constant dense<0.000000e+00> : vector<12x32xf32>
    %37 = tpu.matmul %35, %36, %cst_32 {dimension_numbers = #tpu.dot_dimension_numbers<[1], [0], [0], [1], [0, 0, 1, 1], [], []>} : vector<12x32xf32>, vector<32x32xf32>, vector<12x32xf32> -> vector<12x32xf32>
    %c0_33 = arith.constant 0 : index
    %c0_34 = arith.constant 0 : index
    %38 = vector.load %arg15[%c0_33, %c0_34] : memref<1x32xf32, #tpu.memory_space<vmem>>, vector<1x32xf32>
    %39 = vector.broadcast %38 : vector<1x32xf32> to vector<12x32xf32>
    %40 = arith.addf %37, %39 : vector<12x32xf32>
    %cst_35 = arith.constant 0.000000e+00 : f32
    %41 = vector.broadcast %cst_35 : f32 to vector<12x32xf32>
    %42 = arith.maximumf %40, %41 : vector<12x32xf32>
    %c0_36 = arith.constant 0 : index
    %c0_37 = arith.constant 0 : index
    %43 = vector.load %arg16[%c0_36, %c0_37] : memref<32x32xf32, #tpu.memory_space<vmem>>, vector<32x32xf32>
    %cst_38 = arith.constant dense<0.000000e+00> : vector<12x32xf32>
    %44 = tpu.matmul %42, %43, %cst_38 {dimension_numbers = #tpu.dot_dimension_numbers<[1], [0], [0], [1], [0, 0, 1, 1], [], []>} : vector<12x32xf32>, vector<32x32xf32>, vector<12x32xf32> -> vector<12x32xf32>
    %c0_39 = arith.constant 0 : index
    %c0_40 = arith.constant 0 : index
    %45 = vector.load %arg17[%c0_39, %c0_40] : memref<1x32xf32, #tpu.memory_space<vmem>>, vector<1x32xf32>
    %46 = vector.broadcast %45 : vector<1x32xf32> to vector<12x32xf32>
    %47 = arith.addf %44, %46 : vector<12x32xf32>
    %cst_41 = arith.constant 0.000000e+00 : f32
    %48 = vector.broadcast %cst_41 : f32 to vector<12x32xf32>
    %49 = arith.maximumf %47, %48 : vector<12x32xf32>
    %c0_42 = arith.constant 0 : index
    %c0_43 = arith.constant 0 : index
    %50 = vector.load %arg51[%c0_42, %c0_43] : memref<1x32xf32, #tpu.memory_space<vmem>>, vector<1x32xf32>
    %51 = vector.broadcast %1 : vector<48x1xf32> to vector<48x32xf32>
    %52 = vector.broadcast %50 : vector<1x32xf32> to vector<48x32xf32>
    %53 = arith.mulf %51, %52 : vector<48x32xf32>
    %c0_44 = arith.constant 0 : index
    %c0_45 = arith.constant 0 : index
    %54 = vector.load %arg9[%c0_44, %c0_45] : memref<48x12xf32, #tpu.memory_space<vmem>>, vector<48x12xf32>
    %cst_46 = arith.constant dense<0.000000e+00> : vector<48x32xf32>
    %55 = tpu.matmul %54, %49, %cst_46 {dimension_numbers = #tpu.dot_dimension_numbers<[1], [0], [0], [1], [0, 0, 1, 1], [], []>} : vector<48x12xf32>, vector<12x32xf32>, vector<48x32xf32> -> vector<48x32xf32>
    %c0_47 = arith.constant 0 : index
    %c0_48 = arith.constant 0 : index
    %56 = vector.load %arg52[%c0_47, %c0_48] : memref<32x32xf32, #tpu.memory_space<vmem>>, vector<32x32xf32>
    %cst_49 = arith.constant dense<0.000000e+00> : vector<48x32xf32>
    %57 = tpu.matmul %55, %56, %cst_49 {dimension_numbers = #tpu.dot_dimension_numbers<[1], [0], [0], [1], [0, 0, 1, 1], [], []>} : vector<48x32xf32>, vector<32x32xf32>, vector<48x32xf32> -> vector<48x32xf32>
    %58 = arith.addf %53, %57 : vector<48x32xf32>
    %c0_50 = arith.constant 0 : index
    %c0_51 = arith.constant 0 : index
    %59 = vector.load %arg53[%c0_50, %c0_51] : memref<1x32xf32, #tpu.memory_space<vmem>>, vector<1x32xf32>
    %60 = vector.broadcast %59 : vector<1x32xf32> to vector<48x32xf32>
    %61 = arith.addf %58, %60 : vector<48x32xf32>
    %cst_52 = arith.constant 0.000000e+00 : f32
    %62 = vector.broadcast %cst_52 : f32 to vector<48x32xf32>
    %63 = arith.maximumf %61, %62 : vector<48x32xf32>
    %c0_53 = arith.constant 0 : index
    %c0_54 = arith.constant 0 : index
    %64 = vector.load %arg54[%c0_53, %c0_54] : memref<32x32xf32, #tpu.memory_space<vmem>>, vector<32x32xf32>
    %cst_55 = arith.constant dense<0.000000e+00> : vector<48x32xf32>
    %65 = tpu.matmul %63, %64, %cst_55 {dimension_numbers = #tpu.dot_dimension_numbers<[1], [0], [0], [1], [0, 0, 1, 1], [], []>} : vector<48x32xf32>, vector<32x32xf32>, vector<48x32xf32> -> vector<48x32xf32>
    %c0_56 = arith.constant 0 : index
    %c0_57 = arith.constant 0 : index
    %66 = vector.load %arg55[%c0_56, %c0_57] : memref<1x32xf32, #tpu.memory_space<vmem>>, vector<1x32xf32>
    %67 = vector.broadcast %66 : vector<1x32xf32> to vector<48x32xf32>
    %68 = arith.addf %65, %67 : vector<48x32xf32>
    %cst_58 = arith.constant 0.000000e+00 : f32
    %69 = vector.broadcast %cst_58 : f32 to vector<48x32xf32>
    %70 = arith.maximumf %68, %69 : vector<48x32xf32>
    %c0_59 = arith.constant 0 : index
    %c0_60 = arith.constant 0 : index
    %71 = vector.load %arg56[%c0_59, %c0_60] : memref<32x32xf32, #tpu.memory_space<vmem>>, vector<32x32xf32>
    %cst_61 = arith.constant dense<0.000000e+00> : vector<48x32xf32>
    %72 = tpu.matmul %70, %71, %cst_61 {dimension_numbers = #tpu.dot_dimension_numbers<[1], [0], [0], [1], [0, 0, 1, 1], [], []>} : vector<48x32xf32>, vector<32x32xf32>, vector<48x32xf32> -> vector<48x32xf32>
    %c0_62 = arith.constant 0 : index
    %c0_63 = arith.constant 0 : index
    %73 = vector.load %arg57[%c0_62, %c0_63] : memref<1x32xf32, #tpu.memory_space<vmem>>, vector<1x32xf32>
    %74 = vector.broadcast %73 : vector<1x32xf32> to vector<48x32xf32>
    %75 = arith.addf %72, %74 : vector<48x32xf32>
    %cst_64 = arith.constant 0.000000e+00 : f32
    %76 = vector.broadcast %cst_64 : f32 to vector<48x32xf32>
    %77 = arith.maximumf %75, %76 : vector<48x32xf32>
    %c0_65 = arith.constant 0 : index
    %c0_66 = arith.constant 0 : index
    %78 = vector.load %arg4[%c0_65, %c0_66] : memref<4x48xf32, #tpu.memory_space<vmem>>, vector<4x48xf32>
    %cst_67 = arith.constant dense<0.000000e+00> : vector<4x32xf32>
    %79 = tpu.matmul %78, %77, %cst_67 {dimension_numbers = #tpu.dot_dimension_numbers<[1], [0], [0], [1], [0, 0, 1, 1], [], []>} : vector<4x48xf32>, vector<48x32xf32>, vector<4x32xf32> -> vector<4x32xf32>
    %c0_68 = arith.constant 0 : index
    %c0_69 = arith.constant 0 : index
    %80 = vector.load %arg58[%c0_68, %c0_69] : memref<32x32xf32, #tpu.memory_space<vmem>>, vector<32x32xf32>
    %cst_70 = arith.constant dense<0.000000e+00> : vector<4x32xf32>
    %81 = tpu.matmul %79, %80, %cst_70 {dimension_numbers = #tpu.dot_dimension_numbers<[1], [0], [0], [1], [0, 0, 1, 1], [], []>} : vector<4x32xf32>, vector<32x32xf32>, vector<4x32xf32> -> vector<4x32xf32>
    %c0_71 = arith.constant 0 : index
    %c0_72 = arith.constant 0 : index
    %82 = vector.load %arg59[%c0_71, %c0_72] : memref<1x32xf32, #tpu.memory_space<vmem>>, vector<1x32xf32>
    %83 = vector.broadcast %82 : vector<1x32xf32> to vector<4x32xf32>
    %84 = arith.addf %81, %83 : vector<4x32xf32>
    %cst_73 = arith.constant 0.000000e+00 : f32
    %85 = vector.broadcast %cst_73 : f32 to vector<4x32xf32>
    %86 = arith.maximumf %84, %85 : vector<4x32xf32>
    %c0_74 = arith.constant 0 : index
    %c0_75 = arith.constant 0 : index
    %87 = vector.load %arg60[%c0_74, %c0_75] : memref<32x32xf32, #tpu.memory_space<vmem>>, vector<32x32xf32>
    %cst_76 = arith.constant dense<0.000000e+00> : vector<4x32xf32>
    %88 = tpu.matmul %86, %87, %cst_76 {dimension_numbers = #tpu.dot_dimension_numbers<[1], [0], [0], [1], [0, 0, 1, 1], [], []>} : vector<4x32xf32>, vector<32x32xf32>, vector<4x32xf32> -> vector<4x32xf32>
    %c0_77 = arith.constant 0 : index
    %c0_78 = arith.constant 0 : index
    %89 = vector.load %arg61[%c0_77, %c0_78] : memref<1x32xf32, #tpu.memory_space<vmem>>, vector<1x32xf32>
    %90 = vector.broadcast %89 : vector<1x32xf32> to vector<4x32xf32>
    %91 = arith.addf %88, %90 : vector<4x32xf32>
    %cst_79 = arith.constant 0.000000e+00 : f32
    %92 = vector.broadcast %cst_79 : f32 to vector<4x32xf32>
    %93 = arith.maximumf %91, %92 : vector<4x32xf32>
    %c0_80 = arith.constant 0 : index
    %c0_81 = arith.constant 0 : index
    %94 = vector.load %arg62[%c0_80, %c0_81] : memref<32x32xf32, #tpu.memory_space<vmem>>, vector<32x32xf32>
    %cst_82 = arith.constant dense<0.000000e+00> : vector<4x32xf32>
    %95 = tpu.matmul %93, %94, %cst_82 {dimension_numbers = #tpu.dot_dimension_numbers<[1], [0], [0], [1], [0, 0, 1, 1], [], []>} : vector<4x32xf32>, vector<32x32xf32>, vector<4x32xf32> -> vector<4x32xf32>
    %c0_83 = arith.constant 0 : index
    %c0_84 = arith.constant 0 : index
    %96 = vector.load %arg63[%c0_83, %c0_84] : memref<1x32xf32, #tpu.memory_space<vmem>>, vector<1x32xf32>
    %97 = vector.broadcast %96 : vector<1x32xf32> to vector<4x32xf32>
    %98 = arith.addf %95, %97 : vector<4x32xf32>
    %cst_85 = arith.constant 0.000000e+00 : f32
    %99 = vector.broadcast %cst_85 : f32 to vector<4x32xf32>
    %100 = arith.maximumf %98, %99 : vector<4x32xf32>
    %c0_86 = arith.constant 0 : index
    %c0_87 = arith.constant 0 : index
    %101 = vector.load %arg18[%c0_86, %c0_87] : memref<1x32xf32, #tpu.memory_space<vmem>>, vector<1x32xf32>
    %102 = vector.broadcast %1 : vector<48x1xf32> to vector<48x32xf32>
    %103 = vector.broadcast %101 : vector<1x32xf32> to vector<48x32xf32>
    %104 = arith.mulf %102, %103 : vector<48x32xf32>
    %c0_88 = arith.constant 0 : index
    %c0_89 = arith.constant 0 : index
    %105 = vector.load %arg8[%c0_88, %c0_89] : memref<48x4xf32, #tpu.memory_space<vmem>>, vector<48x4xf32>
    %cst_90 = arith.constant dense<0.000000e+00> : vector<48x32xf32>
    %106 = tpu.matmul %105, %100, %cst_90 {dimension_numbers = #tpu.dot_dimension_numbers<[1], [0], [0], [1], [0, 0, 1, 1], [], []>} : vector<48x4xf32>, vector<4x32xf32>, vector<48x32xf32> -> vector<48x32xf32>
    %c0_91 = arith.constant 0 : index
    %c0_92 = arith.constant 0 : index
    %107 = vector.load %arg19[%c0_91, %c0_92] : memref<32x32xf32, #tpu.memory_space<vmem>>, vector<32x32xf32>
    %cst_93 = arith.constant dense<0.000000e+00> : vector<48x32xf32>
    %108 = tpu.matmul %106, %107, %cst_93 {dimension_numbers = #tpu.dot_dimension_numbers<[1], [0], [0], [1], [0, 0, 1, 1], [], []>} : vector<48x32xf32>, vector<32x32xf32>, vector<48x32xf32> -> vector<48x32xf32>
    %109 = arith.addf %104, %108 : vector<48x32xf32>
    %c0_94 = arith.constant 0 : index
    %c0_95 = arith.constant 0 : index
    %110 = vector.load %arg20[%c0_94, %c0_95] : memref<1x32xf32, #tpu.memory_space<vmem>>, vector<1x32xf32>
    %111 = vector.broadcast %110 : vector<1x32xf32> to vector<48x32xf32>
    %112 = arith.addf %109, %111 : vector<48x32xf32>
    %cst_96 = arith.constant 0.000000e+00 : f32
    %113 = vector.broadcast %cst_96 : f32 to vector<48x32xf32>
    %114 = arith.maximumf %112, %113 : vector<48x32xf32>
    %c0_97 = arith.constant 0 : index
    %c0_98 = arith.constant 0 : index
    %115 = vector.load %arg21[%c0_97, %c0_98] : memref<32x32xf32, #tpu.memory_space<vmem>>, vector<32x32xf32>
    %cst_99 = arith.constant dense<0.000000e+00> : vector<48x32xf32>
    %116 = tpu.matmul %114, %115, %cst_99 {dimension_numbers = #tpu.dot_dimension_numbers<[1], [0], [0], [1], [0, 0, 1, 1], [], []>} : vector<48x32xf32>, vector<32x32xf32>, vector<48x32xf32> -> vector<48x32xf32>
    %c0_100 = arith.constant 0 : index
    %c0_101 = arith.constant 0 : index
    %117 = vector.load %arg22[%c0_100, %c0_101] : memref<1x32xf32, #tpu.memory_space<vmem>>, vector<1x32xf32>
    %118 = vector.broadcast %117 : vector<1x32xf32> to vector<48x32xf32>
    %119 = arith.addf %116, %118 : vector<48x32xf32>
    %cst_102 = arith.constant 0.000000e+00 : f32
    %120 = vector.broadcast %cst_102 : f32 to vector<48x32xf32>
    %121 = arith.maximumf %119, %120 : vector<48x32xf32>
    %c0_103 = arith.constant 0 : index
    %c0_104 = arith.constant 0 : index
    %122 = vector.load %arg23[%c0_103, %c0_104] : memref<32x32xf32, #tpu.memory_space<vmem>>, vector<32x32xf32>
    %cst_105 = arith.constant dense<0.000000e+00> : vector<48x32xf32>
    %123 = tpu.matmul %121, %122, %cst_105 {dimension_numbers = #tpu.dot_dimension_numbers<[1], [0], [0], [1], [0, 0, 1, 1], [], []>} : vector<48x32xf32>, vector<32x32xf32>, vector<48x32xf32> -> vector<48x32xf32>
    %c0_106 = arith.constant 0 : index
    %c0_107 = arith.constant 0 : index
    %124 = vector.load %arg24[%c0_106, %c0_107] : memref<1x32xf32, #tpu.memory_space<vmem>>, vector<1x32xf32>
    %125 = vector.broadcast %124 : vector<1x32xf32> to vector<48x32xf32>
    %126 = arith.addf %123, %125 : vector<48x32xf32>
    %cst_108 = arith.constant 0.000000e+00 : f32
    %127 = vector.broadcast %cst_108 : f32 to vector<48x32xf32>
    %128 = arith.maximumf %126, %127 : vector<48x32xf32>
    %c0_109 = arith.constant 0 : index
    %c0_110 = arith.constant 0 : index
    %129 = vector.load %arg3[%c0_109, %c0_110] : memref<12x48xf32, #tpu.memory_space<vmem>>, vector<12x48xf32>
    %cst_111 = arith.constant dense<0.000000e+00> : vector<12x32xf32>
    %130 = tpu.matmul %129, %128, %cst_111 {dimension_numbers = #tpu.dot_dimension_numbers<[1], [0], [0], [1], [0, 0, 1, 1], [], []>} : vector<12x48xf32>, vector<48x32xf32>, vector<12x32xf32> -> vector<12x32xf32>
    %c0_112 = arith.constant 0 : index
    %c0_113 = arith.constant 0 : index
    %131 = vector.load %arg39[%c0_112, %c0_113] : memref<32x32xf32, #tpu.memory_space<vmem>>, vector<32x32xf32>
    %cst_114 = arith.constant dense<0.000000e+00> : vector<12x32xf32>
    %132 = tpu.matmul %130, %131, %cst_114 {dimension_numbers = #tpu.dot_dimension_numbers<[1], [0], [0], [1], [0, 0, 1, 1], [], []>} : vector<12x32xf32>, vector<32x32xf32>, vector<12x32xf32> -> vector<12x32xf32>
    %c0_115 = arith.constant 0 : index
    %c0_116 = arith.constant 0 : index
    %133 = vector.load %arg40[%c0_115, %c0_116] : memref<1x32xf32, #tpu.memory_space<vmem>>, vector<1x32xf32>
    %134 = vector.broadcast %133 : vector<1x32xf32> to vector<12x32xf32>
    %135 = arith.addf %132, %134 : vector<12x32xf32>
    %cst_117 = arith.constant 0.000000e+00 : f32
    %136 = vector.broadcast %cst_117 : f32 to vector<12x32xf32>
    %137 = arith.maximumf %135, %136 : vector<12x32xf32>
    %c0_118 = arith.constant 0 : index
    %c0_119 = arith.constant 0 : index
    %138 = vector.load %arg41[%c0_118, %c0_119] : memref<32x32xf32, #tpu.memory_space<vmem>>, vector<32x32xf32>
    %cst_120 = arith.constant dense<0.000000e+00> : vector<12x32xf32>
    %139 = tpu.matmul %137, %138, %cst_120 {dimension_numbers = #tpu.dot_dimension_numbers<[1], [0], [0], [1], [0, 0, 1, 1], [], []>} : vector<12x32xf32>, vector<32x32xf32>, vector<12x32xf32> -> vector<12x32xf32>
    %c0_121 = arith.constant 0 : index
    %c0_122 = arith.constant 0 : index
    %140 = vector.load %arg42[%c0_121, %c0_122] : memref<1x32xf32, #tpu.memory_space<vmem>>, vector<1x32xf32>
    %141 = vector.broadcast %140 : vector<1x32xf32> to vector<12x32xf32>
    %142 = arith.addf %139, %141 : vector<12x32xf32>
    %cst_123 = arith.constant 0.000000e+00 : f32
    %143 = vector.broadcast %cst_123 : f32 to vector<12x32xf32>
    %144 = arith.maximumf %142, %143 : vector<12x32xf32>
    %c0_124 = arith.constant 0 : index
    %c0_125 = arith.constant 0 : index
    %145 = vector.load %arg43[%c0_124, %c0_125] : memref<32x32xf32, #tpu.memory_space<vmem>>, vector<32x32xf32>
    %cst_126 = arith.constant dense<0.000000e+00> : vector<12x32xf32>
    %146 = tpu.matmul %144, %145, %cst_126 {dimension_numbers = #tpu.dot_dimension_numbers<[1], [0], [0], [1], [0, 0, 1, 1], [], []>} : vector<12x32xf32>, vector<32x32xf32>, vector<12x32xf32> -> vector<12x32xf32>
    %c0_127 = arith.constant 0 : index
    %c0_128 = arith.constant 0 : index
    %147 = vector.load %arg44[%c0_127, %c0_128] : memref<1x32xf32, #tpu.memory_space<vmem>>, vector<1x32xf32>
    %148 = vector.broadcast %147 : vector<1x32xf32> to vector<12x32xf32>
    %149 = arith.addf %146, %148 : vector<12x32xf32>
    %cst_129 = arith.constant 0.000000e+00 : f32
    %150 = vector.broadcast %cst_129 : f32 to vector<12x32xf32>
    %151 = arith.maximumf %149, %150 : vector<12x32xf32>
    %c0_130 = arith.constant 0 : index
    %c0_131 = arith.constant 0 : index
    %152 = vector.load %arg32[%c0_130, %c0_131] : memref<1x32xf32, #tpu.memory_space<vmem>>, vector<1x32xf32>
    %153 = vector.broadcast %3 : vector<32x1xf32> to vector<32x32xf32>
    %154 = vector.broadcast %152 : vector<1x32xf32> to vector<32x32xf32>
    %155 = arith.mulf %153, %154 : vector<32x32xf32>
    %c0_132 = arith.constant 0 : index
    %c0_133 = arith.constant 0 : index
    %156 = vector.load %arg10[%c0_132, %c0_133] : memref<32x12xf32, #tpu.memory_space<vmem>>, vector<32x12xf32>
    %cst_134 = arith.constant dense<0.000000e+00> : vector<32x32xf32>
    %157 = tpu.matmul %156, %151, %cst_134 {dimension_numbers = #tpu.dot_dimension_numbers<[1], [0], [0], [1], [0, 0, 1, 1], [], []>} : vector<32x12xf32>, vector<12x32xf32>, vector<32x32xf32> -> vector<32x32xf32>
    %c0_135 = arith.constant 0 : index
    %c0_136 = arith.constant 0 : index
    %158 = vector.load %arg33[%c0_135, %c0_136] : memref<32x32xf32, #tpu.memory_space<vmem>>, vector<32x32xf32>
    %cst_137 = arith.constant dense<0.000000e+00> : vector<32x32xf32>
    %159 = tpu.matmul %157, %158, %cst_137 {dimension_numbers = #tpu.dot_dimension_numbers<[1], [0], [0], [1], [0, 0, 1, 1], [], []>} : vector<32x32xf32>, vector<32x32xf32>, vector<32x32xf32> -> vector<32x32xf32>
    %160 = arith.addf %155, %159 : vector<32x32xf32>
    %c0_138 = arith.constant 0 : index
    %c0_139 = arith.constant 0 : index
    %161 = vector.load %arg34[%c0_138, %c0_139] : memref<1x32xf32, #tpu.memory_space<vmem>>, vector<1x32xf32>
    %162 = vector.broadcast %161 : vector<1x32xf32> to vector<32x32xf32>
    %163 = arith.addf %160, %162 : vector<32x32xf32>
    %cst_140 = arith.constant 0.000000e+00 : f32
    %164 = vector.broadcast %cst_140 : f32 to vector<32x32xf32>
    %165 = arith.maximumf %163, %164 : vector<32x32xf32>
    %c0_141 = arith.constant 0 : index
    %c0_142 = arith.constant 0 : index
    %166 = vector.load %arg35[%c0_141, %c0_142] : memref<32x32xf32, #tpu.memory_space<vmem>>, vector<32x32xf32>
    %cst_143 = arith.constant dense<0.000000e+00> : vector<32x32xf32>
    %167 = tpu.matmul %165, %166, %cst_143 {dimension_numbers = #tpu.dot_dimension_numbers<[1], [0], [0], [1], [0, 0, 1, 1], [], []>} : vector<32x32xf32>, vector<32x32xf32>, vector<32x32xf32> -> vector<32x32xf32>
    %c0_144 = arith.constant 0 : index
    %c0_145 = arith.constant 0 : index
    %168 = vector.load %arg36[%c0_144, %c0_145] : memref<1x32xf32, #tpu.memory_space<vmem>>, vector<1x32xf32>
    %169 = vector.broadcast %168 : vector<1x32xf32> to vector<32x32xf32>
    %170 = arith.addf %167, %169 : vector<32x32xf32>
    %cst_146 = arith.constant 0.000000e+00 : f32
    %171 = vector.broadcast %cst_146 : f32 to vector<32x32xf32>
    %172 = arith.maximumf %170, %171 : vector<32x32xf32>
    %c0_147 = arith.constant 0 : index
    %c0_148 = arith.constant 0 : index
    %173 = vector.load %arg37[%c0_147, %c0_148] : memref<32x32xf32, #tpu.memory_space<vmem>>, vector<32x32xf32>
    %cst_149 = arith.constant dense<0.000000e+00> : vector<32x32xf32>
    %174 = tpu.matmul %172, %173, %cst_149 {dimension_numbers = #tpu.dot_dimension_numbers<[1], [0], [0], [1], [0, 0, 1, 1], [], []>} : vector<32x32xf32>, vector<32x32xf32>, vector<32x32xf32> -> vector<32x32xf32>
    %c0_150 = arith.constant 0 : index
    %c0_151 = arith.constant 0 : index
    %175 = vector.load %arg38[%c0_150, %c0_151] : memref<1x32xf32, #tpu.memory_space<vmem>>, vector<1x32xf32>
    %176 = vector.broadcast %175 : vector<1x32xf32> to vector<32x32xf32>
    %177 = arith.addf %174, %176 : vector<32x32xf32>
    %cst_152 = arith.constant 0.000000e+00 : f32
    %178 = vector.broadcast %cst_152 : f32 to vector<32x32xf32>
    %179 = arith.maximumf %177, %178 : vector<32x32xf32>
    %c0_153 = arith.constant 0 : index
    %c0_154 = arith.constant 0 : index
    %180 = vector.load %arg6[%c0_153, %c0_154] : memref<4x32xf32, #tpu.memory_space<vmem>>, vector<4x32xf32>
    %cst_155 = arith.constant dense<0.000000e+00> : vector<4x32xf32>
    %181 = tpu.matmul %180, %179, %cst_155 {dimension_numbers = #tpu.dot_dimension_numbers<[1], [0], [0], [1], [0, 0, 1, 1], [], []>} : vector<4x32xf32>, vector<32x32xf32>, vector<4x32xf32> -> vector<4x32xf32>
    %c0_156 = arith.constant 0 : index
    %c0_157 = arith.constant 0 : index
    %182 = vector.load %arg45[%c0_156, %c0_157] : memref<32x32xf32, #tpu.memory_space<vmem>>, vector<32x32xf32>
    %cst_158 = arith.constant dense<0.000000e+00> : vector<4x32xf32>
    %183 = tpu.matmul %181, %182, %cst_158 {dimension_numbers = #tpu.dot_dimension_numbers<[1], [0], [0], [1], [0, 0, 1, 1], [], []>} : vector<4x32xf32>, vector<32x32xf32>, vector<4x32xf32> -> vector<4x32xf32>
    %c0_159 = arith.constant 0 : index
    %c0_160 = arith.constant 0 : index
    %184 = vector.load %arg46[%c0_159, %c0_160] : memref<1x32xf32, #tpu.memory_space<vmem>>, vector<1x32xf32>
    %185 = vector.broadcast %184 : vector<1x32xf32> to vector<4x32xf32>
    %186 = arith.addf %183, %185 : vector<4x32xf32>
    %cst_161 = arith.constant 0.000000e+00 : f32
    %187 = vector.broadcast %cst_161 : f32 to vector<4x32xf32>
    %188 = arith.maximumf %186, %187 : vector<4x32xf32>
    %c0_162 = arith.constant 0 : index
    %c0_163 = arith.constant 0 : index
    %189 = vector.load %arg47[%c0_162, %c0_163] : memref<32x32xf32, #tpu.memory_space<vmem>>, vector<32x32xf32>
    %cst_164 = arith.constant dense<0.000000e+00> : vector<4x32xf32>
    %190 = tpu.matmul %188, %189, %cst_164 {dimension_numbers = #tpu.dot_dimension_numbers<[1], [0], [0], [1], [0, 0, 1, 1], [], []>} : vector<4x32xf32>, vector<32x32xf32>, vector<4x32xf32> -> vector<4x32xf32>
    %c0_165 = arith.constant 0 : index
    %c0_166 = arith.constant 0 : index
    %191 = vector.load %arg48[%c0_165, %c0_166] : memref<1x32xf32, #tpu.memory_space<vmem>>, vector<1x32xf32>
    %192 = vector.broadcast %191 : vector<1x32xf32> to vector<4x32xf32>
    %193 = arith.addf %190, %192 : vector<4x32xf32>
    %cst_167 = arith.constant 0.000000e+00 : f32
    %194 = vector.broadcast %cst_167 : f32 to vector<4x32xf32>
    %195 = arith.maximumf %193, %194 : vector<4x32xf32>
    %c0_168 = arith.constant 0 : index
    %c0_169 = arith.constant 0 : index
    %196 = vector.load %arg49[%c0_168, %c0_169] : memref<32x32xf32, #tpu.memory_space<vmem>>, vector<32x32xf32>
    %cst_170 = arith.constant dense<0.000000e+00> : vector<4x32xf32>
    %197 = tpu.matmul %195, %196, %cst_170 {dimension_numbers = #tpu.dot_dimension_numbers<[1], [0], [0], [1], [0, 0, 1, 1], [], []>} : vector<4x32xf32>, vector<32x32xf32>, vector<4x32xf32> -> vector<4x32xf32>
    %c0_171 = arith.constant 0 : index
    %c0_172 = arith.constant 0 : index
    %198 = vector.load %arg50[%c0_171, %c0_172] : memref<1x32xf32, #tpu.memory_space<vmem>>, vector<1x32xf32>
    %199 = vector.broadcast %198 : vector<1x32xf32> to vector<4x32xf32>
    %200 = arith.addf %197, %199 : vector<4x32xf32>
    %cst_173 = arith.constant 0.000000e+00 : f32
    %201 = vector.broadcast %cst_173 : f32 to vector<4x32xf32>
    %202 = arith.maximumf %200, %201 : vector<4x32xf32>
    %c0_174 = arith.constant 0 : index
    %c0_175 = arith.constant 0 : index
    %203 = vector.load %arg11[%c0_174, %c0_175] : memref<16x4xf32, #tpu.memory_space<vmem>>, vector<16x4xf32>
    %cst_176 = arith.constant dense<0.000000e+00> : vector<16x32xf32>
    %204 = tpu.matmul %203, %202, %cst_176 {dimension_numbers = #tpu.dot_dimension_numbers<[1], [0], [0], [1], [0, 0, 1, 1], [], []>} : vector<16x4xf32>, vector<4x32xf32>, vector<16x32xf32> -> vector<16x32xf32>
    %c0_177 = arith.constant 0 : index
    %c0_178 = arith.constant 0 : index
    %205 = vector.load %arg25[%c0_177, %c0_178] : memref<32x32xf32, #tpu.memory_space<vmem>>, vector<32x32xf32>
    %cst_179 = arith.constant dense<0.000000e+00> : vector<16x32xf32>
    %206 = tpu.matmul %204, %205, %cst_179 {dimension_numbers = #tpu.dot_dimension_numbers<[1], [0], [0], [1], [0, 0, 1, 1], [], []>} : vector<16x32xf32>, vector<32x32xf32>, vector<16x32xf32> -> vector<16x32xf32>
    %c0_180 = arith.constant 0 : index
    %c0_181 = arith.constant 0 : index
    %207 = vector.load %arg7[%c0_180, %c0_181] : memref<16x12xf32, #tpu.memory_space<vmem>>, vector<16x12xf32>
    %cst_182 = arith.constant dense<0.000000e+00> : vector<16x32xf32>
    %208 = tpu.matmul %207, %151, %cst_182 {dimension_numbers = #tpu.dot_dimension_numbers<[1], [0], [0], [1], [0, 0, 1, 1], [], []>} : vector<16x12xf32>, vector<12x32xf32>, vector<16x32xf32> -> vector<16x32xf32>
    %c0_183 = arith.constant 0 : index
    %c0_184 = arith.constant 0 : index
    %209 = vector.load %arg26[%c0_183, %c0_184] : memref<32x32xf32, #tpu.memory_space<vmem>>, vector<32x32xf32>
    %cst_185 = arith.constant dense<0.000000e+00> : vector<16x32xf32>
    %210 = tpu.matmul %208, %209, %cst_185 {dimension_numbers = #tpu.dot_dimension_numbers<[1], [0], [0], [1], [0, 0, 1, 1], [], []>} : vector<16x32xf32>, vector<32x32xf32>, vector<16x32xf32> -> vector<16x32xf32>
    %211 = arith.addf %206, %210 : vector<16x32xf32>
    %c0_186 = arith.constant 0 : index
    %c0_187 = arith.constant 0 : index
    %212 = vector.load %arg27[%c0_186, %c0_187] : memref<1x32xf32, #tpu.memory_space<vmem>>, vector<1x32xf32>
    %213 = vector.broadcast %212 : vector<1x32xf32> to vector<16x32xf32>
    %214 = arith.addf %211, %213 : vector<16x32xf32>
    %cst_188 = arith.constant 0.000000e+00 : f32
    %215 = vector.broadcast %cst_188 : f32 to vector<16x32xf32>
    %216 = arith.maximumf %214, %215 : vector<16x32xf32>
    %c0_189 = arith.constant 0 : index
    %c0_190 = arith.constant 0 : index
    %217 = vector.load %arg28[%c0_189, %c0_190] : memref<32x32xf32, #tpu.memory_space<vmem>>, vector<32x32xf32>
    %cst_191 = arith.constant dense<0.000000e+00> : vector<16x32xf32>
    %218 = tpu.matmul %216, %217, %cst_191 {dimension_numbers = #tpu.dot_dimension_numbers<[1], [0], [0], [1], [0, 0, 1, 1], [], []>} : vector<16x32xf32>, vector<32x32xf32>, vector<16x32xf32> -> vector<16x32xf32>
    %c0_192 = arith.constant 0 : index
    %c0_193 = arith.constant 0 : index
    %219 = vector.load %arg29[%c0_192, %c0_193] : memref<1x32xf32, #tpu.memory_space<vmem>>, vector<1x32xf32>
    %220 = vector.broadcast %219 : vector<1x32xf32> to vector<16x32xf32>
    %221 = arith.addf %218, %220 : vector<16x32xf32>
    %cst_194 = arith.constant 0.000000e+00 : f32
    %222 = vector.broadcast %cst_194 : f32 to vector<16x32xf32>
    %223 = arith.maximumf %221, %222 : vector<16x32xf32>
    %c0_195 = arith.constant 0 : index
    %c0_196 = arith.constant 0 : index
    %224 = vector.load %arg30[%c0_195, %c0_196] : memref<32x1xf32, #tpu.memory_space<vmem>>, vector<32x1xf32>
    %cst_197 = arith.constant dense<0.000000e+00> : vector<16x1xf32>
    %225 = tpu.matmul %223, %224, %cst_197 {dimension_numbers = #tpu.dot_dimension_numbers<[1], [0], [0], [1], [0, 0, 1, 1], [], []>} : vector<16x32xf32>, vector<32x1xf32>, vector<16x1xf32> -> vector<16x1xf32>
    %c0_198 = arith.constant 0 : index
    %c0_199 = arith.constant 0 : index
    %226 = vector.load %arg31[%c0_198, %c0_199] : memref<1x1xf32, #tpu.memory_space<vmem>>, vector<1x1xf32>
    %227 = vector.broadcast %226 : vector<1x1xf32> to vector<16x1xf32>
    %228 = arith.addf %225, %227 : vector<16x1xf32>
    %c0_200 = arith.constant 0 : index
    %c0_201 = arith.constant 0 : index
    %c0_202 = arith.constant 0 : index
    %229 = vector.load %arg70[%c0_200, %c0_201, %c0_202] : memref<1x16x1xf32, #tpu.memory_space<vmem>>, vector<1x16x1xf32>
    %230 = vector.shape_cast %229 : vector<1x16x1xf32> to vector<16x1xf32>
    %231 = vector.shape_cast %228 : vector<16x1xf32> to vector<1x16x1xf32>
    tpu.vector_store %arg70[%c0_200, %c0_201, %c0_202], %231 {strides = array<i32>} : memref<1x16x1xf32, #tpu.memory_space<vmem>>, vector<1x16x1xf32>,
    return
  }
  func.func @transform_0(%arg0: i32) -> (i32, i32, i32) {
    %c0_i32 = arith.constant 0 : i32
    %c0_i32_0 = arith.constant 0 : i32
    %c0_i32_1 = arith.constant 0 : i32
    return %arg0, %c0_i32, %c0_i32_0 : i32, i32, i32
  }
  func.func @transform_1(%arg0: i32) -> (i32, i32, i32) {
    %c0_i32 = arith.constant 0 : i32
    %c0_i32_0 = arith.constant 0 : i32
    %c0_i32_1 = arith.constant 0 : i32
    return %arg0, %c0_i32, %c0_i32_0 : i32, i32, i32
  }
  func.func @transform_2(%arg0: i32) -> (i32, i32) {
    %c0_i32 = arith.constant 0 : i32
    %c0_i32_0 = arith.constant 0 : i32
    %c0_i32_1 = arith.constant 0 : i32
    return %c0_i32, %c0_i32_0 : i32, i32
  }
  func.func @transform_3(%arg0: i32) -> (i32, i32) {
    %c0_i32 = arith.constant 0 : i32
    %c0_i32_0 = arith.constant 0 : i32
    %c0_i32_1 = arith.constant 0 : i32
    return %c0_i32, %c0_i32_0 : i32, i32
  }
  func.func @transform_4(%arg0: i32) -> (i32, i32) {
    %c0_i32 = arith.constant 0 : i32
    %c0_i32_0 = arith.constant 0 : i32
    %c0_i32_1 = arith.constant 0 : i32
    return %c0_i32, %c0_i32_0 : i32, i32
  }
  func.func @transform_5(%arg0: i32) -> (i32, i32) {
    %c0_i32 = arith.constant 0 : i32
    %c0_i32_0 = arith.constant 0 : i32
    %c0_i32_1 = arith.constant 0 : i32
    return %c0_i32, %c0_i32_0 : i32, i32
  }
  func.func @transform_6(%arg0: i32) -> (i32, i32) {
    %c0_i32 = arith.constant 0 : i32
    %c0_i32_0 = arith.constant 0 : i32
    %c0_i32_1 = arith.constant 0 : i32
    return %c0_i32, %c0_i32_0 : i32, i32
  }
  func.func @transform_7(%arg0: i32) -> (i32, i32) {
    %c0_i32 = arith.constant 0 : i32
    %c0_i32_0 = arith.constant 0 : i32
    %c0_i32_1 = arith.constant 0 : i32
    return %c0_i32, %c0_i32_0 : i32, i32
  }
  func.func @transform_8(%arg0: i32) -> (i32, i32) {
    %c0_i32 = arith.constant 0 : i32
    %c0_i32_0 = arith.constant 0 : i32
    %c0_i32_1 = arith.constant 0 : i32
    return %c0_i32, %c0_i32_0 : i32, i32
  }
  func.func @transform_9(%arg0: i32) -> (i32, i32) {
    %c0_i32 = arith.constant 0 : i32
    %c0_i32_0 = arith.constant 0 : i32
    %c0_i32_1 = arith.constant 0 : i32
    return %c0_i32, %c0_i32_0 : i32, i32
  }
  func.func @transform_10(%arg0: i32) -> (i32, i32) {
    %c0_i32 = arith.constant 0 : i32
    %c0_i32_0 = arith.constant 0 : i32
    %c0_i32_1 = arith.constant 0 : i32
    return %c0_i32, %c0_i32_0 : i32, i32
  }
  func.func @transform_11(%arg0: i32) -> (i32, i32) {
    %c0_i32 = arith.constant 0 : i32
    %c0_i32_0 = arith.constant 0 : i32
    %c0_i32_1 = arith.constant 0 : i32
    return %c0_i32, %c0_i32_0 : i32, i32
  }
  func.func @transform_12(%arg0: i32) -> (i32, i32) {
    %c0_i32 = arith.constant 0 : i32
    %c0_i32_0 = arith.constant 0 : i32
    %c0_i32_1 = arith.constant 0 : i32
    return %c0_i32, %c0_i32_0 : i32, i32
  }
  func.func @transform_13(%arg0: i32) -> (i32, i32) {
    %c0_i32 = arith.constant 0 : i32
    %c0_i32_0 = arith.constant 0 : i32
    %c0_i32_1 = arith.constant 0 : i32
    return %c0_i32, %c0_i32_0 : i32, i32
  }
  func.func @transform_14(%arg0: i32) -> (i32, i32) {
    %c0_i32 = arith.constant 0 : i32
    %c0_i32_0 = arith.constant 0 : i32
    %c0_i32_1 = arith.constant 0 : i32
    return %c0_i32, %c0_i32_0 : i32, i32
  }
  func.func @transform_15(%arg0: i32) -> (i32, i32) {
    %c0_i32 = arith.constant 0 : i32
    %c0_i32_0 = arith.constant 0 : i32
    %c0_i32_1 = arith.constant 0 : i32
    return %c0_i32, %c0_i32_0 : i32, i32
  }
  func.func @transform_16(%arg0: i32) -> (i32, i32) {
    %c0_i32 = arith.constant 0 : i32
    %c0_i32_0 = arith.constant 0 : i32
    %c0_i32_1 = arith.constant 0 : i32
    return %c0_i32, %c0_i32_0 : i32, i32
  }
  func.func @transform_17(%arg0: i32) -> (i32, i32) {
    %c0_i32 = arith.constant 0 : i32
    %c0_i32_0 = arith.constant 0 : i32
    %c0_i32_1 = arith.constant 0 : i32
    return %c0_i32, %c0_i32_0 : i32, i32
  }
  func.func @transform_18(%arg0: i32) -> (i32, i32) {
    %c0_i32 = arith.constant 0 : i32
    %c0_i32_0 = arith.constant 0 : i32
    %c0_i32_1 = arith.constant 0 : i32
    return %c0_i32, %c0_i32_0 : i32, i32
  }
  func.func @transform_19(%arg0: i32) -> (i32, i32) {
    %c0_i32 = arith.constant 0 : i32
    %c0_i32_0 = arith.constant 0 : i32
    %c0_i32_1 = arith.constant 0 : i32
    return %c0_i32, %c0_i32_0 : i32, i32
  }
  func.func @transform_20(%arg0: i32) -> (i32, i32) {
    %c0_i32 = arith.constant 0 : i32
    %c0_i32_0 = arith.constant 0 : i32
    %c0_i32_1 = arith.constant 0 : i32
    return %c0_i32, %c0_i32_0 : i32, i32
  }
  func.func @transform_21(%arg0: i32) -> (i32, i32) {
    %c0_i32 = arith.constant 0 : i32
    %c0_i32_0 = arith.constant 0 : i32
    %c0_i32_1 = arith.constant 0 : i32
    return %c0_i32, %c0_i32_0 : i32, i32
  }
  func.func @transform_22(%arg0: i32) -> (i32, i32) {
    %c0_i32 = arith.constant 0 : i32
    %c0_i32_0 = arith.constant 0 : i32
    %c0_i32_1 = arith.constant 0 : i32
    return %c0_i32, %c0_i32_0 : i32, i32
  }
  func.func @transform_23(%arg0: i32) -> (i32, i32) {
    %c0_i32 = arith.constant 0 : i32
    %c0_i32_0 = arith.constant 0 : i32
    %c0_i32_1 = arith.constant 0 : i32
    return %c0_i32, %c0_i32_0 : i32, i32
  }
  func.func @transform_24(%arg0: i32) -> (i32, i32) {
    %c0_i32 = arith.constant 0 : i32
    %c0_i32_0 = arith.constant 0 : i32
    %c0_i32_1 = arith.constant 0 : i32
    return %c0_i32, %c0_i32_0 : i32, i32
  }
  func.func @transform_25(%arg0: i32) -> (i32, i32) {
    %c0_i32 = arith.constant 0 : i32
    %c0_i32_0 = arith.constant 0 : i32
    %c0_i32_1 = arith.constant 0 : i32
    return %c0_i32, %c0_i32_0 : i32, i32
  }
  func.func @transform_26(%arg0: i32) -> (i32, i32) {
    %c0_i32 = arith.constant 0 : i32
    %c0_i32_0 = arith.constant 0 : i32
    %c0_i32_1 = arith.constant 0 : i32
    return %c0_i32, %c0_i32_0 : i32, i32
  }
  func.func @transform_27(%arg0: i32) -> (i32, i32) {
    %c0_i32 = arith.constant 0 : i32
    %c0_i32_0 = arith.constant 0 : i32
    %c0_i32_1 = arith.constant 0 : i32
    return %c0_i32, %c0_i32_0 : i32, i32
  }
  func.func @transform_28(%arg0: i32) -> (i32, i32) {
    %c0_i32 = arith.constant 0 : i32
    %c0_i32_0 = arith.constant 0 : i32
    %c0_i32_1 = arith.constant 0 : i32
    return %c0_i32, %c0_i32_0 : i32, i32
  }
  func.func @transform_29(%arg0: i32) -> (i32, i32) {
    %c0_i32 = arith.constant 0 : i32
    %c0_i32_0 = arith.constant 0 : i32
    %c0_i32_1 = arith.constant 0 : i32
    return %c0_i32, %c0_i32_0 : i32, i32
  }
  func.func @transform_30(%arg0: i32) -> (i32, i32) {
    %c0_i32 = arith.constant 0 : i32
    %c0_i32_0 = arith.constant 0 : i32
    %c0_i32_1 = arith.constant 0 : i32
    return %c0_i32, %c0_i32_0 : i32, i32
  }
  func.func @transform_31(%arg0: i32) -> (i32, i32) {
    %c0_i32 = arith.constant 0 : i32
    %c0_i32_0 = arith.constant 0 : i32
    %c0_i32_1 = arith.constant 0 : i32
    return %c0_i32, %c0_i32_0 : i32, i32
  }
  func.func @transform_32(%arg0: i32) -> (i32, i32) {
    %c0_i32 = arith.constant 0 : i32
    %c0_i32_0 = arith.constant 0 : i32
    %c0_i32_1 = arith.constant 0 : i32
    return %c0_i32, %c0_i32_0 : i32, i32
  }
  func.func @transform_33(%arg0: i32) -> (i32, i32) {
    %c0_i32 = arith.constant 0 : i32
    %c0_i32_0 = arith.constant 0 : i32
    %c0_i32_1 = arith.constant 0 : i32
    return %c0_i32, %c0_i32_0 : i32, i32
  }
  func.func @transform_34(%arg0: i32) -> (i32, i32) {
    %c0_i32 = arith.constant 0 : i32
    %c0_i32_0 = arith.constant 0 : i32
    %c0_i32_1 = arith.constant 0 : i32
    return %c0_i32, %c0_i32_0 : i32, i32
  }
  func.func @transform_35(%arg0: i32) -> (i32, i32) {
    %c0_i32 = arith.constant 0 : i32
    %c0_i32_0 = arith.constant 0 : i32
    %c0_i32_1 = arith.constant 0 : i32
    return %c0_i32, %c0_i32_0 : i32, i32
  }
  func.func @transform_36(%arg0: i32) -> (i32, i32) {
    %c0_i32 = arith.constant 0 : i32
    %c0_i32_0 = arith.constant 0 : i32
    %c0_i32_1 = arith.constant 0 : i32
    return %c0_i32, %c0_i32_0 : i32, i32
  }
  func.func @transform_37(%arg0: i32) -> (i32, i32) {
    %c0_i32 = arith.constant 0 : i32
    %c0_i32_0 = arith.constant 0 : i32
    %c0_i32_1 = arith.constant 0 : i32
    return %c0_i32, %c0_i32_0 : i32, i32
  }
  func.func @transform_38(%arg0: i32) -> (i32, i32) {
    %c0_i32 = arith.constant 0 : i32
    %c0_i32_0 = arith.constant 0 : i32
    %c0_i32_1 = arith.constant 0 : i32
    return %c0_i32, %c0_i32_0 : i32, i32
  }
  func.func @transform_39(%arg0: i32) -> (i32, i32) {
    %c0_i32 = arith.constant 0 : i32
    %c0_i32_0 = arith.constant 0 : i32
    %c0_i32_1 = arith.constant 0 : i32
    return %c0_i32, %c0_i32_0 : i32, i32
  }
  func.func @transform_40(%arg0: i32) -> (i32, i32) {
    %c0_i32 = arith.constant 0 : i32
    %c0_i32_0 = arith.constant 0 : i32
    %c0_i32_1 = arith.constant 0 : i32
    return %c0_i32, %c0_i32_0 : i32, i32
  }
  func.func @transform_41(%arg0: i32) -> (i32, i32) {
    %c0_i32 = arith.constant 0 : i32
    %c0_i32_0 = arith.constant 0 : i32
    %c0_i32_1 = arith.constant 0 : i32
    return %c0_i32, %c0_i32_0 : i32, i32
  }
  func.func @transform_42(%arg0: i32) -> (i32, i32) {
    %c0_i32 = arith.constant 0 : i32
    %c0_i32_0 = arith.constant 0 : i32
    %c0_i32_1 = arith.constant 0 : i32
    return %c0_i32, %c0_i32_0 : i32, i32
  }
  func.func @transform_43(%arg0: i32) -> (i32, i32) {
    %c0_i32 = arith.constant 0 : i32
    %c0_i32_0 = arith.constant 0 : i32
    %c0_i32_1 = arith.constant 0 : i32
    return %c0_i32, %c0_i32_0 : i32, i32
  }
  func.func @transform_44(%arg0: i32) -> (i32, i32) {
    %c0_i32 = arith.constant 0 : i32
    %c0_i32_0 = arith.constant 0 : i32
    %c0_i32_1 = arith.constant 0 : i32
    return %c0_i32, %c0_i32_0 : i32, i32
  }
  func.func @transform_45(%arg0: i32) -> (i32, i32) {
    %c0_i32 = arith.constant 0 : i32
    %c0_i32_0 = arith.constant 0 : i32
    %c0_i32_1 = arith.constant 0 : i32
    return %c0_i32, %c0_i32_0 : i32, i32
  }
  func.func @transform_46(%arg0: i32) -> (i32, i32) {
    %c0_i32 = arith.constant 0 : i32
    %c0_i32_0 = arith.constant 0 : i32
    %c0_i32_1 = arith.constant 0 : i32
    return %c0_i32, %c0_i32_0 : i32, i32
  }
  func.func @transform_47(%arg0: i32) -> (i32, i32) {
    %c0_i32 = arith.constant 0 : i32
    %c0_i32_0 = arith.constant 0 : i32
    %c0_i32_1 = arith.constant 0 : i32
    return %c0_i32, %c0_i32_0 : i32, i32
  }
  func.func @transform_48(%arg0: i32) -> (i32, i32) {
    %c0_i32 = arith.constant 0 : i32
    %c0_i32_0 = arith.constant 0 : i32
    %c0_i32_1 = arith.constant 0 : i32
    return %c0_i32, %c0_i32_0 : i32, i32
  }
  func.func @transform_49(%arg0: i32) -> (i32, i32) {
    %c0_i32 = arith.constant 0 : i32
    %c0_i32_0 = arith.constant 0 : i32
    %c0_i32_1 = arith.constant 0 : i32
    return %c0_i32, %c0_i32_0 : i32, i32
  }
  func.func @transform_50(%arg0: i32) -> (i32, i32) {
    %c0_i32 = arith.constant 0 : i32
    %c0_i32_0 = arith.constant 0 : i32
    %c0_i32_1 = arith.constant 0 : i32
    return %c0_i32, %c0_i32_0 : i32, i32
  }
  func.func @transform_51(%arg0: i32) -> (i32, i32) {
    %c0_i32 = arith.constant 0 : i32
    %c0_i32_0 = arith.constant 0 : i32
    %c0_i32_1 = arith.constant 0 : i32
    return %c0_i32, %c0_i32_0 : i32, i32
  }
  func.func @transform_52(%arg0: i32) -> (i32, i32) {
    %c0_i32 = arith.constant 0 : i32
    %c0_i32_0 = arith.constant 0 : i32
    %c0_i32_1 = arith.constant 0 : i32
    return %c0_i32, %c0_i32_0 : i32, i32
  }
  func.func @transform_53(%arg0: i32) -> (i32, i32) {
    %c0_i32 = arith.constant 0 : i32
    %c0_i32_0 = arith.constant 0 : i32
    %c0_i32_1 = arith.constant 0 : i32
    return %c0_i32, %c0_i32_0 : i32, i32
  }
  func.func @transform_54(%arg0: i32) -> (i32, i32) {
    %c0_i32 = arith.constant 0 : i32
    %c0_i32_0 = arith.constant 0 : i32
    %c0_i32_1 = arith.constant 0 : i32
    return %c0_i32, %c0_i32_0 : i32, i32
  }
  func.func @transform_55(%arg0: i32) -> (i32, i32) {
    %c0_i32 = arith.constant 0 : i32
    %c0_i32_0 = arith.constant 0 : i32
    %c0_i32_1 = arith.constant 0 : i32
    return %c0_i32, %c0_i32_0 : i32, i32
  }
  func.func @transform_56(%arg0: i32) -> (i32, i32) {
    %c0_i32 = arith.constant 0 : i32
    %c0_i32_0 = arith.constant 0 : i32
    %c0_i32_1 = arith.constant 0 : i32
    return %c0_i32, %c0_i32_0 : i32, i32
  }
  func.func @transform_57(%arg0: i32) -> (i32, i32) {
    %c0_i32 = arith.constant 0 : i32
    %c0_i32_0 = arith.constant 0 : i32
    %c0_i32_1 = arith.constant 0 : i32
    return %c0_i32, %c0_i32_0 : i32, i32
  }
  func.func @transform_58(%arg0: i32) -> (i32, i32) {
    %c0_i32 = arith.constant 0 : i32
    %c0_i32_0 = arith.constant 0 : i32
    %c0_i32_1 = arith.constant 0 : i32
    return %c0_i32, %c0_i32_0 : i32, i32
  }
  func.func @transform_59(%arg0: i32) -> (i32, i32) {
    %c0_i32 = arith.constant 0 : i32
    %c0_i32_0 = arith.constant 0 : i32
    %c0_i32_1 = arith.constant 0 : i32
    return %c0_i32, %c0_i32_0 : i32, i32
  }
  func.func @transform_60(%arg0: i32) -> (i32, i32) {
    %c0_i32 = arith.constant 0 : i32
    %c0_i32_0 = arith.constant 0 : i32
    %c0_i32_1 = arith.constant 0 : i32
    return %c0_i32, %c0_i32_0 : i32, i32
  }
  func.func @transform_61(%arg0: i32) -> (i32, i32) {
    %c0_i32 = arith.constant 0 : i32
    %c0_i32_0 = arith.constant 0 : i32
    %c0_i32_1 = arith.constant 0 : i32
    return %c0_i32, %c0_i32_0 : i32, i32
  }
  func.func @transform_62(%arg0: i32) -> (i32, i32) {
    %c0_i32 = arith.constant 0 : i32
    %c0_i32_0 = arith.constant 0 : i32
    %c0_i32_1 = arith.constant 0 : i32
    return %c0_i32, %c0_i32_0 : i32, i32
  }
  func.func @transform_63(%arg0: i32) -> (i32, i32) {
    %c0_i32 = arith.constant 0 : i32
    %c0_i32_0 = arith.constant 0 : i32
    %c0_i32_1 = arith.constant 0 : i32
    return %c0_i32, %c0_i32_0 : i32, i32
  }
  func.func @transform_64(%arg0: i32) -> (i32, i32) {
    %c0_i32 = arith.constant 0 : i32
    %c0_i32_0 = arith.constant 0 : i32
    %c0_i32_1 = arith.constant 0 : i32
    return %c0_i32, %c0_i32_0 : i32, i32
  }
  func.func @transform_65(%arg0: i32) -> (i32, i32) {
    %c0_i32 = arith.constant 0 : i32
    %c0_i32_0 = arith.constant 0 : i32
    %c0_i32_1 = arith.constant 0 : i32
    return %c0_i32, %c0_i32_0 : i32, i32
  }
  func.func @transform_66(%arg0: i32) -> (i32, i32) {
    %c0_i32 = arith.constant 0 : i32
    %c0_i32_0 = arith.constant 0 : i32
    %c0_i32_1 = arith.constant 0 : i32
    return %c0_i32, %c0_i32_0 : i32, i32
  }
  func.func @transform_67(%arg0: i32) -> (i32, i32) {
    %c0_i32 = arith.constant 0 : i32
    %c0_i32_0 = arith.constant 0 : i32
    %c0_i32_1 = arith.constant 0 : i32
    return %c0_i32, %c0_i32_0 : i32, i32
  }
  func.func @transform_68(%arg0: i32) -> (i32, i32) {
    %c0_i32 = arith.constant 0 : i32
    %c0_i32_0 = arith.constant 0 : i32
    %c0_i32_1 = arith.constant 0 : i32
    return %c0_i32, %c0_i32_0 : i32, i32
  }
  func.func @transform_69(%arg0: i32) -> (i32, i32, i32) {
    %c0_i32 = arith.constant 0 : i32
    %c0_i32_0 = arith.constant 0 : i32
    %c0_i32_1 = arith.constant 0 : i32
    return %arg0, %c0_i32, %c0_i32_0 : i32, i32, i32
  }
}

</mosaic_0001>

<bundles_post_ra>
// kernel: hetnet_forward.1
= control target key start
LH: loop header
LB: loop body
LE: loop exit
PB: predicated region body
PF: predicated region fallthrough
CT: control target
= control target key end

     0   :  { %s9690_s6 = smov 1   ;;  %s9691_s10 = smov 2   ;;  %s11081_s0 = inlined_call_operand.smem [shape: u32[70], index: -1, kind: input, shape index: {}] }
   0x1   :  { %s9815_s5 = sld [smem:[%s11081_s0]]   ;;  %s9692_s14 = smov 3  }
   0x2   :  { %s9820_s9 = sld [smem:[%s11081_s0 + %s9690_s6]]   ;;  %s9693_s18 = smov 4  }
   0x3   :  { %s9825_s13 = sld [smem:[%s11081_s0 + %s9691_s10]]   ;;  %s9694_s22 = smov 5  }
   0x4   :  { %s9830_s17 = sld [smem:[%s11081_s0 + %s9692_s14]]   ;;  %s9695_s26 = smov 6  }
   0x5   :  { %s9835_s21 = sld [smem:[%s11081_s0 + %s9693_s18]]   ;;  %s9696_s30 = smov 7  }
   0x6   :  { %s9840_s25 = sld [smem:[%s11081_s0 + %s9694_s22]]   ;;  %s9697_s4 = smov 8  }
   0x7   :  { %11155 = sst [smem:[#allocation86_spill]] %s9815_s5  ;;  %s9698_s10 = smov 9  }
   0x8   :  { %11156 = sst [smem:[#allocation87_spill]] %s9820_s9  ;;  %s9699_s15 = smov 10  }
   0x9   :  { %11157 = sst [smem:[#allocation88_spill]] %s9825_s13  ;;  %s9700_s20 = smov 11  }
   0xa   :  { %11158 = sst [smem:[#allocation89_spill]] %s9830_s17  ;;  %s9702_s1 = smov 13  }
   0xb   :  { %11159 = sst [smem:[#allocation90_spill]] %s9835_s21  ;;  %s9703_s7 = smov 14  }
   0xc   :  { %s9845_s29 = sld [smem:[%s11081_s0 + %s9695_s26]]   ;;  %s9701_s26 = smov 12  }
   0xd   :  { %s9850_s3 = sld [smem:[%s11081_s0 + %s9696_s30]]   ;;  %s9705_s22 = smov 16  }
   0xe   :  { %s9855_s8 = sld [smem:[%s11081_s0 + %s9697_s4]]   ;;  %s9706_s28 = smov 17  }
   0xf   :  { %s9860_s14 = sld [smem:[%s11081_s0 + %s9698_s10]]   ;;  %s9720_s16 = smov 31  }
  0x10   :  { %s9865_s19 = sld [smem:[%s11081_s0 + %s9699_s15]]   ;;  %s9704_s15 = smov 15  }
  0x11   :  { %s9870_s24 = sld [smem:[%s11081_s0 + %s9700_s20]]   ;;  %s9721_s23 = smov 32  }
  0x12   :  { %11160 = sst [smem:[#allocation91_spill]] %s9845_s29  ;;  %s9723_s10 = smov 34  }
  0x13   :  { %11161 = sst [smem:[#allocation92_spill]] %s9850_s3 }
  0x14   :  { %11162 = sst [smem:[#allocation93_spill]] %s9855_s8 }
  0x15   :  { %11163 = sst [smem:[#allocation94_spill]] %s9860_s14 }
  0x16   :  { %11164 = sst [smem:[#allocation95_spill]] %s9865_s19 }
  0x17   :  { %s9875_s30 = sld [smem:[%s11081_s0 + %s9701_s26]]  }
  0x18   :  { %s9880_s6 = sld [smem:[%s11081_s0 + %s9702_s1]]   ;;  %s9722_s1 = smov 33  }
  0x19   :  { %s9885_s12 = sld [smem:[%s11081_s0 + %s9703_s7]]   ;;  %s9707_s7 = smov 18  }
  0x1a   :  { %s9890_s20 = sld [smem:[%s11081_s0 + %s9704_s15]]   ;;  %s9708_s15 = smov 19  }
  0x1b   :  { %s9895_s27 = sld [smem:[%s11081_s0 + %s9705_s22]]   ;;  %s9709_s22 = smov 20  }
  0x1c   :  { %s9900_s4 = sld [smem:[%s11081_s0 + %s9706_s28]]   ;;  %s9710_s28 = smov 21  }
  0x1d   :  { %11165 = sst [smem:[#allocation96_spill]] %s9875_s30 }
  0x1e   :  { %11166 = sst [smem:[#allocation97_spill]] %s9880_s6 }
  0x1f   :  { %11167 = sst [smem:[#allocation98_spill]] %s9885_s12 }
  0x20   :  { %s9905_s13 = sld [smem:[%s11081_s0 + %s9707_s7]]   ;;  %s9711_s7 = smov 22  }
  0x21   :  { %11168 = sst [smem:[#allocation99_spill]] %s9895_s27 }
  0x22   :  { %11169 = sst [smem:[#allocation100_spill]] %s9900_s4 }
  0x23   :  { %s9910_s3 = sld [smem:[%s11081_s0 + %s9708_s15]]   ;;  %s9712_s15 = smov 23  }
  0x24   :  { %s9915_s8 = sld [smem:[%s11081_s0 + %s9709_s22]]   ;;  %s9713_s22 = smov 24  }
  0x25   :  { %s9920_s4 = sld [smem:[%s11081_s0 + %s9710_s28]]   ;;  %s9714_s28 = smov 25  }
  0x26   :  { %11170 = sst [smem:[#allocation101_spill]] %s9905_s13 }
  0x27   :  { %s9925_s13 = sld [smem:[%s11081_s0 + %s9711_s7]]   ;;  %s9715_s7 = smov 26  }
  0x28   :  { %s9930_s21 = sld [smem:[%s11081_s0 + %s9712_s15]]   ;;  %s9716_s15 = smov 27  }
  0x29   :  { %11171 = sst [smem:[#allocation102_spill]] %s9910_s3 }
  0x2a   :  { %11172 = sst [smem:[#allocation103_spill]] %s9915_s8 }
  0x2b   :  { %11173 = sst [smem:[#allocation104_spill]] %s9920_s4 }
  0x2c   :  { %s9935_s9 = sld [smem:[%s11081_s0 + %s9713_s22]]   ;;  %s9717_s22 = smov 28  }
  0x2d   :  { %11174 = sst [smem:[#allocation105_spill]] %s9925_s13 }
  0x2e   :  { %s9940_s5 = sld [smem:[%s11081_s0 + %s9714_s28]]   ;;  %s9718_s28 = smov 29  }
  0x2f   :  { %s9945_s13 = sld [smem:[%s11081_s0 + %s9715_s7]]   ;;  %s9719_s7 = smov 30  }
  0x30   :  { %s9950_s8 = sld [smem:[%s11081_s0 + %s9716_s15]]   ;;  %s9728_s15 = smov 39  }
  0x31   :  { %s9968_s27 = sld [smem:[%s11081_s0 + %s9720_s16]]   ;;  %s9724_s16 = smov 35  }
  0x32   :  { %11175 = sst [smem:[#allocation106_spill]] %s9935_s9 }
  0x33   :  { %s9955_s9 = sld [smem:[%s11081_s0 + %s9717_s22]]  }
  0x34   :  { %11176 = sst [smem:[#allocation107_spill]] %s9940_s5 }
  0x35   :  { %11177 = sst [smem:[#allocation108_spill]] %s9945_s13 }
  0x36   :  { %11178 = sst [smem:[#allocation109_spill]] %s9950_s8 }
  0x37   :  { %s9960_s5 = sld [smem:[%s11081_s0 + %s9718_s28]]  }
  0x38   :  { %s6905_s13 = sld [smem:[%s11081_s0 + %s9719_s7]]  }
  0x39   :  { %11179 = sst [smem:[#allocation110_spill]] %s9955_s9 }
  0x3a   :  { %11181 = sst [smem:[#allocation112_spill]] %s9968_s27 }
  0x3b   :  { %s9973_s9 = sld [smem:[%s11081_s0 + %s9721_s23]]   ;;  %s9725_s23 = smov 36  }
  0x3c   :  { %s9978_s12 = sld [smem:[%s11081_s0 + %s9722_s1]]   ;;  %s9726_s1 = smov 37  }
  0x3d   :  { %11180 = sst [smem:[#allocation111_spill]] %s9960_s5 }
  0x3e   :  { %s9983_s30 = sld [smem:[%s11081_s0 + %s9723_s10]]   ;;  %v144_v0 = vstv %s6905_s13  ;;  %s9727_s10 = smov 38  }
  0x3f   :  { %s9988_s27 = sld [smem:[%s11081_s0 + %s9724_s16]]   ;;  %145 = vst [vmem:[#allocation2] sm:$0x1] %v144_v0  ;;  %s9729_s13 = smov 40  }
  0x40   :  { %s9998_s7 = sld [smem:[%s11081_s0 + %s9726_s1]]   ;;  %s9730_s1 = smov 41  }
  0x41   :  { %11182 = sst [smem:[#allocation113_spill]] %s9973_s9 }
  0x42   :  { %11183 = sst [smem:[#allocation114_spill]] %s9978_s12  ;;  %s9731_s12 = smov 42  }
  0x43   :  { %s9993_s9 = sld [smem:[%s11081_s0 + %s9725_s23]]  }
  0x44   :  { %s10003_s16 = sld [smem:[%s11081_s0 + %s9727_s10]]  }
  0x45   :  { %11184 = sst [smem:[#allocation115_spill]] %s9988_s27  ;;  %s9732_s27 = smov 43  }
  0x46   :  { %11186 = sst [smem:[#allocation117_spill]] %s9998_s7  ;;  %s9734_s7 = smov 45  }
  0x47   :  { %s10008_s23 = sld [smem:[%s11081_s0 + %s9728_s15]]  }
  0x48   :  { %s10013_s28 = sld [smem:[%s11081_s0 + %s9729_s13]]   ;;  %s9733_s13 = smov 44  }
  0x49   :  { %11185 = sst [smem:[#allocation116_spill]] %s9993_s9 }
  0x4a   :  { %s10018_s19 = sld [smem:[%s11081_s0 + %s9730_s1]]  }
  0x4b   :  { %s10023_s29 = sld [smem:[%s11081_s0 + %s9731_s12]]   ;;  %s9735_s12 = smov 46  }
  0x4c   :  { %s10033_s17 = sld [smem:[%s11081_s0 + %s9733_s13]]   ;;  %s9737_s13 = smov 48  }
  0x4d   :  { %11187 = sst [smem:[#allocation118_spill]] %s10008_s23 }
  0x4e   :  { %s10028_s23 = sld [smem:[%s11081_s0 + %s9732_s27]]   ;;  %s9736_s27 = smov 47  }
  0x50   :  { %11188 = sst [smem:[#allocation119_spill]] %s10018_s19 }
  0x51   :  { %11189 = sst [smem:[#allocation120_spill]] %s10023_s29 }
  0x52   :  { %11191 = sst [smem:[#allocation122_spill]] %s10033_s17 }
  0x53   :  { %s10038_s19 = sld [smem:[%s11081_s0 + %s9734_s7]]   ;;  %s9738_s7 = smov 49  }
  0x54   :  { %11190 = sst [smem:[#allocation121_spill]] %s10028_s23 }
  0x55   :  { %s10043_s29 = sld [smem:[%s11081_s0 + %s9735_s12]]   ;;  %s9739_s12 = smov 50  }
  0x56   :  { %s10048_s23 = sld [smem:[%s11081_s0 + %s9736_s27]]   ;;  %s9740_s27 = smov 51  }
  0x57   :  { %s10053_s17 = sld [smem:[%s11081_s0 + %s9737_s13]]   ;;  %s9741_s13 = smov 52  }
  0x59   :  { %11192 = sst [smem:[#allocation123_spill]] %s10038_s19 }
  0x5a   :  { %s10058_s19 = sld [smem:[%s11081_s0 + %s9738_s7]]   ;;  %s9742_s7 = smov 53  }
  0x5b   :  { %11193 = sst [smem:[#allocation124_spill]] %s10043_s29 }
  0x5c   :  { %11194 = sst [smem:[#allocation125_spill]] %s10048_s23 }
  0x5d   :  { %11195 = sst [smem:[#allocation126_spill]] %s10053_s17 }
  0x5e   :  { %s10063_s29 = sld [smem:[%s11081_s0 + %s9739_s12]]   ;;  %s9743_s12 = smov 54  }
  0x5f   :  { %s10068_s23 = sld [smem:[%s11081_s0 + %s9740_s27]]   ;;  %s9744_s27 = smov 55  }
  0x60   :  { %11196 = sst [smem:[#allocation127_spill]] %s10058_s19 }
  0x61   :  { %s10073_s17 = sld [smem:[%s11081_s0 + %s9741_s13]]   ;;  %s9745_s13 = smov 56  }
  0x62   :  { %s10078_s19 = sld [smem:[%s11081_s0 + %s9742_s7]]   ;;  %s9746_s7 = smov 57  }
  0x64   :  { %11197 = sst [smem:[#allocation128_spill]] %s10063_s29 }
  0x65   :  { %11198 = sst [smem:[#allocation129_spill]] %s10068_s23 }
  0x66   :  { %s10083_s29 = sld [smem:[%s11081_s0 + %s9743_s12]]   ;;  %s9747_s12 = smov 58  }
  0x67   :  { %11199 = sst [smem:[#allocation130_spill]] %s10073_s17 }
  0x68   :  { %11200 = sst [smem:[#allocation131_spill]] %s10078_s19 }
  0x69   :  { %s10088_s23 = sld [smem:[%s11081_s0 + %s9744_s27]]   ;;  %s9748_s27 = smov 59  }
  0x6a   :  { %s10093_s17 = sld [smem:[%s11081_s0 + %s9745_s13]]   ;;  %s9749_s13 = smov 60  }
  0x6b   :  { %s10098_s19 = sld [smem:[%s11081_s0 + %s9746_s7]]   ;;  %s9750_s7 = smov 61  }
  0x6c   :  { %11201 = sst [smem:[#allocation132_spill]] %s10083_s29 }
  0x6d   :  { %s10103_s29 = sld [smem:[%s11081_s0 + %s9747_s12]]   ;;  %s9751_s12 = smov 62  }
  0x6f   :  { %11202 = sst [smem:[#allocation133_spill]] %s10088_s23 }
  0x70   :  { %11203 = sst [smem:[#allocation134_spill]] %s10093_s17 }
  0x71   :  { %11204 = sst [smem:[#allocation135_spill]] %s10098_s19 }
  0x72   :  { %s10108_s23 = sld [smem:[%s11081_s0 + %s9748_s27]]   ;;  %s9752_s27 = smov 63  }
  0x73   :  { %11205 = sst [smem:[#allocation136_spill]] %s10103_s29 }
  0x74   :  { %s10113_s17 = sld [smem:[%s11081_s0 + %s9749_s13]]   ;;  %s9753_s13 = smov 64  }
  0x75   :  { %s10118_s19 = sld [smem:[%s11081_s0 + %s9750_s7]]   ;;  %s9754_s7 = smov 65  }
  0x76   :  { %s10123_s29 = sld [smem:[%s11081_s0 + %s9751_s12]]   ;;  %s9755_s12 = smov 66  }
  0x78   :  { %11206 = sst [smem:[#allocation137_spill]] %s10108_s23 }
  0x79   :  { %s10128_s23 = sld [smem:[%s11081_s0 + %s9752_s27]]   ;;  %s9756_s27 = smov 67  }
  0x7a   :  { %11207 = sst [smem:[#allocation138_spill]] %s10113_s17 }
  0x7b   :  { %11208 = sst [smem:[#allocation139_spill]] %s10118_s19 }
  0x7c   :  { %11209 = sst [smem:[#allocation140_spill]] %s10123_s29 }
  0x7d   :  { %s10133_s17 = sld [smem:[%s11081_s0 + %s9753_s13]]   ;;  %s9757_s13 = smov 68  }
  0x7e   :  { %s10138_s19 = sld [smem:[%s11081_s0 + %s9754_s7]]   ;;  %s9758_s7 = smov 69  }
  0x7f   :  { %11210 = sst [smem:[#allocation141_spill]] %s10128_s23 }
  0x80   :  { %s10143_s29 = sld [smem:[%s11081_s0 + %s9755_s12]]  }
  0x81   :  { %s10148_s23 = sld [smem:[%s11081_s0 + %s9756_s27]]  }
  0x83   :  { %11211 = sst [smem:[#allocation142_spill]] %s10133_s17 }
  0x84   :  { %11212 = sst [smem:[#allocation143_spill]] %s10138_s19 }
  0x85   :  { %s10153_s17 = sld [smem:[%s11081_s0 + %s9757_s13]]  }
  0x86   :  { %s10158_s19 = sld [smem:[%s11081_s0 + %s9758_s7]]  }
  0x87   :  { %146 = vsyncpa [#allocation4], 0 }
  0x88   :  { %147 = vsyncpa [#allocation6], 0 }
  0x89   :  { %148 = vsyncpa [#allocation9], 0 }
  0x8a   :  { %149 = vsyncpa [#allocation12], 0 }
  0x8b   :  { %150 = vsyncpa [#allocation15], 0 }
  0x8c   :  { %151 = vsyncpa [#allocation18], 0 }
  0x8d   :  { %152 = vsyncpa [#allocation21], 0 }
  0x8e   :  { %153 = vsyncpa [#allocation24], 0 }
  0x8f   :  { %154 = vsyncpa [#allocation27], 0 }
  0x90   :  { %155 = vsyncpa [#allocation30], 0 }
  0x91   :  { %156 = vsyncpa [#allocation33], 0 }
  0x92   :  { %157 = vsyncpa [#allocation36], 0 }
  0x93   :  { %158 = vsyncpa [#allocation39], 0 }
  0x94   :  { %159 = vsyncpa [#allocation42], 0 }
  0x95   :  { %160 = vsyncpa [#allocation45], 0 }
  0x96   :  { %161 = vsyncpa [#allocation48], 0 }
  0x97   :  { %162 = vsyncpa [#allocation51], 0 }
  0x98   :  { %163 = vsyncpa [#allocation54], 0 }
  0x99   :  { %164 = vsyncpa [#allocation57], 0 }
  0x9a   :  { %165 = vsyncpa [#allocation60], 0 }
  0x9b   :  { %166 = vsyncpa [#allocation63], 0  ;;  %s10160_s0 = smov 0  }
  0x9c LB: > { %s11213_s14 = sld [smem:[#allocation94_spill]]  ;;  %s11214_s9 = sld [smem:[#allocation116_spill]]  ;;  %s9688_s0 = sphi %s10160_s0, %s172_s0  }
  0x9d   : > { %s11215_s8 = sld [smem:[#allocation109_spill]]  ;;  %s11216_s6 = sld [smem:[#allocation97_spill]] }
  0x9e   : > { %s11217_s5 = sld [smem:[#allocation111_spill]]  ;;  %s11218_s4 = sld [smem:[#allocation104_spill]] }
  0x9f   : > { %s11219_s3 = sld [smem:[#allocation102_spill]]  ;;  %s10166_s12 = sadd.s32 4294967295, %s9688_s0  }
  0xa0   : > { %p6947_p0 = scmp.ge.s32.totalorder %s9688_s0, 1  ;;  %p1662_p1 = scmp.lt.s32.totalorder %s9688_s0, 3 }
  0xa2   : > { %p10170_p2 = pnand %p6947_p0, %p1662_p1 }
  0xa3   : > { %p8323_p3 = scmp.eq.s32.totalorder (!%p10170_p2), %s10166_s12, 0  ;;  %s9759_s11 = smov (!%p10170_p2), [#allocation5]  }
  0xa4   : > { %1666 = sbr.rel (%p10170_p2) target bundleno = 1177 (0x499), region = 12  ;;  %s1692_s27 = sshll.u32 (!%p10170_p2), %s9759_s11, 4  ;;  %s1693_s27 = int_to_ptr.vmem [resolvable:$true] %s1692_s27 }
  0xa5   : > { %s8532_s15 = scalar_lea.hbm (!%p10170_p2), %s9840_s25, 64 }
  0xa6   : > { %p8533_p4 = scmp.ne.s32.totalorder (!%p10170_p2), %s9840_s25, %s8532_s15  ;;  %p8538_p7 = scmp.lt.u32.totalorder (!%p10170_p2), %s8532_s15, %s9840_s25 }
  0xa8   : > { %p8534_p5 = pnand (!%p10170_p2), %p8533_p4, %p8323_p3 }
  0xaa   : > { %p8535_p6 = pneg (!%p10170_p2), %p8534_p5 }
  0xac   : > { %p8540_p8 = pnand %p8538_p7, %p8535_p6 }
  0xae   : > { %8543 = shalt.err (!%p8540_p8)
}
  0xaf   : > { %s8544_s18 = scalar_lea.vmem %s1693_s27, 64  ;;  %p8551_p12 = scmp.lt.s32.totalorder %s1693_s27, %s1693_s27 }
  0xb0   : > { %p8545_p9 = scmp.ne.s32.totalorder %s1693_s27, %s8544_s18  ;;  %p8552_p13 = scmp.lt.s32.totalorder %s8544_s18, %s8544_s18 }
  0xb2   : > { %p8546_p10 = pnand %p8545_p9, %p8323_p3  ;;  %p8553_p0 = por %p8552_p13, %p8551_p12 }
  0xb4   : > { %p8547_p11 = pneg %p8546_p10 }
  0xb6   : > { %p8554_p1 = pnand %p8553_p0, %p8547_p11 }
  0xb8   : > { %8557 = shalt.err (!%p8554_p1)
}
  0xb9   : > { %8162 = dma.hbm_to_vmem [thread:$0]  (%p8323_p3), %s9840_s25, 64, %s1693_s27, [#allocation6]  }
  0xba   : > { %s9760_s13 = smov [#allocation8]   ;;  %s9761_s26 = smov [#allocation11]  }
  0xbb   : > { %s1721_s22 = sshll.u32 %s9760_s13, 4  ;;  %s1747_s7 = sshll.u32 %s9761_s26, 4  ;;  %s1722_s22 = int_to_ptr.vmem [resolvable:$true] %s1721_s22  ;;  %s10187_s7 = int_to_ptr.vmem [resolvable:$true] %s1747_s7 }
  0xbc   : > { %s8558_s1 = scalar_lea.hbm %s11213_s14, 512 }
  0xbd   : > { %p8559_p4 = scmp.ne.s32.totalorder %s11213_s14, %s8558_s1  ;;  %p8564_p7 = scmp.lt.u32.totalorder %s8558_s1, %s11213_s14 }
  0xbf   : > { %p8560_p5 = pnand %p8559_p4, %p8323_p3 }
  0xc1   : > { %p8561_p6 = pneg %p8560_p5 }
  0xc3   : > { %p8566_p8 = pnand %p8564_p7, %p8561_p6 }
  0xc5   : > { %8569 = shalt.err (!%p8566_p8)
}
  0xc6   : > { %s8570_s2 = scalar_lea.vmem %s1722_s22, 512  ;;  %p8577_p12 = scmp.lt.s32.totalorder %s1722_s22, %s1722_s22 }
  0xc7   : > { %p8571_p9 = scmp.ne.s32.totalorder %s1722_s22, %s8570_s2  ;;  %p8578_p13 = scmp.lt.s32.totalorder %s8570_s2, %s8570_s2 }
  0xc9   : > { %p8572_p10 = pnand %p8571_p9, %p8323_p3  ;;  %p8579_p0 = por %p8578_p13, %p8577_p12 }
  0xcb   : > { %p8573_p11 = pneg %p8572_p10 }
  0xcd   : > { %p8580_p1 = pnand %p8579_p0, %p8573_p11 }
  0xcf   : > { %8583 = shalt.err (!%p8580_p1)
}
  0xd0   : > { %s11124_s11 = smov 128   ;;  %s11126_s27 = smov 8  }
  0xd1   : > { %8166 = dma.hbm_to_vmem [thread:$0]  (%p8323_p3), %s11213_s14, 512, %s1722_s22, [#allocation9], %s11124_s11, %s11124_s11, %s11126_s27  }
  0xd2   : > { %s8584_s15 = scalar_lea.hbm %s9870_s24, 512 }
  0xd3   : > { %p8585_p4 = scmp.ne.s32.totalorder %s9870_s24, %s8584_s15  ;;  %p8590_p7 = scmp.lt.u32.totalorder %s8584_s15, %s9870_s24 }
  0xd5   : > { %p8586_p5 = pnand %p8585_p4, %p8323_p3 }
  0xd7   : > { %p8587_p6 = pneg %p8586_p5 }
  0xd9   : > { %p8592_p8 = pnand %p8590_p7, %p8587_p6 }
  0xdb   : > { %8595 = shalt.err (!%p8592_p8)
}
  0xdc   : > { %s8596_s18 = scalar_lea.vmem %s10187_s7, 512  ;;  %p8603_p12 = scmp.lt.s32.totalorder %s10187_s7, %s10187_s7 }
  0xdd   : > { %p8597_p9 = scmp.ne.s32.totalorder %s10187_s7, %s8596_s18  ;;  %p8604_p13 = scmp.lt.s32.totalorder %s8596_s18, %s8596_s18 }
  0xdf   : > { %p8598_p10 = pnand %p8597_p9, %p8323_p3  ;;  %p8605_p0 = por %p8604_p13, %p8603_p12 }
  0xe1   : > { %p8599_p11 = pneg %p8598_p10 }
  0xe3   : > { %p8606_p1 = pnand %p8605_p0, %p8599_p11 }
  0xe5   : > { %8609 = shalt.err (!%p8606_p1)
}
  0xe6   : > { %8170 = dma.hbm_to_vmem [thread:$0]  (%p8323_p3), %s9870_s24, 512, %s10187_s7, [#allocation12], %s11124_s11, %s11124_s11, %s11126_s27  }
  0xe7   : > { %s9764_s13 = smov [#allocation14]   ;;  %s9765_s26 = smov [#allocation17]  }
  0xe8   : > { %s1771_s22 = sshll.u32 %s9764_s13, 4  ;;  %s1795_s1 = sshll.u32 %s9765_s26, 4  ;;  %s1772_s22 = int_to_ptr.vmem [resolvable:$true] %s1771_s22  ;;  %s10220_s1 = int_to_ptr.vmem [resolvable:$true] %s1795_s1 }
  0xe9   : > { %s8610_s2 = scalar_lea.hbm %s11216_s6, 512 }
  0xea   : > { %p8611_p4 = scmp.ne.s32.totalorder %s11216_s6, %s8610_s2  ;;  %p8616_p7 = scmp.lt.u32.totalorder %s8610_s2, %s11216_s6 }
  0xec   : > { %p8612_p5 = pnand %p8611_p4, %p8323_p3 }
  0xee   : > { %p8613_p6 = pneg %p8612_p5 }
  0xf0   : > { %p8618_p8 = pnand %p8616_p7, %p8613_p6 }
  0xf2   : > { %8621 = shalt.err (!%p8618_p8)
}
  0xf3   : > { %s8622_s15 = scalar_lea.vmem %s1772_s22, 512  ;;  %p8629_p12 = scmp.lt.s32.totalorder %s1772_s22, %s1772_s22 }
  0xf4   : > { %p8623_p9 = scmp.ne.s32.totalorder %s1772_s22, %s8622_s15  ;;  %p8630_p13 = scmp.lt.s32.totalorder %s8622_s15, %s8622_s15 }
  0xf6   : > { %p8624_p10 = pnand %p8623_p9, %p8323_p3  ;;  %p8631_p0 = por %p8630_p13, %p8629_p12 }
  0xf8   : > { %p8625_p11 = pneg %p8624_p10 }
  0xfa   : > { %p8632_p1 = pnand %p8631_p0, %p8625_p11 }
  0xfc   : > { %8635 = shalt.err (!%p8632_p1)
}
  0xfd   : > { %8174 = dma.hbm_to_vmem [thread:$0]  (%p8323_p3), %s11216_s6, 512, %s1772_s22, [#allocation15], %s11124_s11, %s11124_s11, %s11126_s27  }
  0xfe   : > { %s8636_s7 = scalar_lea.hbm %s9890_s20, 512 }
  0xff   : > { %p8637_p4 = scmp.ne.s32.totalorder %s9890_s20, %s8636_s7  ;;  %p8642_p7 = scmp.lt.u32.totalorder %s8636_s7, %s9890_s20 }
 0x101   : > { %p8638_p5 = pnand %p8637_p4, %p8323_p3 }
 0x103   : > { %p8639_p6 = pneg %p8638_p5 }
 0x105   : > { %p8644_p8 = pnand %p8642_p7, %p8639_p6 }
 0x107   : > { %8647 = shalt.err (!%p8644_p8)
}
 0x108   : > { %s8648_s18 = scalar_lea.vmem %s10220_s1, 512  ;;  %p8655_p12 = scmp.lt.s32.totalorder %s10220_s1, %s10220_s1 }
 0x109   : > { %p8649_p9 = scmp.ne.s32.totalorder %s10220_s1, %s8648_s18  ;;  %p8656_p13 = scmp.lt.s32.totalorder %s8648_s18, %s8648_s18 }
 0x10b   : > { %p8650_p10 = pnand %p8649_p9, %p8323_p3  ;;  %p8657_p0 = por %p8656_p13, %p8655_p12 }
 0x10d   : > { %p8651_p11 = pneg %p8650_p10 }
 0x10f   : > { %p8658_p1 = pnand %p8657_p0, %p8651_p11 }
 0x111   : > { %8661 = shalt.err (!%p8658_p1)
}
 0x112   : > { %8178 = dma.hbm_to_vmem [thread:$0]  (%p8323_p3), %s9890_s20, 512, %s10220_s1, [#allocation18], %s11124_s11, %s11124_s11, %s11126_s27  }
 0x113   : > { %s9766_s13 = smov [#allocation20]   ;;  %s9767_s26 = smov [#allocation23]  }
 0x114   : > { %s1826_s22 = sshll.u32 %s9766_s13, 4  ;;  %s1850_s2 = sshll.u32 %s9767_s26, 4  ;;  %s1827_s22 = int_to_ptr.vmem [resolvable:$true] %s1826_s22  ;;  %s10253_s2 = int_to_ptr.vmem [resolvable:$true] %s1850_s2 }
 0x115   : > { %s8662_s15 = scalar_lea.hbm %s11219_s3, 16 }
 0x116   : > { %p8663_p4 = scmp.ne.s32.totalorder %s11219_s3, %s8662_s15  ;;  %p8668_p7 = scmp.lt.u32.totalorder %s8662_s15, %s11219_s3 }
 0x118   : > { %p8664_p5 = pnand %p8663_p4, %p8323_p3 }
 0x11a   : > { %p8665_p6 = pneg %p8664_p5 }
 0x11c   : > { %p8670_p8 = pnand %p8668_p7, %p8665_p6 }
 0x11e   : > { %8673 = shalt.err (!%p8670_p8)
}
 0x11f   : > { %s8674_s7 = scalar_lea.vmem %s1827_s22, 16  ;;  %s8680_s1 = scalar_lea.vmem %s1827_s22, 32 }
 0x120   : > { %p8675_p9 = scmp.ne.s32.totalorder %s1827_s22, %s8674_s7  ;;  %p8681_p12 = scmp.lt.s32.totalorder %s1827_s22, %s1827_s22 }
 0x121   : > { %p8682_p13 = scmp.lt.s32.totalorder %s8680_s1, %s8674_s7 }
 0x122   : > { %p8676_p10 = pnand %p8675_p9, %p8323_p3 }
 0x123   : > { %p8683_p0 = por %p8682_p13, %p8681_p12 }
 0x124   : > { %p8677_p11 = pneg %p8676_p10 }
 0x126   : > { %p8684_p1 = pnand %p8683_p0, %p8677_p11 }
 0x128   : > { %8687 = shalt.err (!%p8684_p1)
}
 0x129   : > { %8182 = dma.hbm_to_vmem [thread:$0]  (%p8323_p3), %s11219_s3, 16, %s1827_s22, [#allocation21]  }
 0x12a   : > { %s8688_s18 = scalar_lea.hbm %s11218_s4, 16 }
 0x12b   : > { %p8689_p4 = scmp.ne.s32.totalorder %s11218_s4, %s8688_s18  ;;  %p8694_p7 = scmp.lt.u32.totalorder %s8688_s18, %s11218_s4 }
 0x12d   : > { %p8690_p5 = pnand %p8689_p4, %p8323_p3 }
 0x12f   : > { %p8691_p6 = pneg %p8690_p5 }
 0x131   : > { %p8696_p8 = pnand %p8694_p7, %p8691_p6 }
 0x133   : > { %8699 = shalt.err (!%p8696_p8)
}
 0x134   : > { %s8700_s13 = scalar_lea.vmem %s10253_s2, 16  ;;  %s8706_s26 = scalar_lea.vmem %s10253_s2, 32 }
 0x135   : > { %p8701_p9 = scmp.ne.s32.totalorder %s10253_s2, %s8700_s13  ;;  %p8707_p12 = scmp.lt.s32.totalorder %s10253_s2, %s10253_s2 }
 0x136   : > { %p8708_p13 = scmp.lt.s32.totalorder %s8706_s26, %s8700_s13 }
 0x137   : > { %p8702_p10 = pnand %p8701_p9, %p8323_p3 }
 0x138   : > { %p8709_p0 = por %p8708_p13, %p8707_p12 }
 0x139   : > { %p8703_p11 = pneg %p8702_p10 }
 0x13b   : > { %p8710_p1 = pnand %p8709_p0, %p8703_p11 }
 0x13d   : > { %8713 = shalt.err (!%p8710_p1)
}
 0x13e   : > { %8186 = dma.hbm_to_vmem [thread:$0]  (%p8323_p3), %s11218_s4, 16, %s10253_s2, [#allocation24]  }
 0x13f   : > { %s9768_s22 = smov [#allocation26]   ;;  %s9769_s7 = smov [#allocation29]  }
 0x140   : > { %s1874_s15 = sshll.u32 %s9768_s22, 4  ;;  %s1901_s1 = sshll.u32 %s9769_s7, 4  ;;  %s1875_s15 = int_to_ptr.vmem [resolvable:$true] %s1874_s15  ;;  %s10281_s1 = int_to_ptr.vmem [resolvable:$true] %s1901_s1 }
 0x141   : > { %s8714_s18 = scalar_lea.hbm %s9930_s21, 16 }
 0x142   : > { %p8715_p4 = scmp.ne.s32.totalorder %s9930_s21, %s8714_s18  ;;  %p8720_p7 = scmp.lt.u32.totalorder %s8714_s18, %s9930_s21 }
 0x144   : > { %p8716_p5 = pnand %p8715_p4, %p8323_p3 }
 0x146   : > { %p8717_p6 = pneg %p8716_p5 }
 0x148   : > { %p8722_p8 = pnand %p8720_p7, %p8717_p6 }
 0x14a   : > { %8725 = shalt.err (!%p8722_p8)
}
 0x14b   : > { %s8726_s13 = scalar_lea.vmem %s1875_s15, 16  ;;  %s8732_s2 = scalar_lea.vmem %s1875_s15, 32 }
 0x14c   : > { %p8727_p9 = scmp.ne.s32.totalorder %s1875_s15, %s8726_s13  ;;  %p8733_p12 = scmp.lt.s32.totalorder %s1875_s15, %s1875_s15 }
 0x14d   : > { %p8734_p13 = scmp.lt.s32.totalorder %s8732_s2, %s8726_s13 }
 0x14e   : > { %p8728_p10 = pnand %p8727_p9, %p8323_p3 }
 0x14f   : > { %p8735_p0 = por %p8734_p13, %p8733_p12 }
 0x150   : > { %p8729_p11 = pneg %p8728_p10 }
 0x152   : > { %p8736_p1 = pnand %p8735_p0, %p8729_p11 }
 0x154   : > { %8739 = shalt.err (!%p8736_p1)
}
 0x155   : > { %8190 = dma.hbm_to_vmem [thread:$0]  (%p8323_p3), %s9930_s21, 16, %s1875_s15, [#allocation27]  }
 0x156   : > { %s8740_s26 = scalar_lea.hbm %s11215_s8, 512 }
 0x157   : > { %p8741_p4 = scmp.ne.s32.totalorder %s11215_s8, %s8740_s26  ;;  %p8746_p7 = scmp.lt.u32.totalorder %s8740_s26, %s11215_s8 }
 0x159   : > { %p8742_p5 = pnand %p8741_p4, %p8323_p3 }
 0x15b   : > { %p8743_p6 = pneg %p8742_p5 }
 0x15d   : > { %p8748_p8 = pnand %p8746_p7, %p8743_p6 }
 0x15f   : > { %8751 = shalt.err (!%p8748_p8)
}
 0x160   : > { %s8752_s22 = scalar_lea.vmem %s10281_s1, 512  ;;  %p8759_p12 = scmp.lt.s32.totalorder %s10281_s1, %s10281_s1 }
 0x161   : > { %p8753_p9 = scmp.ne.s32.totalorder %s10281_s1, %s8752_s22  ;;  %p8760_p13 = scmp.lt.s32.totalorder %s8752_s22, %s8752_s22 }
 0x163   : > { %p8754_p10 = pnand %p8753_p9, %p8323_p3  ;;  %p8761_p0 = por %p8760_p13, %p8759_p12 }
 0x165   : > { %p8755_p11 = pneg %p8754_p10 }
 0x167   : > { %p8762_p1 = pnand %p8761_p0, %p8755_p11 }
 0x169   : > { %8765 = shalt.err (!%p8762_p1)
}
 0x16a   : > { %8194 = dma.hbm_to_vmem [thread:$0]  (%p8323_p3), %s11215_s8, 512, %s10281_s1, [#allocation30], %s11124_s11, %s11124_s11, %s11126_s27  }
 0x16b   : > { %s9770_s15 = smov [#allocation32]   ;;  %s9771_s18 = smov [#allocation35]  }
 0x16c   : > { %s1925_s7 = sshll.u32 %s9770_s15, 4  ;;  %s1958_s13 = sshll.u32 %s9771_s18, 4  ;;  %s1926_s7 = int_to_ptr.vmem [resolvable:$true] %s1925_s7  ;;  %s10311_s13 = int_to_ptr.vmem [resolvable:$true] %s1958_s13 }
 0x16d   : > { %s8766_s2 = scalar_lea.hbm %s11217_s5, 512 }
 0x16e   : > { %p8767_p4 = scmp.ne.s32.totalorder %s11217_s5, %s8766_s2  ;;  %p8772_p7 = scmp.lt.u32.totalorder %s8766_s2, %s11217_s5 }
 0x170   : > { %p8768_p5 = pnand %p8767_p4, %p8323_p3 }
 0x172   : > { %p8769_p6 = pneg %p8768_p5 }
 0x174   : > { %p8774_p8 = pnand %p8772_p7, %p8769_p6 }
 0x176   : > { %8777 = shalt.err (!%p8774_p8)
}
 0x177   : > { %s8778_s26 = scalar_lea.vmem %s1926_s7, 512  ;;  %p8785_p12 = scmp.lt.s32.totalorder %s1926_s7, %s1926_s7 }
 0x178   : > { %p8779_p9 = scmp.ne.s32.totalorder %s1926_s7, %s8778_s26  ;;  %p8786_p13 = scmp.lt.s32.totalorder %s8778_s26, %s8778_s26 }
 0x17a   : > { %p8780_p10 = pnand %p8779_p9, %p8323_p3  ;;  %p8787_p0 = por %p8786_p13, %p8785_p12 }
 0x17c   : > { %p8781_p11 = pneg %p8780_p10 }
 0x17e   : > { %p8788_p1 = pnand %p8787_p0, %p8781_p11 }
 0x180   : > { %8791 = shalt.err (!%p8788_p1)
}
 0x181   : > { %8198 = dma.hbm_to_vmem [thread:$0]  (%p8323_p3), %s11217_s5, 512, %s1926_s7, [#allocation33], %s11124_s11, %s11124_s11, %s11126_s27  }
 0x182   : > { %s8792_s1 = scalar_lea.hbm %s9983_s30, 512 }
 0x183   : > { %p8793_p4 = scmp.ne.s32.totalorder %s9983_s30, %s8792_s1  ;;  %p8798_p7 = scmp.lt.u32.totalorder %s8792_s1, %s9983_s30 }
 0x185   : > { %p8794_p5 = pnand %p8793_p4, %p8323_p3 }
 0x187   : > { %p8795_p6 = pneg %p8794_p5 }
 0x189   : > { %p8800_p8 = pnand %p8798_p7, %p8795_p6 }
 0x18b   : > { %8803 = shalt.err (!%p8800_p8)
}
 0x18c   : > { %s8804_s22 = scalar_lea.vmem %s10311_s13, 512  ;;  %p8811_p12 = scmp.lt.s32.totalorder %s10311_s13, %s10311_s13 }
 0x18d   : > { %p8805_p9 = scmp.ne.s32.totalorder %s10311_s13, %s8804_s22  ;;  %p8812_p13 = scmp.lt.s32.totalorder %s8804_s22, %s8804_s22 }
 0x18f   : > { %p8806_p10 = pnand %p8805_p9, %p8323_p3  ;;  %p8813_p0 = por %p8812_p13, %p8811_p12 }
 0x191   : > { %p8807_p11 = pneg %p8806_p10 }
 0x193   : > { %p8814_p1 = pnand %p8813_p0, %p8807_p11 }
 0x195   : > { %8817 = shalt.err (!%p8814_p1)
}
 0x196   : > { %8202 = dma.hbm_to_vmem [thread:$0]  (%p8323_p3), %s9983_s30, 512, %s10311_s13, [#allocation36], %s11124_s11, %s11124_s11, %s11126_s27  }
 0x197   : > { %s9772_s15 = smov [#allocation38]   ;;  %s9773_s18 = smov [#allocation41]  }
 0x198   : > { %s1982_s7 = sshll.u32 %s9772_s15, 4  ;;  %s2006_s2 = sshll.u32 %s9773_s18, 4  ;;  %s1983_s7 = int_to_ptr.vmem [resolvable:$true] %s1982_s7  ;;  %s10344_s2 = int_to_ptr.vmem [resolvable:$true] %s2006_s2 }
 0x199   : > { %s8818_s26 = scalar_lea.hbm %s11214_s9, 512 }
 0x19a   : > { %p8819_p4 = scmp.ne.s32.totalorder %s11214_s9, %s8818_s26  ;;  %p8824_p7 = scmp.lt.u32.totalorder %s8818_s26, %s11214_s9 }
 0x19c   : > { %p8820_p5 = pnand %p8819_p4, %p8323_p3 }
 0x19e   : > { %p8821_p6 = pneg %p8820_p5 }
 0x1a0   : > { %p8826_p8 = pnand %p8824_p7, %p8821_p6 }
 0x1a2   : > { %8829 = shalt.err (!%p8826_p8)
}
 0x1a3   : > { %s8830_s1 = scalar_lea.vmem %s1983_s7, 512  ;;  %p8837_p12 = scmp.lt.s32.totalorder %s1983_s7, %s1983_s7 }
 0x1a4   : > { %p8831_p9 = scmp.ne.s32.totalorder %s1983_s7, %s8830_s1  ;;  %p8838_p13 = scmp.lt.s32.totalorder %s8830_s1, %s8830_s1 }
 0x1a6   : > { %p8832_p10 = pnand %p8831_p9, %p8323_p3  ;;  %p8839_p0 = por %p8838_p13, %p8837_p12 }
 0x1a8   : > { %p8833_p11 = pneg %p8832_p10 }
 0x1aa   : > { %p8840_p1 = pnand %p8839_p0, %p8833_p11 }
 0x1ac   : > { %8843 = shalt.err (!%p8840_p1)
}
 0x1ad   : > { %8206 = dma.hbm_to_vmem [thread:$0]  (%p8323_p3), %s11214_s9, 512, %s1983_s7, [#allocation39], %s11124_s11, %s11124_s11, %s11126_s27  }
 0x1ae   : > { %s8844_s13 = scalar_lea.hbm %s10003_s16, 512 }
 0x1af   : > { %p8845_p4 = scmp.ne.s32.totalorder %s10003_s16, %s8844_s13  ;;  %p8850_p7 = scmp.lt.u32.totalorder %s8844_s13, %s10003_s16 }
 0x1b1   : > { %p8846_p5 = pnand %p8845_p4, %p8323_p3 }
 0x1b3   : > { %p8847_p6 = pneg %p8846_p5 }
 0x1b5   : > { %p8852_p8 = pnand %p8850_p7, %p8847_p6 }
 0x1b7   : > { %8855 = shalt.err (!%p8852_p8)
}
 0x1b8   : > { %s8856_s22 = scalar_lea.vmem %s10344_s2, 512  ;;  %p8863_p12 = scmp.lt.s32.totalorder %s10344_s2, %s10344_s2 }
 0x1b9   : > { %p8857_p9 = scmp.ne.s32.totalorder %s10344_s2, %s8856_s22  ;;  %p8864_p13 = scmp.lt.s32.totalorder %s8856_s22, %s8856_s22 }
 0x1bb   : > { %p8858_p10 = pnand %p8857_p9, %p8323_p3  ;;  %p8865_p0 = por %p8864_p13, %p8863_p12 }
 0x1bd   : > { %p8859_p11 = pneg %p8858_p10 }
 0x1bf   : > { %p8866_p1 = pnand %p8865_p0, %p8859_p11 }
 0x1c1   : > { %8869 = shalt.err (!%p8866_p1)
}
 0x1c2   : > { %8210 = dma.hbm_to_vmem [thread:$0]  (%p8323_p3), %s10003_s16, 512, %s10344_s2, [#allocation42], %s11124_s11, %s11124_s11, %s11126_s27  }
 0x1c3   : > { %s9774_s15 = smov [#allocation44]   ;;  %s9775_s18 = smov [#allocation47]  }
 0x1c4   : > { %s2030_s7 = sshll.u32 %s9774_s15, 4  ;;  %s2054_s26 = sshll.u32 %s9775_s18, 4  ;;  %s2031_s7 = int_to_ptr.vmem [resolvable:$true] %s2030_s7  ;;  %s10377_s26 = int_to_ptr.vmem [resolvable:$true] %s2054_s26 }
 0x1c5   : > { %s8870_s1 = scalar_lea.hbm %s10013_s28, 512 }
 0x1c6   : > { %p8871_p4 = scmp.ne.s32.totalorder %s10013_s28, %s8870_s1  ;;  %p8876_p7 = scmp.lt.u32.totalorder %s8870_s1, %s10013_s28 }
 0x1c8   : > { %p8872_p5 = pnand %p8871_p4, %p8323_p3 }
 0x1ca   : > { %p8873_p6 = pneg %p8872_p5 }
 0x1cc   : > { %p8878_p8 = pnand %p8876_p7, %p8873_p6 }
 0x1ce   : > { %8881 = shalt.err (!%p8878_p8)
}
 0x1cf   : > { %s8882_s13 = scalar_lea.vmem %s2031_s7, 512  ;;  %p8889_p12 = scmp.lt.s32.totalorder %s2031_s7, %s2031_s7 }
 0x1d0   : > { %p8883_p9 = scmp.ne.s32.totalorder %s2031_s7, %s8882_s13  ;;  %p8890_p13 = scmp.lt.s32.totalorder %s8882_s13, %s8882_s13 }
 0x1d2   : > { %p8884_p10 = pnand %p8883_p9, %p8323_p3  ;;  %p8891_p0 = por %p8890_p13, %p8889_p12 }
 0x1d4   : > { %p8885_p11 = pneg %p8884_p10 }
 0x1d6   : > { %p8892_p1 = pnand %p8891_p0, %p8885_p11 }
 0x1d8   : > { %8895 = shalt.err (!%p8892_p1)
}
 0x1d9   : > { %s11221_s2 = sld [smem:[#allocation120_spill]] }
 0x1da   : > { %8214 = dma.hbm_to_vmem [thread:$0]  (%p8323_p3), %s10013_s28, 512, %s2031_s7, [#allocation45], %s11124_s11, %s11124_s11, %s11126_s27  }
 0x1df   : > { %s8896_s22 = scalar_lea.hbm %s11221_s2, 512 }
 0x1e0   : > { %p8897_p4 = scmp.ne.s32.totalorder %s11221_s2, %s8896_s22  ;;  %p8902_p7 = scmp.lt.u32.totalorder %s8896_s22, %s11221_s2 }
 0x1e2   : > { %p8898_p5 = pnand %p8897_p4, %p8323_p3 }
 0x1e4   : > { %p8899_p6 = pneg %p8898_p5 }
 0x1e6   : > { %p8904_p8 = pnand %p8902_p7, %p8899_p6 }
 0x1e8   : > { %8907 = shalt.err (!%p8904_p8)
}
 0x1e9   : > { %s8908_s15 = scalar_lea.vmem %s10377_s26, 512  ;;  %p8915_p12 = scmp.lt.s32.totalorder %s10377_s26, %s10377_s26 }
 0x1ea   : > { %p8909_p9 = scmp.ne.s32.totalorder %s10377_s26, %s8908_s15  ;;  %p8916_p13 = scmp.lt.s32.totalorder %s8908_s15, %s8908_s15 }
 0x1ec   : > { %p8910_p10 = pnand %p8909_p9, %p8323_p3  ;;  %p8917_p0 = por %p8916_p13, %p8915_p12 }
 0x1ee   : > { %p8911_p11 = pneg %p8910_p10 }
 0x1f0   : > { %p8918_p1 = pnand %p8917_p0, %p8911_p11 }
 0x1f2   : > { %8921 = shalt.err (!%p8918_p1)
}
 0x1f3   : > { %s11222_s7 = sld [smem:[#allocation122_spill]]  ;;  %s9776_s18 = smov [#allocation50]  }
 0x1f4   : > { %8218 = dma.hbm_to_vmem [thread:$0]  (%p8323_p3), %s11221_s2, 512, %s10377_s26, [#allocation48], %s11124_s11, %s11124_s11, %s11126_s27  }
 0x1f5   : > { %s2078_s1 = sshll.u32 %s9776_s18, 4  ;;  %s9777_s13 = smov [#allocation53]   ;;  %s2079_s1 = int_to_ptr.vmem [resolvable:$true] %s2078_s1 }
 0x1f6   : > { %s2102_s22 = sshll.u32 %s9777_s13, 4  ;;  %s10410_s22 = int_to_ptr.vmem [resolvable:$true] %s2102_s22 }
 0x1f9   : > { %s8922_s15 = scalar_lea.hbm %s11222_s7, 512 }
 0x1fa   : > { %p8923_p4 = scmp.ne.s32.totalorder %s11222_s7, %s8922_s15  ;;  %p8928_p7 = scmp.lt.u32.totalorder %s8922_s15, %s11222_s7 }
 0x1fc   : > { %p8924_p5 = pnand %p8923_p4, %p8323_p3 }
 0x1fe   : > { %p8925_p6 = pneg %p8924_p5 }
 0x200   : > { %p8930_p8 = pnand %p8928_p7, %p8925_p6 }
 0x202   : > { %8933 = shalt.err (!%p8930_p8)
}
 0x203   : > { %s8934_s3 = scalar_lea.vmem %s2079_s1, 512  ;;  %p8941_p12 = scmp.lt.s32.totalorder %s2079_s1, %s2079_s1 }
 0x204   : > { %p8935_p9 = scmp.ne.s32.totalorder %s2079_s1, %s8934_s3  ;;  %p8942_p13 = scmp.lt.s32.totalorder %s8934_s3, %s8934_s3 }
 0x206   : > { %p8936_p10 = pnand %p8935_p9, %p8323_p3  ;;  %p8943_p0 = por %p8942_p13, %p8941_p12 }
 0x208   : > { %p8937_p11 = pneg %p8936_p10 }
 0x20a   : > { %p8944_p1 = pnand %p8943_p0, %p8937_p11 }
 0x20c   : > { %8947 = shalt.err (!%p8944_p1)
}
 0x20d   : > { %s11223_s26 = sld [smem:[#allocation124_spill]] }
 0x20e   : > { %8222 = dma.hbm_to_vmem [thread:$0]  (%p8323_p3), %s11222_s7, 512, %s2079_s1, [#allocation51], %s11124_s11, %s11124_s11, %s11126_s27  }
 0x213   : > { %s8948_s18 = scalar_lea.hbm %s11223_s26, 512 }
 0x214   : > { %p8949_p4 = scmp.ne.s32.totalorder %s11223_s26, %s8948_s18  ;;  %p8954_p7 = scmp.lt.u32.totalorder %s8948_s18, %s11223_s26 }
 0x216   : > { %p8950_p5 = pnand %p8949_p4, %p8323_p3 }
 0x218   : > { %p8951_p6 = pneg %p8950_p5 }
 0x21a   : > { %p8956_p8 = pnand %p8954_p7, %p8951_p6 }
 0x21c   : > { %8959 = shalt.err (!%p8956_p8)
}
 0x21d   : > { %s8960_s3 = scalar_lea.vmem %s10410_s22, 512  ;;  %p8967_p12 = scmp.lt.s32.totalorder %s10410_s22, %s10410_s22 }
 0x21e   : > { %p8961_p9 = scmp.ne.s32.totalorder %s10410_s22, %s8960_s3  ;;  %p8968_p13 = scmp.lt.s32.totalorder %s8960_s3, %s8960_s3 }
 0x220   : > { %p8962_p10 = pnand %p8961_p9, %p8323_p3  ;;  %p8969_p0 = por %p8968_p13, %p8967_p12 }
 0x222   : > { %p8963_p11 = pneg %p8962_p10 }
 0x224   : > { %p8970_p1 = pnand %p8969_p0, %p8963_p11 }
 0x226   : > { %8973 = shalt.err (!%p8970_p1)
}
 0x227   : > { %s11224_s1 = sld [smem:[#allocation126_spill]]  ;;  %s9778_s13 = smov [#allocation56]  }
 0x228   : > { %8226 = dma.hbm_to_vmem [thread:$0]  (%p8323_p3), %s11223_s26, 512, %s10410_s22, [#allocation54], %s11124_s11, %s11124_s11, %s11126_s27  }
 0x229   : > { %s2126_s15 = sshll.u32 %s9778_s13, 4  ;;  %s9779_s18 = smov [#allocation59]   ;;  %s2127_s15 = int_to_ptr.vmem [resolvable:$true] %s2126_s15 }
 0x22a   : > { %s2157_s2 = sshll.u32 %s9779_s18, 4  ;;  %s10443_s2 = int_to_ptr.vmem [resolvable:$true] %s2157_s2 }
 0x22d   : > { %s8974_s3 = scalar_lea.hbm %s11224_s1, 512 }
 0x22e   : > { %p8975_p4 = scmp.ne.s32.totalorder %s11224_s1, %s8974_s3  ;;  %p8980_p7 = scmp.lt.u32.totalorder %s8974_s3, %s11224_s1 }
 0x230   : > { %p8976_p5 = pnand %p8975_p4, %p8323_p3 }
 0x232   : > { %p8977_p6 = pneg %p8976_p5 }
 0x234   : > { %p8982_p8 = pnand %p8980_p7, %p8977_p6 }
 0x236   : > { %8985 = shalt.err (!%p8982_p8)
}
 0x237   : > { %s8986_s4 = scalar_lea.vmem %s2127_s15, 512  ;;  %p8993_p12 = scmp.lt.s32.totalorder %s2127_s15, %s2127_s15 }
 0x238   : > { %p8987_p9 = scmp.ne.s32.totalorder %s2127_s15, %s8986_s4  ;;  %p8994_p13 = scmp.lt.s32.totalorder %s8986_s4, %s8986_s4 }
 0x23a   : > { %p8988_p10 = pnand %p8987_p9, %p8323_p3  ;;  %p8995_p0 = por %p8994_p13, %p8993_p12 }
 0x23c   : > { %p8989_p11 = pneg %p8988_p10 }
 0x23e   : > { %p8996_p1 = pnand %p8995_p0, %p8989_p11 }
 0x240   : > { %8999 = shalt.err (!%p8996_p1)
}
 0x241   : > { %s11225_s22 = sld [smem:[#allocation130_spill]] }
 0x242   : > { %8230 = dma.hbm_to_vmem [thread:$0]  (%p8323_p3), %s11224_s1, 512, %s2127_s15, [#allocation57], %s11124_s11, %s11124_s11, %s11126_s27  }
 0x247   : > { %s9000_s13 = scalar_lea.hbm %s11225_s22, 16 }
 0x248   : > { %p9001_p4 = scmp.ne.s32.totalorder %s11225_s22, %s9000_s13  ;;  %p9006_p7 = scmp.lt.u32.totalorder %s9000_s13, %s11225_s22 }
 0x24a   : > { %p9002_p5 = pnand %p9001_p4, %p8323_p3 }
 0x24c   : > { %p9003_p6 = pneg %p9002_p5 }
 0x24e   : > { %p9008_p8 = pnand %p9006_p7, %p9003_p6 }
 0x250   : > { %9011 = shalt.err (!%p9008_p8)
}
 0x251   : > { %s9012_s4 = scalar_lea.vmem %s10443_s2, 16  ;;  %s9018_s18 = scalar_lea.vmem %s10443_s2, 32 }
 0x252   : > { %p9013_p9 = scmp.ne.s32.totalorder %s10443_s2, %s9012_s4  ;;  %p9019_p12 = scmp.lt.s32.totalorder %s10443_s2, %s10443_s2 }
 0x253   : > { %p9020_p13 = scmp.lt.s32.totalorder %s9018_s18, %s9012_s4 }
 0x254   : > { %p9014_p10 = pnand %p9013_p9, %p8323_p3 }
 0x255   : > { %p9021_p0 = por %p9020_p13, %p9019_p12 }
 0x256   : > { %p9015_p11 = pneg %p9014_p10 }
 0x258   : > { %p9022_p1 = pnand %p9021_p0, %p9015_p11 }
 0x25a   : > { %9025 = shalt.err (!%p9022_p1)
}
 0x25b   : > { %s11226_s15 = sld [smem:[#allocation133_spill]]  ;;  %s9780_s3 = smov [#allocation62]  }
 0x25c   : > { %8234 = dma.hbm_to_vmem [thread:$0]  (%p8323_p3), %s11225_s22, 16, %s10443_s2, [#allocation60]  }
 0x25d   : > { %s2183_s13 = sshll.u32 %s9780_s3, 4  ;;  %s9781_s11 = smov [#allocation3]   ;;  %s2184_s13 = int_to_ptr.vmem [resolvable:$true] %s2183_s13 }
 0x25e   : > { %s1678_s27 = sshll.u32 %s9781_s11, 4  ;;  %s1679_s27 = int_to_ptr.vmem [resolvable:$true] %s1678_s27 }
 0x261   : > { %s9026_s1 = scalar_lea.hbm %s11226_s15, 512 }
 0x262   : > { %p9027_p4 = scmp.ne.s32.totalorder %s11226_s15, %s9026_s1  ;;  %p9032_p7 = scmp.lt.u32.totalorder %s9026_s1, %s11226_s15 }
 0x264   : > { %p9028_p5 = pnand %p9027_p4, %p8323_p3 }
 0x266   : > { %p9029_p6 = pneg %p9028_p5 }
 0x268   : > { %p9034_p8 = pnand %p9032_p7, %p9029_p6 }
 0x26a   : > { %9037 = shalt.err (!%p9034_p8)
}
 0x26b   : > { %s9038_s4 = scalar_lea.vmem %s2184_s13, 512  ;;  %p9045_p12 = scmp.lt.s32.totalorder %s2184_s13, %s2184_s13 }
 0x26c   : > { %p9039_p9 = scmp.ne.s32.totalorder %s2184_s13, %s9038_s4  ;;  %p9046_p13 = scmp.lt.s32.totalorder %s9038_s4, %s9038_s4 }
 0x26e   : > { %p9040_p10 = pnand %p9039_p9, %p8323_p3  ;;  %p9047_p0 = por %p9046_p13, %p9045_p12 }
 0x270   : > { %p9041_p11 = pneg %p9040_p10 }
 0x272   : > { %p9048_p1 = pnand %p9047_p0, %p9041_p11 }
 0x274   : > { %9051 = shalt.err (!%p9048_p1)
}
 0x275   : > { %s11227_s11 = smov 8   ;;  %s11228_s2 = smov 128  }
 0x276   : > { %s11229_s1 = sld [smem:[#allocation89_spill]] }
 0x277   : > { %8238 = dma.hbm_to_vmem [thread:$0]  (%p8323_p3), %s11226_s15, 512, %s2184_s13, [#allocation63], %s11228_s2, %s11228_s2, %s11227_s11  }
 0x27c   : > { %s9052_s18 = scalar_lea.hbm %s11229_s1, 64 }
 0x27d   : > { %p9053_p4 = scmp.ne.s32.totalorder %s11229_s1, %s9052_s18  ;;  %p9058_p7 = scmp.lt.u32.totalorder %s9052_s18, %s11229_s1 }
 0x27f   : > { %p9054_p5 = pnand %p9053_p4, %p8323_p3 }
 0x281   : > { %p9055_p6 = pneg %p9054_p5 }
 0x283   : > { %p9060_p8 = pnand %p9058_p7, %p9055_p6 }
 0x285   : > { %9063 = shalt.err (!%p9060_p8)
}
 0x286   : > { %s9064_s3 = scalar_lea.vmem %s1679_s27, 64  ;;  %p9071_p12 = scmp.lt.s32.totalorder %s1679_s27, %s1679_s27 }
 0x287   : > { %p9065_p9 = scmp.ne.s32.totalorder %s1679_s27, %s9064_s3  ;;  %p9072_p13 = scmp.lt.s32.totalorder %s9064_s3, %s9064_s3 }
 0x289   : > { %p9066_p10 = pnand %p9065_p9, %p8323_p3  ;;  %p9073_p0 = por %p9072_p13, %p9071_p12 }
 0x28b   : > { %p9067_p11 = pneg %p9066_p10 }
 0x28d   : > { %p9074_p1 = pnand %p9073_p0, %p9067_p11 }
 0x28f   : > { %9077 = shalt.err (!%p9074_p1)
}
 0x290   : > { %s11230_s13 = sld [smem:[#allocation91_spill]]  ;;  %s9782_s4 = smov [#allocation7]  }
 0x291   : > { %8160 = dma.hbm_to_vmem [thread:$0]  (%p8323_p3), %s11229_s1, 64, %s1679_s27, [#allocation4]  }
 0x292   : > { %s1702_s18 = sshll.u32 %s9782_s4, 4  ;;  %s9783_s5 = smov [#allocation10]   ;;  %s1703_s18 = int_to_ptr.vmem [resolvable:$true] %s1702_s18 }
 0x293   : > { %s1734_s6 = sshll.u32 %s9783_s5, 4  ;;  %s1735_s6 = int_to_ptr.vmem [resolvable:$true] %s1734_s6 }
 0x296   : > { %s9078_s7 = scalar_lea.hbm %s11230_s13, 256 }
 0x297   : > { %p9079_p4 = scmp.ne.s32.totalorder %s11230_s13, %s9078_s7  ;;  %p9084_p7 = scmp.lt.u32.totalorder %s9078_s7, %s11230_s13 }
 0x299   : > { %p9080_p5 = pnand %p9079_p4, %p8323_p3 }
 0x29b   : > { %p9081_p6 = pneg %p9080_p5 }
 0x29d   : > { %p9086_p8 = pnand %p9084_p7, %p9081_p6 }
 0x29f   : > { %9089 = shalt.err (!%p9086_p8)
}
 0x2a0   : > { %s9090_s3 = scalar_lea.vmem %s1703_s18, 256  ;;  %p9097_p12 = scmp.lt.s32.totalorder %s1703_s18, %s1703_s18 }
 0x2a1   : > { %p9091_p9 = scmp.ne.s32.totalorder %s1703_s18, %s9090_s3  ;;  %p9098_p13 = scmp.lt.s32.totalorder %s9090_s3, %s9090_s3 }
 0x2a3   : > { %p9092_p10 = pnand %p9091_p9, %p8323_p3  ;;  %p9099_p0 = por %p9098_p13, %p9097_p12 }
 0x2a5   : > { %p9093_p11 = pneg %p9092_p10 }
 0x2a7   : > { %p9100_p1 = pnand %p9099_p0, %p9093_p11 }
 0x2a9   : > { %9103 = shalt.err (!%p9100_p1)
}
 0x2aa   : > { %s11231_s5 = sld [smem:[#allocation95_spill]] }
 0x2ab   : > { %8164 = dma.hbm_to_vmem [thread:$0]  (%p8323_p3), %s11230_s13, 256, %s1703_s18, [#allocation6], %s11228_s2, %s11228_s2, %s11227_s11  }
 0x2b0   : > { %s9104_s27 = scalar_lea.hbm %s11231_s5, 256 }
 0x2b1   : > { %p9105_p4 = scmp.ne.s32.totalorder %s11231_s5, %s9104_s27  ;;  %p9110_p7 = scmp.lt.u32.totalorder %s9104_s27, %s11231_s5 }
 0x2b3   : > { %p9106_p5 = pnand %p9105_p4, %p8323_p3 }
 0x2b5   : > { %p9107_p6 = pneg %p9106_p5 }
 0x2b7   : > { %p9112_p8 = pnand %p9110_p7, %p9107_p6 }
 0x2b9   : > { %9115 = shalt.err (!%p9112_p8)
}
 0x2ba   : > { %s9116_s7 = scalar_lea.vmem %s1735_s6, 256  ;;  %p9123_p12 = scmp.lt.s32.totalorder %s1735_s6, %s1735_s6 }
 0x2bb   : > { %p9117_p9 = scmp.ne.s32.totalorder %s1735_s6, %s9116_s7  ;;  %p9124_p13 = scmp.lt.s32.totalorder %s9116_s7, %s9116_s7 }
 0x2bd   : > { %p9118_p10 = pnand %p9117_p9, %p8323_p3  ;;  %p9125_p0 = por %p9124_p13, %p9123_p12 }
 0x2bf   : > { %p9119_p11 = pneg %p9118_p10 }
 0x2c1   : > { %p9126_p1 = pnand %p9125_p0, %p9119_p11 }
 0x2c3   : > { %9129 = shalt.err (!%p9126_p1)
}
 0x2c4   : > { %s11232_s4 = sld [smem:[#allocation96_spill]]  ;;  %s9784_s18 = smov [#allocation13]  }
 0x2c5   : > { %8168 = dma.hbm_to_vmem [thread:$0]  (%p8323_p3), %s11231_s5, 256, %s1735_s6, [#allocation9], %s11228_s2, %s11228_s2, %s11227_s11  }
 0x2c6   : > { %s1761_s3 = sshll.u32 %s9784_s18, 4  ;;  %s9785_s27 = smov [#allocation16]   ;;  %s1762_s3 = int_to_ptr.vmem [resolvable:$true] %s1761_s3 }
 0x2c7   : > { %s1785_s1 = sshll.u32 %s9785_s27, 4  ;;  %s1786_s1 = int_to_ptr.vmem [resolvable:$true] %s1785_s1 }
 0x2ca   : > { %s9130_s7 = scalar_lea.hbm %s11232_s4, 16 }
 0x2cb   : > { %p9131_p4 = scmp.ne.s32.totalorder %s11232_s4, %s9130_s7  ;;  %p9136_p7 = scmp.lt.u32.totalorder %s9130_s7, %s11232_s4 }
 0x2cd   : > { %p9132_p5 = pnand %p9131_p4, %p8323_p3 }
 0x2cf   : > { %p9133_p6 = pneg %p9132_p5 }
 0x2d1   : > { %p9138_p8 = pnand %p9136_p7, %p9133_p6 }
 0x2d3   : > { %9141 = shalt.err (!%p9138_p8)
}
 0x2d4   : > { %s9142_s8 = scalar_lea.vmem %s1762_s3, 16  ;;  %s9148_s6 = scalar_lea.vmem %s1762_s3, 32 }
 0x2d5   : > { %p9143_p9 = scmp.ne.s32.totalorder %s1762_s3, %s9142_s8  ;;  %p9149_p12 = scmp.lt.s32.totalorder %s1762_s3, %s1762_s3 }
 0x2d6   : > { %p9150_p13 = scmp.lt.s32.totalorder %s9148_s6, %s9142_s8 }
 0x2d7   : > { %p9144_p10 = pnand %p9143_p9, %p8323_p3 }
 0x2d8   : > { %p9151_p0 = por %p9150_p13, %p9149_p12 }
 0x2d9   : > { %p9145_p11 = pneg %p9144_p10 }
 0x2db   : > { %p9152_p1 = pnand %p9151_p0, %p9145_p11 }
 0x2dd   : > { %9155 = shalt.err (!%p9152_p1)
}
 0x2de   : > { %s11233_s18 = sld [smem:[#allocation98_spill]] }
 0x2df   : > { %8172 = dma.hbm_to_vmem [thread:$0]  (%p8323_p3), %s11232_s4, 16, %s1762_s3, [#allocation12]  }
 0x2e4   : > { %s9156_s27 = scalar_lea.hbm %s11233_s18, 16 }
 0x2e5   : > { %p9157_p4 = scmp.ne.s32.totalorder %s11233_s18, %s9156_s27  ;;  %p9162_p7 = scmp.lt.u32.totalorder %s9156_s27, %s11233_s18 }
 0x2e7   : > { %p9158_p5 = pnand %p9157_p4, %p8323_p3 }
 0x2e9   : > { %p9159_p6 = pneg %p9158_p5 }
 0x2eb   : > { %p9164_p8 = pnand %p9162_p7, %p9159_p6 }
 0x2ed   : > { %9167 = shalt.err (!%p9164_p8)
}
 0x2ee   : > { %s9168_s8 = scalar_lea.vmem %s1786_s1, 16  ;;  %s9174_s7 = scalar_lea.vmem %s1786_s1, 32 }
 0x2ef   : > { %p9169_p9 = scmp.ne.s32.totalorder %s1786_s1, %s9168_s8  ;;  %p9175_p12 = scmp.lt.s32.totalorder %s1786_s1, %s1786_s1 }
 0x2f0   : > { %p9176_p13 = scmp.lt.s32.totalorder %s9174_s7, %s9168_s8 }
 0x2f1   : > { %p9170_p10 = pnand %p9169_p9, %p8323_p3 }
 0x2f2   : > { %p9177_p0 = por %p9176_p13, %p9175_p12 }
 0x2f3   : > { %p9171_p11 = pneg %p9170_p10 }
 0x2f5   : > { %p9178_p1 = pnand %p9177_p0, %p9171_p11 }
 0x2f7   : > { %9181 = shalt.err (!%p9178_p1)
}
 0x2f8   : > { %s11234_s3 = sld [smem:[#allocation99_spill]]  ;;  %s9786_s6 = smov [#allocation19]  }
 0x2f9   : > { %8176 = dma.hbm_to_vmem [thread:$0]  (%p8323_p3), %s11233_s18, 16, %s1786_s1, [#allocation15]  }
 0x2fa   : > { %s1809_s27 = sshll.u32 %s9786_s6, 4  ;;  %s9787_s4 = smov [#allocation22]   ;;  %s1810_s27 = int_to_ptr.vmem [resolvable:$true] %s1809_s27 }
 0x2fb   : > { %s1836_s5 = sshll.u32 %s9787_s4, 4  ;;  %s1837_s5 = int_to_ptr.vmem [resolvable:$true] %s1836_s5 }
 0x2fe   : > { %s9182_s9 = scalar_lea.hbm %s11234_s3, 16 }
 0x2ff   : > { %p9183_p4 = scmp.ne.s32.totalorder %s11234_s3, %s9182_s9  ;;  %p9188_p7 = scmp.lt.u32.totalorder %s9182_s9, %s11234_s3 }
 0x301   : > { %p9184_p5 = pnand %p9183_p4, %p8323_p3 }
 0x303   : > { %p9185_p6 = pneg %p9184_p5 }
 0x305   : > { %p9190_p8 = pnand %p9188_p7, %p9185_p6 }
 0x307   : > { %9193 = shalt.err (!%p9190_p8)
}
 0x308   : > { %s9194_s8 = scalar_lea.vmem %s1810_s27, 16  ;;  %s9200_s1 = scalar_lea.vmem %s1810_s27, 32 }
 0x309   : > { %p9195_p9 = scmp.ne.s32.totalorder %s1810_s27, %s9194_s8  ;;  %p9201_p12 = scmp.lt.s32.totalorder %s1810_s27, %s1810_s27 }
 0x30a   : > { %p9202_p13 = scmp.lt.s32.totalorder %s9200_s1, %s9194_s8 }
 0x30b   : > { %p9196_p10 = pnand %p9195_p9, %p8323_p3 }
 0x30c   : > { %p9203_p0 = por %p9202_p13, %p9201_p12 }
 0x30d   : > { %p9197_p11 = pneg %p9196_p10 }
 0x30f   : > { %p9204_p1 = pnand %p9203_p0, %p9197_p11 }
 0x311   : > { %9207 = shalt.err (!%p9204_p1)
}
 0x312   : > { %s11235_s4 = sld [smem:[#allocation103_spill]] }
 0x313   : > { %8180 = dma.hbm_to_vmem [thread:$0]  (%p8323_p3), %s11234_s3, 16, %s1810_s27, [#allocation18]  }
 0x318   : > { %s9208_s9 = scalar_lea.hbm %s11235_s4, 512 }
 0x319   : > { %p9209_p4 = scmp.ne.s32.totalorder %s11235_s4, %s9208_s9  ;;  %p9214_p7 = scmp.lt.u32.totalorder %s9208_s9, %s11235_s4 }
 0x31b   : > { %p9210_p5 = pnand %p9209_p4, %p8323_p3 }
 0x31d   : > { %p9211_p6 = pneg %p9210_p5 }
 0x31f   : > { %p9216_p8 = pnand %p9214_p7, %p9211_p6 }
 0x321   : > { %9219 = shalt.err (!%p9216_p8)
}
 0x322   : > { %s9220_s7 = scalar_lea.vmem %s1837_s5, 512  ;;  %p9227_p12 = scmp.lt.s32.totalorder %s1837_s5, %s1837_s5 }
 0x323   : > { %p9221_p9 = scmp.ne.s32.totalorder %s1837_s5, %s9220_s7  ;;  %p9228_p13 = scmp.lt.s32.totalorder %s9220_s7, %s9220_s7 }
 0x325   : > { %p9222_p10 = pnand %p9221_p9, %p8323_p3  ;;  %p9229_p0 = por %p9228_p13, %p9227_p12 }
 0x327   : > { %p9223_p11 = pneg %p9222_p10 }
 0x329   : > { %p9230_p1 = pnand %p9229_p0, %p9223_p11 }
 0x32b   : > { %9233 = shalt.err (!%p9230_p1)
}
 0x32c   : > { %s11236_s6 = sld [smem:[#allocation105_spill]]  ;;  %s9788_s27 = smov [#allocation25]  }
 0x32d   : > { %8184 = dma.hbm_to_vmem [thread:$0]  (%p8323_p3), %s11235_s4, 512, %s1837_s5, [#allocation21], %s11228_s2, %s11228_s2, %s11227_s11  }
 0x32e   : > { %s1860_s8 = sshll.u32 %s9788_s27, 4  ;;  %s9789_s1 = smov [#allocation28]   ;;  %s1861_s8 = int_to_ptr.vmem [resolvable:$true] %s1860_s8 }
 0x32f   : > { %s1891_s9 = sshll.u32 %s9789_s1, 4  ;;  %s1892_s9 = int_to_ptr.vmem [resolvable:$true] %s1891_s9 }
 0x332   : > { %s9234_s7 = scalar_lea.hbm %s11236_s6, 512 }
 0x333   : > { %p9235_p4 = scmp.ne.s32.totalorder %s11236_s6, %s9234_s7  ;;  %p9240_p7 = scmp.lt.u32.totalorder %s9234_s7, %s11236_s6 }
 0x335   : > { %p9236_p5 = pnand %p9235_p4, %p8323_p3 }
 0x337   : > { %p9237_p6 = pneg %p9236_p5 }
 0x339   : > { %p9242_p8 = pnand %p9240_p7, %p9237_p6 }
 0x33b   : > { %9245 = shalt.err (!%p9242_p8)
}
 0x33c   : > { %s9246_s3 = scalar_lea.vmem %s1861_s8, 512  ;;  %p9253_p12 = scmp.lt.s32.totalorder %s1861_s8, %s1861_s8 }
 0x33d   : > { %p9247_p9 = scmp.ne.s32.totalorder %s1861_s8, %s9246_s3  ;;  %p9254_p13 = scmp.lt.s32.totalorder %s9246_s3, %s9246_s3 }
 0x33f   : > { %p9248_p10 = pnand %p9247_p9, %p8323_p3  ;;  %p9255_p0 = por %p9254_p13, %p9253_p12 }
 0x341   : > { %p9249_p11 = pneg %p9248_p10 }
 0x343   : > { %p9256_p1 = pnand %p9255_p0, %p9249_p11 }
 0x345   : > { %9259 = shalt.err (!%p9256_p1)
}
 0x346   : > { %s11237_s5 = sld [smem:[#allocation108_spill]] }
 0x347   : > { %8188 = dma.hbm_to_vmem [thread:$0]  (%p8323_p3), %s11236_s6, 512, %s1861_s8, [#allocation24], %s11228_s2, %s11228_s2, %s11227_s11  }
 0x34c   : > { %s9260_s27 = scalar_lea.hbm %s11237_s5, 16 }
 0x34d   : > { %p9261_p4 = scmp.ne.s32.totalorder %s11237_s5, %s9260_s27  ;;  %p9266_p7 = scmp.lt.u32.totalorder %s9260_s27, %s11237_s5 }
 0x34f   : > { %p9262_p5 = pnand %p9261_p4, %p8323_p3 }
 0x351   : > { %p9263_p6 = pneg %p9262_p5 }
 0x353   : > { %p9268_p8 = pnand %p9266_p7, %p9263_p6 }
 0x355   : > { %9271 = shalt.err (!%p9268_p8)
}
 0x356   : > { %s9272_s3 = scalar_lea.vmem %s1892_s9, 16  ;;  %s9278_s1 = scalar_lea.vmem %s1892_s9, 32 }
 0x357   : > { %p9273_p9 = scmp.ne.s32.totalorder %s1892_s9, %s9272_s3  ;;  %p9279_p12 = scmp.lt.s32.totalorder %s1892_s9, %s1892_s9 }
 0x358   : > { %p9280_p13 = scmp.lt.s32.totalorder %s9278_s1, %s9272_s3 }
 0x359   : > { %p9274_p10 = pnand %p9273_p9, %p8323_p3 }
 0x35a   : > { %p9281_p0 = por %p9280_p13, %p9279_p12 }
 0x35b   : > { %p9275_p11 = pneg %p9274_p10 }
 0x35d   : > { %p9282_p1 = pnand %p9281_p0, %p9275_p11 }
 0x35f   : > { %9285 = shalt.err (!%p9282_p1)
}
 0x360   : > { %s11238_s8 = sld [smem:[#allocation110_spill]]  ;;  %s9790_s7 = smov [#allocation31]  }
 0x361   : > { %8192 = dma.hbm_to_vmem [thread:$0]  (%p8323_p3), %s11237_s5, 16, %s1892_s9, [#allocation27]  }
 0x362   : > { %s1915_s27 = sshll.u32 %s9790_s7, 4  ;;  %s9791_s4 = smov [#allocation34]   ;;  %s1916_s27 = int_to_ptr.vmem [resolvable:$true] %s1915_s27 }
 0x363   : > { %s1948_s6 = sshll.u32 %s9791_s4, 4  ;;  %s1949_s6 = int_to_ptr.vmem [resolvable:$true] %s1948_s6 }
 0x366   : > { %s9286_s13 = scalar_lea.hbm %s11238_s8, 16 }
 0x367   : > { %p9287_p4 = scmp.ne.s32.totalorder %s11238_s8, %s9286_s13  ;;  %p9292_p7 = scmp.lt.u32.totalorder %s9286_s13, %s11238_s8 }
 0x369   : > { %p9288_p5 = pnand %p9287_p4, %p8323_p3 }
 0x36b   : > { %p9289_p6 = pneg %p9288_p5 }
 0x36d   : > { %p9294_p8 = pnand %p9292_p7, %p9289_p6 }
 0x36f   : > { %9297 = shalt.err (!%p9294_p8)
}
 0x370   : > { %s9298_s3 = scalar_lea.vmem %s1916_s27, 16  ;;  %s9304_s9 = scalar_lea.vmem %s1916_s27, 32 }
 0x371   : > { %p9299_p9 = scmp.ne.s32.totalorder %s1916_s27, %s9298_s3  ;;  %p9305_p12 = scmp.lt.s32.totalorder %s1916_s27, %s1916_s27 }
 0x372   : > { %p9306_p13 = scmp.lt.s32.totalorder %s9304_s9, %s9298_s3 }
 0x373   : > { %p9300_p10 = pnand %p9299_p9, %p8323_p3 }
 0x374   : > { %p9307_p0 = por %p9306_p13, %p9305_p12 }
 0x375   : > { %p9301_p11 = pneg %p9300_p10 }
 0x377   : > { %p9308_p1 = pnand %p9307_p0, %p9301_p11 }
 0x379   : > { %9311 = shalt.err (!%p9308_p1)
}
 0x37a   : > { %s11239_s4 = sld [smem:[#allocation114_spill]] }
 0x37b   : > { %8196 = dma.hbm_to_vmem [thread:$0]  (%p8323_p3), %s11238_s8, 16, %s1916_s27, [#allocation30]  }
 0x380   : > { %s9312_s13 = scalar_lea.hbm %s11239_s4, 16 }
 0x381   : > { %p9313_p4 = scmp.ne.s32.totalorder %s11239_s4, %s9312_s13  ;;  %p9318_p7 = scmp.lt.u32.totalorder %s9312_s13, %s11239_s4 }
 0x383   : > { %p9314_p5 = pnand %p9313_p4, %p8323_p3 }
 0x385   : > { %p9315_p6 = pneg %p9314_p5 }
 0x387   : > { %p9320_p8 = pnand %p9318_p7, %p9315_p6 }
 0x389   : > { %9323 = shalt.err (!%p9320_p8)
}
 0x38a   : > { %s9324_s1 = scalar_lea.vmem %s1949_s6, 16  ;;  %s9330_s7 = scalar_lea.vmem %s1949_s6, 32 }
 0x38b   : > { %p9325_p9 = scmp.ne.s32.totalorder %s1949_s6, %s9324_s1  ;;  %p9331_p12 = scmp.lt.s32.totalorder %s1949_s6, %s1949_s6 }
 0x38c   : > { %p9332_p13 = scmp.lt.s32.totalorder %s9330_s7, %s9324_s1 }
 0x38d   : > { %p9326_p10 = pnand %p9325_p9, %p8323_p3 }
 0x38e   : > { %p9333_p0 = por %p9332_p13, %p9331_p12 }
 0x38f   : > { %p9327_p11 = pneg %p9326_p10 }
 0x391   : > { %p9334_p1 = pnand %p9333_p0, %p9327_p11 }
 0x393   : > { %9337 = shalt.err (!%p9334_p1)
}
 0x394   : > { %s11240_s27 = sld [smem:[#allocation115_spill]]  ;;  %s9792_s3 = smov [#allocation37]  }
 0x395   : > { %8200 = dma.hbm_to_vmem [thread:$0]  (%p8323_p3), %s11239_s4, 16, %s1949_s6, [#allocation33]  }
 0x396   : > { %s1972_s9 = sshll.u32 %s9792_s3, 4  ;;  %s9793_s13 = smov [#allocation40]   ;;  %s1973_s9 = int_to_ptr.vmem [resolvable:$true] %s1972_s9 }
 0x397   : > { %s1996_s5 = sshll.u32 %s9793_s13, 4  ;;  %s1997_s5 = int_to_ptr.vmem [resolvable:$true] %s1996_s5 }
 0x39a   : > { %s9338_s8 = scalar_lea.hbm %s11240_s27, 16 }
 0x39b   : > { %p9339_p4 = scmp.ne.s32.totalorder %s11240_s27, %s9338_s8  ;;  %p9344_p7 = scmp.lt.u32.totalorder %s9338_s8, %s11240_s27 }
 0x39d   : > { %p9340_p5 = pnand %p9339_p4, %p8323_p3 }
 0x39f   : > { %p9341_p6 = pneg %p9340_p5 }
 0x3a1   : > { %p9346_p8 = pnand %p9344_p7, %p9341_p6 }
 0x3a3   : > { %9349 = shalt.err (!%p9346_p8)
}
 0x3a4   : > { %s9350_s1 = scalar_lea.vmem %s1973_s9, 16  ;;  %s9356_s6 = scalar_lea.vmem %s1973_s9, 32 }
 0x3a5   : > { %p9351_p9 = scmp.ne.s32.totalorder %s1973_s9, %s9350_s1  ;;  %p9357_p12 = scmp.lt.s32.totalorder %s1973_s9, %s1973_s9 }
 0x3a6   : > { %p9358_p13 = scmp.lt.s32.totalorder %s9356_s6, %s9350_s1 }
 0x3a7   : > { %p9352_p10 = pnand %p9351_p9, %p8323_p3 }
 0x3a8   : > { %p9359_p0 = por %p9358_p13, %p9357_p12 }
 0x3a9   : > { %p9353_p11 = pneg %p9352_p10 }
 0x3ab   : > { %p9360_p1 = pnand %p9359_p0, %p9353_p11 }
 0x3ad   : > { %9363 = shalt.err (!%p9360_p1)
}
 0x3ae   : > { %s11241_s7 = sld [smem:[#allocation117_spill]] }
 0x3af   : > { %8204 = dma.hbm_to_vmem [thread:$0]  (%p8323_p3), %s11240_s27, 16, %s1973_s9, [#allocation36]  }
 0x3b4   : > { %s9364_s8 = scalar_lea.hbm %s11241_s7, 16 }
 0x3b5   : > { %p9365_p4 = scmp.ne.s32.totalorder %s11241_s7, %s9364_s8  ;;  %p9370_p7 = scmp.lt.u32.totalorder %s9364_s8, %s11241_s7 }
 0x3b7   : > { %p9366_p5 = pnand %p9365_p4, %p8323_p3 }
 0x3b9   : > { %p9367_p6 = pneg %p9366_p5 }
 0x3bb   : > { %p9372_p8 = pnand %p9370_p7, %p9367_p6 }
 0x3bd   : > { %9375 = shalt.err (!%p9372_p8)
}
 0x3be   : > { %s9376_s3 = scalar_lea.vmem %s1997_s5, 16  ;;  %s9382_s13 = scalar_lea.vmem %s1997_s5, 32 }
 0x3bf   : > { %p9377_p9 = scmp.ne.s32.totalorder %s1997_s5, %s9376_s3  ;;  %p9383_p12 = scmp.lt.s32.totalorder %s1997_s5, %s1997_s5 }
 0x3c0   : > { %p9384_p13 = scmp.lt.s32.totalorder %s9382_s13, %s9376_s3 }
 0x3c1   : > { %p9378_p10 = pnand %p9377_p9, %p8323_p3 }
 0x3c2   : > { %p9385_p0 = por %p9384_p13, %p9383_p12 }
 0x3c3   : > { %p9379_p11 = pneg %p9378_p10 }
 0x3c5   : > { %p9386_p1 = pnand %p9385_p0, %p9379_p11 }
 0x3c7   : > { %9389 = shalt.err (!%p9386_p1)
}
 0x3c8   : > { %s11242_s9 = sld [smem:[#allocation118_spill]]  ;;  %s9794_s1 = smov [#allocation43]  }
 0x3c9   : > { %8208 = dma.hbm_to_vmem [thread:$0]  (%p8323_p3), %s11241_s7, 16, %s1997_s5, [#allocation39]  }
 0x3ca   : > { %s2020_s6 = sshll.u32 %s9794_s1, 4  ;;  %s9795_s8 = smov [#allocation46]   ;;  %s2021_s6 = int_to_ptr.vmem [resolvable:$true] %s2020_s6 }
 0x3cb   : > { %s2044_s4 = sshll.u32 %s9795_s8, 4  ;;  %s2045_s4 = int_to_ptr.vmem [resolvable:$true] %s2044_s4 }
 0x3ce   : > { %s9390_s14 = scalar_lea.hbm %s11242_s9, 16 }
 0x3cf   : > { %p9391_p4 = scmp.ne.s32.totalorder %s11242_s9, %s9390_s14  ;;  %p9396_p7 = scmp.lt.u32.totalorder %s9390_s14, %s11242_s9 }
 0x3d1   : > { %p9392_p5 = pnand %p9391_p4, %p8323_p3 }
 0x3d3   : > { %p9393_p6 = pneg %p9392_p5 }
 0x3d5   : > { %p9398_p8 = pnand %p9396_p7, %p9393_p6 }
 0x3d7   : > { %9401 = shalt.err (!%p9398_p8)
}
 0x3d8   : > { %s9402_s3 = scalar_lea.vmem %s2021_s6, 16  ;;  %s9408_s5 = scalar_lea.vmem %s2021_s6, 32 }
 0x3d9   : > { %p9403_p9 = scmp.ne.s32.totalorder %s2021_s6, %s9402_s3  ;;  %p9409_p12 = scmp.lt.s32.totalorder %s2021_s6, %s2021_s6 }
 0x3da   : > { %p9410_p13 = scmp.lt.s32.totalorder %s9408_s5, %s9402_s3 }
 0x3db   : > { %p9404_p10 = pnand %p9403_p9, %p8323_p3 }
 0x3dc   : > { %p9411_p0 = por %p9410_p13, %p9409_p12 }
 0x3dd   : > { %p9405_p11 = pneg %p9404_p10 }
 0x3df   : > { %p9412_p1 = pnand %p9411_p0, %p9405_p11 }
 0x3e1   : > { %9415 = shalt.err (!%p9412_p1)
}
 0x3e2   : > { %s11243_s13 = sld [smem:[#allocation119_spill]] }
 0x3e3   : > { %8212 = dma.hbm_to_vmem [thread:$0]  (%p8323_p3), %s11242_s9, 16, %s2021_s6, [#allocation42]  }
 0x3e8   : > { %s9416_s14 = scalar_lea.hbm %s11243_s13, 16 }
 0x3e9   : > { %p9417_p4 = scmp.ne.s32.totalorder %s11243_s13, %s9416_s14  ;;  %p9422_p7 = scmp.lt.u32.totalorder %s9416_s14, %s11243_s13 }
 0x3eb   : > { %p9418_p5 = pnand %p9417_p4, %p8323_p3 }
 0x3ed   : > { %p9419_p6 = pneg %p9418_p5 }
 0x3ef   : > { %p9424_p8 = pnand %p9422_p7, %p9419_p6 }
 0x3f1   : > { %9427 = shalt.err (!%p9424_p8)
}
 0x3f2   : > { %s9428_s1 = scalar_lea.vmem %s2045_s4, 16  ;;  %s9434_s8 = scalar_lea.vmem %s2045_s4, 32 }
 0x3f3   : > { %p9429_p9 = scmp.ne.s32.totalorder %s2045_s4, %s9428_s1  ;;  %p9435_p12 = scmp.lt.s32.totalorder %s2045_s4, %s2045_s4 }
 0x3f4   : > { %p9436_p13 = scmp.lt.s32.totalorder %s9434_s8, %s9428_s1 }
 0x3f5   : > { %p9430_p10 = pnand %p9429_p9, %p8323_p3 }
 0x3f6   : > { %p9437_p0 = por %p9436_p13, %p9435_p12 }
 0x3f7   : > { %p9431_p11 = pneg %p9430_p10 }
 0x3f9   : > { %p9438_p1 = pnand %p9437_p0, %p9431_p11 }
 0x3fb   : > { %9441 = shalt.err (!%p9438_p1)
}
 0x3fc   : > { %s11244_s6 = sld [smem:[#allocation121_spill]]  ;;  %s9796_s3 = smov [#allocation49]  }
 0x3fd   : > { %8216 = dma.hbm_to_vmem [thread:$0]  (%p8323_p3), %s11243_s13, 16, %s2045_s4, [#allocation45]  }
 0x3fe   : > { %s2068_s5 = sshll.u32 %s9796_s3, 4  ;;  %s9797_s14 = smov [#allocation52]   ;;  %s2069_s5 = int_to_ptr.vmem [resolvable:$true] %s2068_s5 }
 0x3ff   : > { %s2092_s7 = sshll.u32 %s9797_s14, 4  ;;  %s2093_s7 = int_to_ptr.vmem [resolvable:$true] %s2092_s7 }
 0x402   : > { %s9442_s9 = scalar_lea.hbm %s11244_s6, 16 }
 0x403   : > { %p9443_p4 = scmp.ne.s32.totalorder %s11244_s6, %s9442_s9  ;;  %p9448_p7 = scmp.lt.u32.totalorder %s9442_s9, %s11244_s6 }
 0x405   : > { %p9444_p5 = pnand %p9443_p4, %p8323_p3 }
 0x407   : > { %p9445_p6 = pneg %p9444_p5 }
 0x409   : > { %p9450_p8 = pnand %p9448_p7, %p9445_p6 }
 0x40b   : > { %9453 = shalt.err (!%p9450_p8)
}
 0x40c   : > { %s9454_s1 = scalar_lea.vmem %s2069_s5, 16  ;;  %s9460_s4 = scalar_lea.vmem %s2069_s5, 32 }
 0x40d   : > { %p9455_p9 = scmp.ne.s32.totalorder %s2069_s5, %s9454_s1  ;;  %p9461_p12 = scmp.lt.s32.totalorder %s2069_s5, %s2069_s5 }
 0x40e   : > { %p9462_p13 = scmp.lt.s32.totalorder %s9460_s4, %s9454_s1 }
 0x40f   : > { %p9456_p10 = pnand %p9455_p9, %p8323_p3 }
 0x410   : > { %p9463_p0 = por %p9462_p13, %p9461_p12 }
 0x411   : > { %p9457_p11 = pneg %p9456_p10 }
 0x413   : > { %p9464_p1 = pnand %p9463_p0, %p9457_p11 }
 0x415   : > { %9467 = shalt.err (!%p9464_p1)
}
 0x416   : > { %s11245_s8 = sld [smem:[#allocation123_spill]] }
 0x417   : > { %8220 = dma.hbm_to_vmem [thread:$0]  (%p8323_p3), %s11244_s6, 16, %s2069_s5, [#allocation48]  }
 0x41c   : > { %s9468_s9 = scalar_lea.hbm %s11245_s8, 16 }
 0x41d   : > { %p9469_p4 = scmp.ne.s32.totalorder %s11245_s8, %s9468_s9  ;;  %p9474_p7 = scmp.lt.u32.totalorder %s9468_s9, %s11245_s8 }
 0x41f   : > { %p9470_p5 = pnand %p9469_p4, %p8323_p3 }
 0x421   : > { %p9471_p6 = pneg %p9470_p5 }
 0x423   : > { %p9476_p8 = pnand %p9474_p7, %p9471_p6 }
 0x425   : > { %9479 = shalt.err (!%p9476_p8)
}
 0x426   : > { %s9480_s3 = scalar_lea.vmem %s2093_s7, 16  ;;  %s9486_s14 = scalar_lea.vmem %s2093_s7, 32 }
 0x427   : > { %p9481_p9 = scmp.ne.s32.totalorder %s2093_s7, %s9480_s3  ;;  %p9487_p12 = scmp.lt.s32.totalorder %s2093_s7, %s2093_s7 }
 0x428   : > { %p9488_p13 = scmp.lt.s32.totalorder %s9486_s14, %s9480_s3 }
 0x429   : > { %p9482_p10 = pnand %p9481_p9, %p8323_p3 }
 0x42a   : > { %p9489_p0 = por %p9488_p13, %p9487_p12 }
 0x42b   : > { %p9483_p11 = pneg %p9482_p10 }
 0x42d   : > { %p9490_p1 = pnand %p9489_p0, %p9483_p11 }
 0x42f   : > { %9493 = shalt.err (!%p9490_p1)
}
 0x430   : > { %s11246_s5 = sld [smem:[#allocation125_spill]]  ;;  %s9798_s1 = smov [#allocation55]  }
 0x431   : > { %8224 = dma.hbm_to_vmem [thread:$0]  (%p8323_p3), %s11245_s8, 16, %s2093_s7, [#allocation51]  }
 0x432   : > { %s2116_s4 = sshll.u32 %s9798_s1, 4  ;;  %s9799_s9 = smov [#allocation58]   ;;  %s2117_s4 = int_to_ptr.vmem [resolvable:$true] %s2116_s4 }
 0x433   : > { %s2140_s6 = sshll.u32 %s9799_s9, 4  ;;  %s2141_s6 = int_to_ptr.vmem [resolvable:$true] %s2140_s6 }
 0x436   : > { %s9494_s13 = scalar_lea.hbm %s11246_s5, 16 }
 0x437   : > { %p9495_p4 = scmp.ne.s32.totalorder %s11246_s5, %s9494_s13  ;;  %p9500_p7 = scmp.lt.u32.totalorder %s9494_s13, %s11246_s5 }
 0x439   : > { %p9496_p5 = pnand %p9495_p4, %p8323_p3 }
 0x43b   : > { %p9497_p6 = pneg %p9496_p5 }
 0x43d   : > { %p9502_p8 = pnand %p9500_p7, %p9497_p6 }
 0x43f   : > { %9505 = shalt.err (!%p9502_p8)
}
 0x440   : > { %s9506_s3 = scalar_lea.vmem %s2117_s4, 16  ;;  %s9512_s7 = scalar_lea.vmem %s2117_s4, 32 }
 0x441   : > { %p9507_p9 = scmp.ne.s32.totalorder %s2117_s4, %s9506_s3  ;;  %p9513_p12 = scmp.lt.s32.totalorder %s2117_s4, %s2117_s4 }
 0x442   : > { %p9514_p13 = scmp.lt.s32.totalorder %s9512_s7, %s9506_s3 }
 0x443   : > { %p9508_p10 = pnand %p9507_p9, %p8323_p3 }
 0x444   : > { %p9515_p0 = por %p9514_p13, %p9513_p12 }
 0x445   : > { %p9509_p11 = pneg %p9508_p10 }
 0x447   : > { %p9516_p1 = pnand %p9515_p0, %p9509_p11 }
 0x449   : > { %9519 = shalt.err (!%p9516_p1)
}
 0x44a   : > { %s11247_s14 = sld [smem:[#allocation127_spill]] }
 0x44b   : > { %8228 = dma.hbm_to_vmem [thread:$0]  (%p8323_p3), %s11246_s5, 16, %s2117_s4, [#allocation54]  }
 0x450   : > { %s9520_s13 = scalar_lea.hbm %s11247_s14, 16 }
 0x451   : > { %p9521_p4 = scmp.ne.s32.totalorder %s11247_s14, %s9520_s13  ;;  %p9526_p7 = scmp.lt.u32.totalorder %s9520_s13, %s11247_s14 }
 0x453   : > { %p9522_p5 = pnand %p9521_p4, %p8323_p3 }
 0x455   : > { %p9523_p6 = pneg %p9522_p5 }
 0x457   : > { %p9528_p8 = pnand %p9526_p7, %p9523_p6 }
 0x459   : > { %9531 = shalt.err (!%p9528_p8)
}
 0x45a   : > { %s9532_s1 = scalar_lea.vmem %s2141_s6, 16  ;;  %s9538_s9 = scalar_lea.vmem %s2141_s6, 32 }
 0x45b   : > { %p9533_p9 = scmp.ne.s32.totalorder %s2141_s6, %s9532_s1  ;;  %p9539_p12 = scmp.lt.s32.totalorder %s2141_s6, %s2141_s6 }
 0x45c   : > { %p9540_p13 = scmp.lt.s32.totalorder %s9538_s9, %s9532_s1 }
 0x45d   : > { %p9534_p10 = pnand %p9533_p9, %p8323_p3 }
 0x45e   : > { %p9541_p0 = por %p9540_p13, %p9539_p12 }
 0x45f   : > { %p9535_p11 = pneg %p9534_p10 }
 0x461   : > { %p9542_p1 = pnand %p9541_p0, %p9535_p11 }
 0x463   : > { %9545 = shalt.err (!%p9542_p1)
}
 0x464   : > { %s11248_s4 = sld [smem:[#allocation131_spill]]  ;;  %s9800_s3 = smov [#allocation61]  }
 0x465   : > { %8232 = dma.hbm_to_vmem [thread:$0]  (%p8323_p3), %s11247_s14, 16, %s2141_s6, [#allocation57]  }
 0x466   : > { %s2167_s7 = sshll.u32 %s9800_s3, 4  ;;  %s9801_s13 = smov [#allocation64]   ;;  %s2168_s7 = int_to_ptr.vmem [resolvable:$true] %s2167_s7 }
 0x467   : > { %s2199_s5 = sshll.u32 %s9801_s13, 4  ;;  %s2200_s5 = int_to_ptr.vmem [resolvable:$true] %s2199_s5 }
 0x46a   : > { %s9546_s8 = scalar_lea.hbm %s11248_s4, 512 }
 0x46b   : > { %p9547_p4 = scmp.ne.s32.totalorder %s11248_s4, %s9546_s8  ;;  %p9552_p7 = scmp.lt.u32.totalorder %s9546_s8, %s11248_s4 }
 0x46d   : > { %p9548_p5 = pnand %p9547_p4, %p8323_p3 }
 0x46f   : > { %p9549_p6 = pneg %p9548_p5 }
 0x471   : > { %p9554_p8 = pnand %p9552_p7, %p9549_p6 }
 0x473   : > { %9557 = shalt.err (!%p9554_p8)
}
 0x474   : > { %s9558_s1 = scalar_lea.vmem %s2168_s7, 512  ;;  %p9565_p12 = scmp.lt.s32.totalorder %s2168_s7, %s2168_s7 }
 0x475   : > { %p9559_p9 = scmp.ne.s32.totalorder %s2168_s7, %s9558_s1  ;;  %p9566_p13 = scmp.lt.s32.totalorder %s9558_s1, %s9558_s1 }
 0x477   : > { %p9560_p10 = pnand %p9559_p9, %p8323_p3  ;;  %p9567_p0 = por %p9566_p13, %p9565_p12 }
 0x479   : > { %p9561_p11 = pneg %p9560_p10 }
 0x47b   : > { %p9568_p1 = pnand %p9567_p0, %p9561_p11 }
 0x47d   : > { %9571 = shalt.err (!%p9568_p1)
}
 0x47e   : > { %s11249_s6 = sld [smem:[#allocation135_spill]] }
 0x47f   : > { %8236 = dma.hbm_to_vmem [thread:$0]  (%p8323_p3), %s11248_s4, 512, %s2168_s7, [#allocation60], %s11228_s2, %s11228_s2, %s11227_s11  }
 0x484   : > { %s9572_s8 = scalar_lea.hbm %s11249_s6, 512 }
 0x485   : > { %p9573_p4 = scmp.ne.s32.totalorder %s11249_s6, %s9572_s8  ;;  %p9578_p7 = scmp.lt.u32.totalorder %s9572_s8, %s11249_s6 }
 0x487   : > { %p9574_p5 = pnand %p9573_p4, %p8323_p3 }
 0x489   : > { %p9575_p6 = pneg %p9574_p5 }
 0x48b   : > { %p9580_p8 = pnand %p9578_p7, %p9575_p6 }
 0x48d   : > { %9583 = shalt.err (!%p9580_p8)
}
 0x48e   : > { %s9584_s9 = scalar_lea.vmem %s2200_s5, 512  ;;  %p9591_p12 = scmp.lt.s32.totalorder %s2200_s5, %s2200_s5 }
 0x48f   : > { %p9585_p9 = scmp.ne.s32.totalorder %s2200_s5, %s9584_s9  ;;  %p9592_p13 = scmp.lt.s32.totalorder %s9584_s9, %s9584_s9 }
 0x491   : > { %p9586_p10 = pnand %p9585_p9, %p8323_p3  ;;  %p9593_p0 = por %p9592_p13, %p9591_p12 }
 0x493   : > { %p9587_p11 = pneg %p9586_p10 }
 0x495   : > { %p9594_p1 = pnand %p9593_p0, %p9587_p11 }
 0x497   : > { %9597 = shalt.err (!%p9594_p1)
}
 0x498   : > { %8240 = dma.hbm_to_vmem [thread:$0]  (%p8323_p3), %s11249_s6, 512, %s2200_s5, [#allocation63], %s11228_s2, %s11228_s2, %s11227_s11  }
 0x499 PF: > { %2264 = sbr.rel (%p10170_p2) target bundleno = 8811 (0x226b), region = 296  ;;  %p8364_p4 = scmp.eq.s32.totalorder (!%p10170_p2), %s10166_s12, 0 }
 0x4a0   : > { %9603 = dma.done.wait (%p8364_p4), [#allocation4], 64  }
 0x4a1   : > { %9605 = vsyncadd (%p8364_p4), [#allocation4], 4294967232 }
 0x4a2   : > { %9607 = dma.done.wait (%p8364_p4), [#allocation6], 320  }
 0x4a3   : > { %9609 = vsyncadd (%p8364_p4), [#allocation6], 4294966976 }
 0x4a4   : > { %9611 = dma.done.wait (%p8364_p4), [#allocation9], 768  }
 0x4a5   : > { %9613 = vsyncadd (%p8364_p4), [#allocation9], 4294966528 }
 0x4a6   : > { %9615 = dma.done.wait (%p8364_p4), [#allocation12], 528  }
 0x4a7   : > { %9617 = vsyncadd (%p8364_p4), [#allocation12], 4294966768 }
 0x4a8   : > { %9619 = dma.done.wait (%p8364_p4), [#allocation15], 528  }
 0x4a9   : > { %9621 = vsyncadd (%p8364_p4), [#allocation15], 4294966768 }
 0x4aa   : > { %9623 = dma.done.wait (%p8364_p4), [#allocation18], 528  }
 0x4ab   : > { %9625 = vsyncadd (%p8364_p4), [#allocation18], 4294966768 }
 0x4ac   : > { %9627 = dma.done.wait (%p8364_p4), [#allocation21], 528  }
 0x4ad   : > { %9629 = vsyncadd (%p8364_p4), [#allocation21], 4294966768 }
 0x4ae   : > { %9631 = dma.done.wait (%p8364_p4), [#allocation24], 528  }
 0x4af   : > { %9633 = vsyncadd (%p8364_p4), [#allocation24], 4294966768 }
 0x4b0   : > { %9635 = dma.done.wait (%p8364_p4), [#allocation27], 32  }
 0x4b1   : > { %9637 = vsyncadd (%p8364_p4), [#allocation27], 4294967264 }
 0x4b2   : > { %9639 = dma.done.wait (%p8364_p4), [#allocation30], 528  }
 0x4b3   : > { %9641 = vsyncadd (%p8364_p4), [#allocation30], 4294966768 }
 0x4b4   : > { %9643 = dma.done.wait (%p8364_p4), [#allocation33], 528  }
 0x4b5   : > { %9645 = vsyncadd (%p8364_p4), [#allocation33], 4294966768 }
 0x4b6   : > { %9647 = dma.done.wait (%p8364_p4), [#allocation36], 528  }
 0x4b7   : > { %9649 = vsyncadd (%p8364_p4), [#allocation36], 4294966768 }
 0x4b8   : > { %9651 = dma.done.wait (%p8364_p4), [#allocation39], 528  }
 0x4b9   : > { %9653 = vsyncadd (%p8364_p4), [#allocation39], 4294966768 }
 0x4ba   : > { %9655 = dma.done.wait (%p8364_p4), [#allocation42], 528  }
 0x4bb   : > { %9657 = vsyncadd (%p8364_p4), [#allocation42], 4294966768 }
 0x4bc   : > { %9659 = dma.done.wait (%p8364_p4), [#allocation45], 528  }
 0x4bd   : > { %9661 = vsyncadd (%p8364_p4), [#allocation45], 4294966768 }
 0x4be   : > { %9663 = dma.done.wait (%p8364_p4), [#allocation48], 528  }
 0x4bf   : > { %9665 = vsyncadd (%p8364_p4), [#allocation48], 4294966768 }
 0x4c0   : > { %9667 = dma.done.wait (%p8364_p4), [#allocation51], 528  }
 0x4c1   : > { %9669 = vsyncadd (%p8364_p4), [#allocation51], 4294966768 }
 0x4c2   : > { %9671 = dma.done.wait (%p8364_p4), [#allocation54], 528  }
 0x4c3   : > { %9673 = vsyncadd (%p8364_p4), [#allocation54], 4294966768 }
 0x4c4   : > { %9675 = dma.done.wait (%p8364_p4), [#allocation57], 528  }
 0x4c5   : > { %9677 = vsyncadd (%p8364_p4), [#allocation57], 4294966768 }
 0x4c6   : > { %9679 = dma.done.wait (%p8364_p4), [#allocation60], 528  }
 0x4c7   : > { %9681 = vsyncadd (%p8364_p4), [#allocation60], 4294966768 }
 0x4c8   : > { %9683 = dma.done.wait (%p8364_p4), [#allocation63], 1024  }
 0x4c9   : > { %9685 = vsyncadd (%p8364_p4), [#allocation63], 4294966272  ;;  %s11250_s10 = sld [smem:[#allocation86_spill]]  ;;  %s11251_s11 = sld [smem:[#allocation143_spill]]  ;;  %v9802_v1 = vmov 0   ;;  %v2803_v18 = vld [vmem:[%s10148_s23] sm:$0xff] }
 0x4ca   : > { %p2585_p2 = scmp.lt.s32.totalorder %s10166_s12, 1  ;;  %8531 = vset.pattern.permute.xlu1 %v9802_v1  ;;  %8530 = vset.pattern.permute.xlu0 %v9802_v1  ;;  %s11252_s3 = sld [smem:[#allocation87_spill]]  ;;  %v2804_v19 = vld [vmem:[%s10148_s23 + $0x8] sm:$0xff]  ;;  %vm2683_vm0 = vcmask 261120   ;;  %v2805_v47 = vld [vmem:[%s10148_s23 + $0x10] sm:$0xff]  ;;  %v2806_v48 = vld [vmem:[%s10148_s23 + $0x18] sm:$0xff] }
 0x4cb   : > { %s11253_s1 = sld [smem:[#allocation141_spill]]  ;;  %s11254_s8 = sld [smem:[#allocation142_spill]]  ;;  %v7903_v20 = vpack.c.bf16 %v2804_v19, %v2803_v18  ;;  %v7907_v49 = vpack.c.bf16 %v2806_v48, %v2805_v47  ;;  %v7039_v50 = vld [vmem:[%s10143_s29] ss:$0 sm:$0xff]  ;;  %vm2935_vm1 = vcmask 392192   ;;  %v3114_v47 = vld [vmem:[#allocation14 + $0x18] sm:$0xff] }
 0x4cc   : > { %s11277_s12 = smov (!%p2585_p2, %s10166_s12), 1  ;;  %s11255_s9 = sld [smem:[#allocation90_spill]]  ;;  %vm3318_vm2 = vcmask 97280   ;;  %vm3337_vm3 = vcmask 1043456   ;;  %vm9803_vm4 = vmmov 1   ;;  %vm9805_vm6 = vmmov 0  }
 0x4cd   : > { %s8158_s2 = smul.u32 48, %s11277_s12  ;;  %s7187_s7 = sshll.u32 %s11277_s12, 5  ;;  %7904 = vmatprep.subr.bf16.mxu1 %v7903_v20  ;;  %vm10869_vm5 = vmpackc.low %vm3337_vm3, %vm9803_vm4  ;;  %vm4186_vm7 = vcmask 31744   ;;  %vm6414_vm8 = vcmask 7168  }
 0x4ce   : > { %7906 = vmatpush3.bf16.msra.mxu1 %v7903_v20 }
 0x4cf   : > { %s2589_s5 = scalar_lea.vmem %s11250_s10, %s8158_s2  ;;  %v2672_v6 = vld [vmem:[%s11251_s11] sm:$0xff]  ;;  %v2673_v7 = vld [vmem:[%s11251_s11 + $0x8] sm:$0xff]  ;;  %v2674_v8 = vld [vmem:[%s11251_s11 + $0x10] sm:$0xff]  ;;  %7908 = vmatprep.subr.bf16.mxu1 %v7907_v49  ;;  %s11256_s10 = sld [smem:[#allocation93_spill]] }
 0x4d0   : > { %v2602_v2 = vld [vmem:[%s2589_s5 + $0x10] sm:$0xff]  ;;  %v2600_v3 = vld [vmem:[%s2589_s5] sm:$0xff]  ;;  %v2603_v4 = vld [vmem:[%s2589_s5 + $0x18] sm:$0xff]  ;;  %v7895_v9 = vpack.c.bf16 %v2673_v7, %v2672_v6  ;;  %s2594_s13 = scalar_lea.vmem %s11252_s3, %s7187_s7  ;;  %s11257_s2 = sld [smem:[#allocation129_spill]] }
 0x4d1   : > { %2623 = vperm.xlu1 %8531, %v2602_v2   ;;  %2613 = vperm.xlu0 %8530, %v2600_v3   ;;  %v2601_v5 = vld [vmem:[%s2589_s5 + $0x8] sm:$0xff]  ;;  %v2675_v10 = vld [vmem:[%s11251_s11 + $0x18] sm:$0xff]  ;;  %v2604_v12 = vld [vmem:[%s2589_s5 + $0x20] sm:$0xff]  ;;  %s11261_s3 = sld [smem:[#allocation132_spill]]  ;;  %s11262_s7 = sld [smem:[#allocation134_spill]] }
 0x4d2   : > { %v2605_v11 = vld [vmem:[%s2589_s5 + $0x28] sm:$0xff]  ;;  %v7899_v13 = vpack.c.bf16 %v2675_v10, %v2674_v8  ;;  %7896 = vmatprep.subr.bf16.mxu0 %v7895_v9  ;;  %v2606_v15 = vld [vmem:[%s2594_s13] sm:$0xff]  ;;  %v2609_v16 = vld [vmem:[%s2594_s13 + $0x18] sm:$0xff]  ;;  %7910 = vmatpush3.bf16.msra.mxu1 %v7907_v49  ;;  %s11260_s5 = sld [smem:[#allocation128_spill]] }
 0x4d3   : > { %7898 = vmatpush3.bf16.msra.mxu0 %v7895_v9  ;;  %v2607_v14 = vld [vmem:[%s2594_s13 + $0x8] sm:$0xff]  ;;  %v2608_v17 = vld [vmem:[%s2594_s13 + $0x10] sm:$0xff]  ;;  %v7037_v21 = vld [vmem:[%s11253_s1] ss:$0 sm:$0xff]  ;;  %s11263_s13 = sld [smem:[#allocation137_spill]]  ;;  %s11264_s1 = sld [smem:[#allocation139_spill]] }
 0x4d4   : > { %7900 = vmatprep.subr.bf16.mxu0 %v7899_v13  ;;  %v7038_v22 = vld [vmem:[%s11254_s8] ss:$0 sm:$0xff]  ;;  %v3017_v6 = vld [vmem:[#allocation11] sm:$0xff]  ;;  %v3018_v7 = vld [vmem:[#allocation11 + $0x8] sm:$0xff]  ;;  %s11265_s8 = sld [smem:[#allocation136_spill]] }
 0x4d5   : > { %2628 = vperm.xlu1 %8531, %v2603_v4   ;;  %2618 = vperm.xlu0 %8530, %v2601_v5   ;;  %v2933_v5 = vld [vmem:[%s11255_s9] sm:$0xff]  ;;  %v7923_v9 = vpack.c.bf16 %v3018_v7, %v3017_v6  ;;  %v3205_v49 = vld [vmem:[#allocation17] sm:$0xff] }
 0x4d6   : > { %v3019_v8 = vld [vmem:[#allocation11 + $0x10] sm:$0xff]  ;;  %v3020_v10 = vld [vmem:[#allocation11 + $0x18] sm:$0xff] }
 0x4d7   : > { %7902 = vmatpush3.bf16.msra.mxu0 %v7899_v13  ;;  %7924 = vmatprep.subr.bf16.mxu1 %v7923_v9  ;;  %v3436_v6 = vld [vmem:[%s11257_s2] sm:$0xff]  ;;  %v3437_v7 = vld [vmem:[%s11257_s2 + $0x8] sm:$0xff] }
 0x4d9   : > { %2638 = vperm.xlu1 %8531, %v2605_v11   ;;  %2633 = vperm.xlu0 %8530, %v2604_v12   ;;  %v7927_v11 = vpack.c.bf16 %v3020_v10, %v3019_v8  ;;  %v7046_v12 = vld [vmem:[%s10153_s17] ss:$0 sm:$0xff]  ;;  %v3438_v8 = vld [vmem:[%s11257_s2 + $0x10] sm:$0xff]  ;;  %v3439_v10 = vld [vmem:[%s11257_s2 + $0x18] sm:$0xff]  ;;  %s11275_s2 = sld [smem:[#allocation106_spill]] }
 0x4dd   : > { %5078 = vperm.xlu1 %8531, %v2607_v14   ;;  %5073 = vperm.xlu0 %8530, %v2606_v15  }
 0x4e1   : > { %5088 = vperm.xlu1 %8531, %v2609_v16   ;;  %5083 = vperm.xlu0 %8530, %v2608_v17  }
 0x550   : > { %v10818_v23 = vpop.permute.xlu1 %2623  ;;  %v10820_v24 = vpop.permute.xlu0 %2613 }
 0x551   : > { %v2649_v25 = vmul.f32 %v7037_v21, %v10818_v23  ;;  %v2647_v26 = vmul.f32 %v7037_v21, %v10820_v24 }
 0x553   : > { %v2660_v27 = vadd.f32 %v7038_v22, %v2647_v26  ;;  %v2662_v28 = vadd.f32 %v7038_v22, %v2649_v25 }
 0x554   : > { %v10824_v29 = vpop.permute.xlu1 %2628  ;;  %v10826_v30 = vpop.permute.xlu0 %2618 }
 0x555   : > { %v2650_v31 = vmul.f32 %v7037_v21, %v10824_v29  ;;  %v2648_v32 = vmul.f32 %v7037_v21, %v10826_v30  ;;  %v2666_v33 = vmax.f32 %v2660_v27, 0.0  ;;  %v2668_v35 = vmax.f32 %v2662_v28, 0.0 }
 0x557   : > { %v2661_v34 = vadd.f32 %v7038_v22, %v2648_v32  ;;  %7447 = vmatprep.mubr.msk.f32.mxu0 %vm2683_vm0, %v2666_v33  ;;  %v2663_v38 = vadd.f32 %v7038_v22, %v2650_v31 }
 0x558   : > { %v10831_v36 = vpop.permute.xlu1 %2638  ;;  %v10833_v37 = vpop.permute.xlu0 %2633 }
 0x559   : > { %v2667_v39 = vmax.f32 %v2661_v34, 0.0  ;;  %v2652_v40 = vmul.f32 %v7037_v21, %v10831_v36  ;;  %v2651_v41 = vmul.f32 %v7037_v21, %v10833_v37  ;;  %v2669_v43 = vmax.f32 %v2663_v38, 0.0 }
 0x55b   : > { %v2664_v42 = vadd.f32 %v7038_v22, %v2651_v41  ;;  %7448 = vmatmul.mubr.msk.f32.vlgmr.msra.gmra.mrb[0].mxu0 %vm2683_vm0, %v2667_v39  ;;  %v2665_v44 = vadd.f32 %v7038_v22, %v2652_v40  ;;  %v2934_v40 = vld [vmem:[%s11255_s9 + $0x8] sm:$0xf] }
 0x55c   : > { %7450 = vmatprep.mubr.msk.f32.mxu0 %vm2683_vm0, %v2668_v35  ;;  %v3111_v41 = vld [vmem:[#allocation14] sm:$0xff] }
 0x55d   : > { %v2670_v45 = vmax.f32 %v2664_v42, 0.0  ;;  %v2671_v46 = vmax.f32 %v2665_v44, 0.0  ;;  %v3112_v42 = vld [vmem:[#allocation14 + $0x8] sm:$0xff] }
 0x55f   : > { %7451 = vmatmul.mubr.msk.f32.gmra.mrb[2].mxu0 %vm2683_vm0, %v2669_v43  ;;  %v7931_v43 = vpack.c.bf16 %v3112_v42, %v3111_v41  ;;  %v3580_v41 = vld [vmem:[#allocation61 + $0x10] sm:$0xff]  ;;  %v3581_v42 = vld [vmem:[#allocation61 + $0x18] sm:$0xff] }
 0x560   : > { %7453 = vmatprep.mubr.msk.f32.mxu0 %vm2683_vm0, %v2670_v45 }
 0x563   : > { %7454 = vmatmul.mubr.msk.f32.gmra.mrb[4].mxu0 %vm2683_vm0, %v2671_v46  ;;  %v3113_v46 = vld [vmem:[#allocation14 + $0x10] sm:$0xff] }
 0x564   : > { %7485 = vmatprep.mubr.msk.f32.mxu0 %vm2935_vm1, %v2933_v5  ;;  %v7935_v48 = vpack.c.bf16 %v3114_v47, %v3113_v46  ;;  %v3312_v5 = vld [vmem:[%s11256_s10] sm:$0xff] }
 0x565   : > { %v7064_v47 = vld [vmem:[%s11260_s5] ss:$0 sm:$0xff]  ;;  %s11266_s5 = sld [smem:[#allocation138_spill]] }
 0x62e   : > { %v7449_v51 = vpop.f32.mrb[0].mxu0 }
 0x62f   : > { %v2774_v52 = vadd.f32 %v7449_v51, %v7039_v50  ;;  %v2768_v53 = vpop.f32.mrb[1].mxu0 }
 0x630   : > { %v2769_v54 = vadd.f32 %v7039_v50, %v2768_v53 }
 0x631   : > { %v2798_v57 = vmax.f32 %v2774_v52, 0.0  ;;  %v7055_v52 = vld [vmem:[#allocation13] ss:$0 sm:$0xff] }
 0x632   : > { %v2797_v55 = vmax.f32 %v2769_v54, 0.0  ;;  %v7452_v56 = vpop.f32.mrb[2].mxu0 }
 0x633   : > { %v2784_v58 = vadd.f32 %v7452_v56, %v7039_v50  ;;  %v2778_v59 = vpop.f32.mrb[3].mxu0 }
 0x634   : > { %v2779_v60 = vadd.f32 %v7039_v50, %v2778_v59  ;;  %7464 = vmatprep.mubr.msk.f32.mxu1 %vm2683_vm0, %v2797_v55  ;;  %v3207_v59 = vld [vmem:[#allocation17 + $0x10] sm:$0xff] }
 0x635   : > { %7465 = vmatmul.mubr.msk.f32.vlgmr.msra.gmra.mrb[0].mxu1 %vm2683_vm0, %v2798_v57  ;;  %v2800_v63 = vmax.f32 %v2784_v58, 0.0 }
 0x636   : > { %v2799_v61 = vmax.f32 %v2779_v60, 0.0  ;;  %v7455_v62 = vpop.f32.mrb[4].mxu0  ;;  %7926 = vmatpush3.bf16.msra.mxu1 %v7923_v9  ;;  %v3208_v60 = vld [vmem:[#allocation17 + $0x18] sm:$0xff]  ;;  %v7953_v9 = vpack.c.bf16 %v3437_v7, %v3436_v6 }
 0x637   : > { %v2794_v0 = vadd.f32 %v7455_v62, %v7039_v50  ;;  %v2788_v1 = vpop.f32.mrb[5].mxu0  ;;  %7928 = vmatprep.subr.bf16.mxu1 %v7927_v11  ;;  %v7058_v62 = vld [vmem:[#allocation16] ss:$0 sm:$0xff] }
 0x638   : > { %v2789_v2 = vadd.f32 %v7039_v50, %v2788_v1  ;;  %7467 = vmatprep.mubr.msk.f32.mxu1 %vm2683_vm0, %v2799_v61  ;;  %v3206_v50 = vld [vmem:[#allocation17 + $0x8] sm:$0xff]  ;;  %v7943_v61 = vpack.c.bf16 %v3208_v60, %v3207_v59  ;;  %v3308_v59 = vmul.f32 %v7064_v47, %v10818_v23 }
 0x639   : > { %7468 = vmatmul.mubr.msk.f32.gmra.mrb[2].mxu1 %vm2683_vm0, %v2800_v63  ;;  %v2802_v4 = vmax.f32 %v2794_v0, 0.0  ;;  %v7939_v51 = vpack.c.bf16 %v3206_v50, %v3205_v49  ;;  %v7078_v50 = vld [vmem:[#allocation59] ss:$0 sm:$0xff] }
 0x63a   : > { %v2801_v3 = vmax.f32 %v2789_v2, 0.0  ;;  %7930 = vmatpush3.bf16.msra.mxu1 %v7927_v11  ;;  %v7957_v11 = vpack.c.bf16 %v3439_v10, %v3438_v8 }
 0x63b   : > { %7940 = vmatprep.subr.bf16.mxu1 %v7939_v51 }
 0x63c   : > { %7470 = vmatprep.mubr.msk.f32.mxu1 %vm2683_vm0, %v2801_v3 }
 0x63d   : > { %7471 = vmatmul.mubr.msk.f32.gmra.mrb[4].mxu1 %vm2683_vm0, %v2802_v4 }
 0x708   : > { %v7466_v13 = vpop.f32.mrb[0].mxu1 }
 0x709   : > { %v2904_v14 = vadd.f32 %v7466_v13, %v7046_v12  ;;  %v2898_v15 = vpop.f32.mrb[1].mxu1 }
 0x70a   : > { %v2899_v16 = vadd.f32 %v7046_v12, %v2898_v15 }
 0x70b   : > { %v2928_v17 = vmax.f32 %v2904_v14, 0.0 }
 0x70c   : > { %v2927_v18 = vmax.f32 %v2899_v16, 0.0  ;;  %v7469_v19 = vpop.f32.mrb[2].mxu1 }
 0x70d   : > { %v2914_v20 = vadd.f32 %v7469_v19, %v7046_v12  ;;  %v2908_v21 = vpop.f32.mrb[3].mxu1 }
 0x70e   : > { %v7911_v22 = vpack.c.bf16 %v2928_v17, %v2927_v18  ;;  %v2909_v25 = vadd.f32 %v7046_v12, %v2908_v21  ;;  %v3313_v21 = vld [vmem:[%s11256_s10 + $0x8] sm:$0xff] }
 0x70f   : > { %v2930_v26 = vmax.f32 %v2914_v20, 0.0 }
 0x710   : > { %v2929_v27 = vmax.f32 %v2909_v25, 0.0  ;;  %v7472_v28 = vpop.f32.mrb[4].mxu1  ;;  %7912 = vmatprep.subr.bf16.mxu0 %v7911_v22  ;;  %v3315_v25 = vld [vmem:[%s11256_s10 + $0x18] sm:$0xff] }
 0x711   : > { %v2924_v31 = vadd.f32 %v7472_v28, %v7046_v12  ;;  %v2918_v32 = vpop.f32.mrb[5].mxu1  ;;  %7914 = vmatpush3.bf16.msra.mxu0 %v7911_v22  ;;  %v3314_v22 = vld [vmem:[%s11256_s10 + $0x10] sm:$0xff] }
 0x712   : > { %v7915_v33 = vpack.c.bf16 %v2930_v26, %v2929_v27  ;;  %v2919_v34 = vadd.f32 %v7046_v12, %v2918_v32  ;;  %v7061_v12 = vld [vmem:[#allocation19] ss:$0 sm:$0xff]  ;;  %v3316_v26 = vld [vmem:[%s11256_s10 + $0x20] sm:$0xff] }
 0x713   : > { %v2932_v35 = vmax.f32 %v2924_v31, 0.0  ;;  %v3317_v27 = vld [vmem:[%s11256_s10 + $0x28] sm:$0xff]  ;;  %v3579_v31 = vld [vmem:[#allocation61 + $0x8] sm:$0xff] }
 0x714   : > { %v2931_v38 = vmax.f32 %v2919_v34, 0.0  ;;  %7916 = vmatprep.subr.bf16.mxu0 %v7915_v33  ;;  %v3578_v28 = vld [vmem:[#allocation61] sm:$0xff] }
 0x715   : > { %7918 = vmatpush3.bf16.msra.mxu0 %v7915_v33  ;;  %v7961_v32 = vpack.c.bf16 %v3579_v31, %v3578_v28 }
 0x716   : > { %v7919_v39 = vpack.c.bf16 %v2932_v35, %v2931_v38 }
 0x718   : > { %7920 = vmatprep.subr.bf16.mxu0 %v7919_v39 }
 0x719   : > { %7922 = vmatpush3.bf16.msra.mxu0 %v7919_v39 }
 0x71a   : > { %7932 = vmatprep.subr.bf16.mxu0 %v7931_v43 }
 0x71c   : > { %7486 = vmatmul.mubr.msk.f32.vlgmr.msra.gmra.mrb[6].mxu0 %vm2935_vm1, %v2934_v40 }
 0x71d   : > { %7934 = vmatpush3.bf16.msra.mxu0 %v7931_v43  ;;  %v7965_v43 = vpack.c.bf16 %v3581_v42, %v3580_v41 }
 0x71e   : > { %7936 = vmatprep.subr.bf16.mxu0 %v7935_v48 }
 0x721   : > { %7938 = vmatpush3.bf16.msra.mxu0 %v7935_v48  ;;  %v3307_v48 = vmul.f32 %v7064_v47, %v10826_v30 }
 0x7ef   : > { %v7487_v44 = vpop.f32.mrb[6].mxu0 }
 0x7f0   : > { %v3008_v45 = vpop.f32.mrb[7].mxu0 }
 0x7f1   : > { %7496 = vmatprep.mubr.msk.f32.mxu1 %vm2683_vm0, %v3008_v45  ;;  %v3709_v45 = vld [vmem:[#allocation62 + $0x8] sm:$0xff] }
 0x7f2   : > { %7497 = vmatmul.mubr.msk.f32.vlgmr.msra.gmra.mrb[6].mxu1 %vm2683_vm0, %v7487_v44  ;;  %v3708_v44 = vld [vmem:[#allocation62] sm:$0xff] }
 0x7f3   : > { %7942 = vmatpush3.bf16.msra.mxu1 %v7939_v51  ;;  %v7969_v46 = vpack.c.bf16 %v3709_v45, %v3708_v44  ;;  %v3306_v51 = vmul.f32 %v7064_v47, %v10820_v24  ;;  %v9804_v44 = vmov 0.0|0.0   ;;  %v9806_v45 = vmov 0.0  }
 0x7f4   : > { %7944 = vmatprep.subr.bf16.mxu1 %v7943_v61 }
 0x7f7   : > { %7946 = vmatpush3.bf16.msra.mxu1 %v7943_v61 }
 0x7f8   : > { %7954 = vmatprep.subr.bf16.mxu1 %v7953_v9 }
 0x8c5   : > { %v7498_v53 = vpop.f32.mrb[6].mxu1 }
 0x8c6   : > { %v3106_v54 = vadd.f32 %v7498_v53, %v7055_v52  ;;  %v3100_v55 = vpop.f32.mrb[7].mxu1 }
 0x8c7   : > { %v3101_v56 = vadd.f32 %v7055_v52, %v3100_v55 }
 0x8c8   : > { %v3110_v58 = vmax.f32 %v3106_v54, 0.0 }
 0x8c9   : > { %v3109_v57 = vmax.f32 %v3101_v56, 0.0  ;;  %v3309_v56 = vmul.f32 %v7064_v47, %v10824_v29 }
 0x8cb   : > { %7507 = vmatprep.mubr.msk.f32.mxu0 %vm2683_vm0, %v3109_v57 }
 0x8cc   : > { %7508 = vmatmul.mubr.msk.f32.vlgmr.msra.gmra.mrb[8].mxu0 %vm2683_vm0, %v3110_v58 }
 0x8cd   : > { %7525 = vmatprep.mubr.msk.f32.mxu0 %vm3318_vm2, %v3312_v5  ;;  %v3310_v5 = vmul.f32 %v7064_v47, %v10833_v37 }
 0x99f   : > { %v7509_v63 = vpop.f32.mrb[8].mxu0 }
 0x9a0   : > { %v3200_v0 = vadd.f32 %v7509_v63, %v7058_v62  ;;  %v3194_v1 = vpop.f32.mrb[9].mxu0 }
 0x9a1   : > { %v3195_v2 = vadd.f32 %v7058_v62, %v3194_v1 }
 0x9a2   : > { %v3204_v4 = vmax.f32 %v3200_v0, 0.0 }
 0x9a3   : > { %v3203_v3 = vmax.f32 %v3195_v2, 0.0  ;;  %v3311_v2 = vmul.f32 %v7064_v47, %v10831_v36  ;;  %v3913_v47 = vld [vmem:[#allocation64 + $0x8] sm:$0xff] }
 0x9a5   : > { %7518 = vmatprep.mubr.msk.f32.mxu1 %vm2683_vm0, %v3203_v3 }
 0x9a6   : > { %7519 = vmatmul.mubr.msk.f32.vlgmr.msra.gmra.mrb[8].mxu1 %vm2683_vm0, %v3204_v4 }
 0x9a7   : > { %7956 = vmatpush3.bf16.msra.mxu1 %v7953_v9 }
 0x9a8   : > { %7958 = vmatprep.subr.bf16.mxu1 %v7957_v11 }
 0x9ab   : > { %7960 = vmatpush3.bf16.msra.mxu1 %v7957_v11 }
 0x9ac   : > { %7970 = vmatprep.subr.bf16.mxu1 %v7969_v46 }
 0xa79   : > { %v7520_v13 = vpop.f32.mrb[8].mxu1 }
 0xa7a   : > { %v3294_v14 = vadd.f32 %v7520_v13, %v7061_v12  ;;  %v3288_v15 = vpop.f32.mrb[9].mxu1 }
 0xa7b   : > { %v3289_v16 = vadd.f32 %v7061_v12, %v3288_v15  ;;  %v3710_v15 = vld [vmem:[#allocation62 + $0x10] sm:$0xff] }
 0xa7c   : > { %v3298_v17 = vmax.f32 %v3294_v14, 0.0 }
 0xa7d   : > { %v3297_v18 = vmax.f32 %v3289_v16, 0.0  ;;  %v3711_v16 = vld [vmem:[#allocation62 + $0x18] sm:$0xff] }
 0xa7f   : > { %v7947_v20 = vpack.c.bf16 %v3298_v17, %v3297_v18  ;;  %v7973_v17 = vpack.c.bf16 %v3711_v16, %v3710_v15  ;;  %v7079_v18 = vld [vmem:[%s11261_s3] ss:$0 sm:$0xff]  ;;  %v3999_v16 = vld [vmem:[%s11263_s13 + $0x10] sm:$0xff]  ;;  %s11267_s3 = sld [smem:[#allocation92_spill]] }
 0xa81   : > { %7949 = vmatprep.subr.msk.bf16.mxu0 %vm10869_vm5, %v7947_v20 }
 0xa82   : > { %7952 = vmatpush3.bf16.msk.msra.mxu0 %vm10869_vm5, %v7947_v20 }
 0xa83   : > { %7962 = vmatprep.subr.bf16.mxu0 %v7961_v32 }
 0xa85   : > { %7526 = vmatmul.mubr.msk.f32.vlgmr.msra.gmra.mrb[10].mxu0 %vm3318_vm2, %v3313_v21 }
 0xa86   : > { %7528 = vmatprep.mubr.msk.f32.mxu0 %vm3318_vm2, %v3314_v22  ;;  %7964 = vmatpush3.bf16.msra.mxu0 %v7961_v32 }
 0xa87   : > { %7966 = vmatprep.subr.bf16.mxu0 %v7965_v43 }
 0xa89   : > { %7529 = vmatmul.mubr.msk.f32.gmra.mrb[12].mxu0 %vm3318_vm2, %v3315_v25 }
 0xa8a   : > { %7531 = vmatprep.mubr.msk.f32.mxu0 %vm3318_vm2, %v3316_v26  ;;  %7968 = vmatpush3.bf16.msra.mxu0 %v7965_v43 }
 0xa8b   : > { %7977 = vmatprep.subr.bf16.mxu0 %v9804_v44 }
 0xa8d   : > { %7532 = vmatmul.mubr.msk.f32.gmra.mrb[14].mxu0 %vm3318_vm2, %v3317_v27 }
 0xb58   : > { %v7527_v33 = vpop.f32.mrb[10].mxu0 }
 0xb59   : > { %v3407_v34 = vpop.f32.mrb[11].mxu0 }
 0xb5a   : > { %7542 = vmatprep.mubr.msk.f32.mxu1 %vm2683_vm0, %v3407_v34 }
 0xb5b   : > { %7543 = vmatmul.mubr.msk.f32.vlgmr.msra.gmra.mrb[10].mxu1 %vm2683_vm0, %v7527_v33 }
 0xb5c   : > { %v7530_v35 = vpop.f32.mrb[12].mxu0  ;;  %7972 = vmatpush3.bf16.msra.mxu1 %v7969_v46  ;;  %v3912_v46 = vld [vmem:[#allocation64] sm:$0xff] }
 0xb5d   : > { %v3417_v38 = vpop.f32.mrb[13].mxu0  ;;  %7974 = vmatprep.subr.bf16.mxu1 %v7973_v17 }
 0xb5e   : > { %7545 = vmatprep.mubr.msk.f32.mxu1 %vm2683_vm0, %v3417_v38 }
 0xb5f   : > { %7546 = vmatmul.mubr.msk.f32.gmra.mrb[12].mxu1 %vm2683_vm0, %v7530_v35 }
 0xb60   : > { %v7533_v39 = vpop.f32.mrb[14].mxu0  ;;  %7976 = vmatpush3.bf16.msra.mxu1 %v7973_v17  ;;  %v4000_v17 = vld [vmem:[%s11263_s13 + $0x18] sm:$0xff] }
 0xb61   : > { %v3427_v40 = vpop.f32.mrb[15].mxu0  ;;  %7986 = vmatprep.subr.bf16.mxu1 %v9804_v44 }
 0xb62   : > { %7548 = vmatprep.mubr.msk.f32.mxu1 %vm2683_vm0, %v3427_v40 }
 0xb63   : > { %7549 = vmatmul.mubr.msk.f32.gmra.mrb[14].mxu1 %vm2683_vm0, %v7533_v39 }
 0xc2e   : > { %v7544_v49 = vpop.f32.mrb[10].mxu1 }
 0xc2f   : > { %v3554_v52 = vadd.f32 %v7544_v49, %v3307_v48  ;;  %v3524_v53 = vpop.f32.mrb[11].mxu1  ;;  %v3914_v48 = vld [vmem:[#allocation64 + $0x10] sm:$0xff]  ;;  %v7987_v49 = vpack.c.bf16 %v3913_v47, %v3912_v46 }
 0xc30   : > { %v3553_v54 = vadd.f32 %v3524_v53, %v3306_v51 }
 0xc31   : > { %v3567_v55 = vadd.f32 %v7078_v50, %v3554_v52  ;;  %v7086_v52 = vld [vmem:[%s11262_s7] ss:$0 sm:$0xff]  ;;  %s11268_s7 = sld [smem:[#allocation101_spill]] }
 0xc32   : > { %v3566_v57 = vadd.f32 %v7078_v50, %v3553_v54  ;;  %v7547_v58 = vpop.f32.mrb[12].mxu1 }
 0xc33   : > { %v3556_v60 = vadd.f32 %v7547_v58, %v3309_v56  ;;  %v3534_v61 = vpop.f32.mrb[13].mxu1  ;;  %v3573_v0 = vmax.f32 %v3567_v55, 0.0 }
 0xc34   : > { %v3572_v62 = vmax.f32 %v3566_v57, 0.0  ;;  %v3555_v63 = vadd.f32 %v3534_v61, %v3308_v59 }
 0xc35   : > { %v3569_v1 = vadd.f32 %v7078_v50, %v3556_v60 }
 0xc36   : > { %v3568_v3 = vadd.f32 %v7078_v50, %v3555_v63  ;;  %v7550_v4 = vpop.f32.mrb[14].mxu1  ;;  %7559 = vmatprep.mubr.msk.f32.mxu0 %vm2683_vm0, %v3572_v62 }
 0xc37   : > { %v3558_v6 = vadd.f32 %v7550_v4, %v3311_v2  ;;  %v3544_v7 = vpop.f32.mrb[15].mxu1  ;;  %7560 = vmatmul.mubr.msk.f32.vlgmr.msra.gmra.mrb[16].mxu0 %vm2683_vm0, %v3573_v0  ;;  %v3575_v10 = vmax.f32 %v3569_v1, 0.0  ;;  %v4304_v46 = vld [vmem:[%s11268_s7 + $0x8] sm:$0xff]  ;;  %v4305_v47 = vld [vmem:[%s11268_s7 + $0x10] sm:$0xff] }
 0xc38   : > { %v3574_v8 = vmax.f32 %v3568_v3, 0.0  ;;  %v3557_v9 = vadd.f32 %v3544_v7, %v3310_v5 }
 0xc39   : > { %v3571_v11 = vadd.f32 %v7078_v50, %v3558_v6 }
 0xc3a   : > { %v3570_v12 = vadd.f32 %v7078_v50, %v3557_v9  ;;  %7562 = vmatprep.mubr.msk.f32.mxu0 %vm2683_vm0, %v3574_v8  ;;  %v3915_v50 = vld [vmem:[#allocation64 + $0x18] sm:$0xff] }
 0xc3b   : > { %7563 = vmatmul.mubr.msk.f32.gmra.mrb[18].mxu0 %vm2683_vm0, %v3575_v10  ;;  %v3577_v14 = vmax.f32 %v3571_v11, 0.0  ;;  %v7990_v51 = vpack.c.bf16 %v3915_v50, %v3914_v48  ;;  %v3838_v10 = vld [vmem:[#allocation3] sm:$0xf] }
 0xc3c   : > { %v3576_v13 = vmax.f32 %v3570_v12, 0.0  ;;  %v3997_v11 = vld [vmem:[%s11263_s13] sm:$0xff]  ;;  %v3998_v12 = vld [vmem:[%s11263_s13 + $0x8] sm:$0xff] }
 0xc3e   : > { %7565 = vmatprep.mubr.msk.f32.mxu0 %vm2683_vm0, %v3576_v13  ;;  %v7993_v13 = vpack.c.bf16 %v3998_v12, %v3997_v11 }
 0xc3f   : > { %7566 = vmatmul.mubr.msk.f32.gmra.mrb[20].mxu0 %vm2683_vm0, %v3577_v14 }
 0xc40   : > { %7597 = vmatprep.mubr.msk.f32.mxu0 %vm9805_vm6, %v9806_v45 }
 0xd0a   : > { %v7561_v20 = vpop.f32.mrb[16].mxu0 }
 0xd0b   : > { %v3679_v21 = vadd.f32 %v7561_v20, %v7079_v18  ;;  %v3673_v22 = vpop.f32.mrb[17].mxu0  ;;  %v4082_v20 = vld [vmem:[%s11264_s1] sm:$0xff] }
 0xd0c   : > { %v3674_v25 = vadd.f32 %v7079_v18, %v3673_v22 }
 0xd0d   : > { %v3703_v28 = vmax.f32 %v3679_v21, 0.0  ;;  %v4083_v21 = vld [vmem:[%s11264_s1 + $0x8] sm:$0xff] }
 0xd0e   : > { %v3702_v26 = vmax.f32 %v3674_v25, 0.0  ;;  %v7564_v27 = vpop.f32.mrb[18].mxu0  ;;  %v7999_v22 = vpack.c.bf16 %v4083_v21, %v4082_v20  ;;  %v7094_v25 = vld [vmem:[%s11265_s8] ss:$0 sm:$0xff]  ;;  %s11269_s8 = sld [smem:[#allocation140_spill]] }
 0xd0f   : > { %v3689_v31 = vadd.f32 %v7564_v27, %v7079_v18  ;;  %v3683_v32 = vpop.f32.mrb[19].mxu0 }
 0xd10   : > { %v3684_v33 = vadd.f32 %v7079_v18, %v3683_v32  ;;  %7576 = vmatprep.mubr.msk.f32.mxu1 %vm2683_vm0, %v3702_v26  ;;  %v4084_v32 = vld [vmem:[%s11264_s1 + $0x10] sm:$0xff] }
 0xd11   : > { %7577 = vmatmul.mubr.msk.f32.vlgmr.msra.gmra.mrb[16].mxu1 %vm2683_vm0, %v3703_v28  ;;  %v3705_v38 = vmax.f32 %v3689_v31, 0.0 }
 0xd12   : > { %v3704_v34 = vmax.f32 %v3684_v33, 0.0  ;;  %v7567_v35 = vpop.f32.mrb[20].mxu0  ;;  %7988 = vmatpush3.bf16.msra.mxu1 %v7987_v49  ;;  %v4085_v33 = vld [vmem:[%s11264_s1 + $0x18] sm:$0xff]  ;;  %s11273_s1 = sld [smem:[#allocation112_spill]] }
 0xd13   : > { %v3699_v39 = vadd.f32 %v7567_v35, %v7079_v18  ;;  %v3693_v40 = vpop.f32.mrb[21].mxu0  ;;  %7989 = vmatprep.subr.bf16.mxu1 %v9804_v44  ;;  %v7096_v35 = vld [vmem:[%s11266_s5] ss:$0 sm:$0xff]  ;;  %v4306_v49 = vld [vmem:[%s11268_s7 + $0x18] sm:$0xff]  ;;  %s11270_s5 = sld [smem:[#allocation100_spill]] }
 0xd14   : > { %v3694_v41 = vadd.f32 %v7079_v18, %v3693_v40  ;;  %7579 = vmatprep.mubr.msk.f32.mxu1 %vm2683_vm0, %v3704_v34  ;;  %v7996_v18 = vpack.c.bf16 %v4000_v17, %v3999_v16  ;;  %v8002_v34 = vpack.c.bf16 %v4085_v33, %v4084_v32  ;;  %v8008_v50 = vpack.c.bf16 %v4306_v49, %v4305_v47 }
 0xd15   : > { %7580 = vmatmul.mubr.msk.f32.gmra.mrb[18].mxu1 %vm2683_vm0, %v3705_v38  ;;  %v3707_v43 = vmax.f32 %v3699_v39, 0.0 }
 0xd16   : > { %v3706_v42 = vmax.f32 %v3694_v41, 0.0  ;;  %7991 = vmatpush3.bf16.msra.mxu1 %v7990_v51  ;;  %v7098_v51 = vld [vmem:[%s11269_s8] ss:$0 sm:$0xff]  ;;  %s11271_s8 = sld [smem:[#allocation88_spill]] }
 0xd17   : > { %7998 = vmatprep.subr.bf16.mxu1 %v9804_v44 }
 0xd18   : > { %7582 = vmatprep.mubr.msk.f32.mxu1 %vm2683_vm0, %v3706_v42  ;;  %v4180_v42 = vld [vmem:[%s11267_s3] sm:$0xff] }
 0xd19   : > { %7583 = vmatmul.mubr.msk.f32.gmra.mrb[20].mxu1 %vm2683_vm0, %v3707_v43  ;;  %v4303_v43 = vld [vmem:[%s11268_s7] sm:$0xff] }
 0xd1a   : > { %7608 = vmatprep.mubr.msk.f32.mxu1 %vm9805_vm6, %v9806_v45  ;;  %v8004_v48 = vpack.c.bf16 %v4304_v46, %v4303_v43  ;;  %v7100_v12 = vld [vmem:[%s11270_s5] ss:$0 sm:$0xff]  ;;  %s11272_s5 = sld [smem:[#allocation113_spill]] }
 0xd1b   : > { %v4174_v16 = vmul.f32 %v7100_v12, %v10820_v24 }
 0xde4   : > { %v7578_v53 = vpop.f32.mrb[16].mxu1 }
 0xde5   : > { %v3809_v54 = vadd.f32 %v7578_v53, %v7086_v52  ;;  %v3803_v55 = vpop.f32.mrb[17].mxu1 }
 0xde6   : > { %v3804_v56 = vadd.f32 %v7086_v52, %v3803_v55 }
 0xde7   : > { %v3833_v57 = vmax.f32 %v3809_v54, 0.0 }
 0xde8   : > { %v3832_v58 = vmax.f32 %v3804_v56, 0.0  ;;  %v7581_v59 = vpop.f32.mrb[18].mxu1  ;;  %v4181_v56 = vld [vmem:[%s11267_s3 + $0x8] sm:$0xff] }
 0xde9   : > { %v3819_v60 = vadd.f32 %v7581_v59, %v7086_v52  ;;  %v3813_v61 = vpop.f32.mrb[19].mxu1  ;;  %v4184_v59 = vld [vmem:[%s11267_s3 + $0x20] sm:$0xff] }
 0xdea   : > { %v7978_v62 = vpack.c.bf16 %v3833_v57, %v3832_v58  ;;  %v3814_v63 = vadd.f32 %v7086_v52, %v3813_v61  ;;  %v4182_v57 = vld [vmem:[%s11267_s3 + $0x10] sm:$0xff]  ;;  %v4183_v58 = vld [vmem:[%s11267_s3 + $0x18] sm:$0xff] }
 0xdeb   : > { %v3835_v0 = vmax.f32 %v3819_v60, 0.0  ;;  %v4185_v60 = vld [vmem:[%s11267_s3 + $0x28] sm:$0xff]  ;;  %v4445_v61 = vld [vmem:[#allocation22] sm:$0xff] }
 0xdec   : > { %v3834_v1 = vmax.f32 %v3814_v63, 0.0  ;;  %v7584_v2 = vpop.f32.mrb[20].mxu1  ;;  %7979 = vmatpush3.bf16.msra.mxu0 %v7978_v62  ;;  %v4446_v62 = vld [vmem:[#allocation22 + $0x8] sm:$0xff] }
 0xded   : > { %v3829_v3 = vadd.f32 %v7584_v2, %v7086_v52  ;;  %v3823_v4 = vpop.f32.mrb[21].mxu1  ;;  %7980 = vmatprep.subr.bf16.mxu0 %v9804_v44  ;;  %v8012_v63 = vpack.c.bf16 %v4446_v62, %v4445_v61 }
 0xdee   : > { %v7981_v5 = vpack.c.bf16 %v3835_v0, %v3834_v1  ;;  %v3824_v6 = vadd.f32 %v7086_v52, %v3823_v4 }
 0xdef   : > { %v3837_v7 = vmax.f32 %v3829_v3, 0.0 }
 0xdf0   : > { %v3836_v8 = vmax.f32 %v3824_v6, 0.0  ;;  %7982 = vmatpush3.bf16.msra.mxu0 %v7981_v5  ;;  %v4447_v6 = vld [vmem:[#allocation22 + $0x10] sm:$0xff] }
 0xdf1   : > { %7983 = vmatprep.subr.bf16.mxu0 %v9804_v44 }
 0xdf2   : > { %v7984_v9 = vpack.c.bf16 %v3837_v7, %v3836_v8  ;;  %v4448_v7 = vld [vmem:[#allocation22 + $0x18] sm:$0xff] }
 0xdf3   : > { %v8016_v8 = vpack.c.bf16 %v4448_v7, %v4447_v6  ;;  %v7122_v6 = vld [vmem:[#allocation26] ss:$0 sm:$0xff] }
 0xdf4   : > { %7985 = vmatpush3.bf16.msra.mxu0 %v7984_v9  ;;  %v4575_v9 = vld [vmem:[#allocation25] sm:$0xff] }
 0xdf5   : > { %7992 = vmatprep.subr.bf16.mxu0 %v9804_v44 }
 0xdf7   : > { %7598 = vmatmul.mubr.msk.f32.vlgmr.msra.gmra.mrb[22].mxu0 %vm2935_vm1, %v3838_v10  ;;  %v4576_v10 = vld [vmem:[#allocation25 + $0x8] sm:$0xff] }
 0xdf8   : > { %7619 = vmatprep.mubr.msk.f32.mxu0 %vm9805_vm6, %v9806_v45  ;;  %7994 = vmatpush3.bf16.msra.mxu0 %v7993_v13  ;;  %v8020_v11 = vpack.c.bf16 %v4576_v10, %v4575_v9  ;;  %v4175_v13 = vmul.f32 %v7100_v12, %v10826_v30 }
 0xdf9   : > { %7995 = vmatprep.subr.bf16.mxu0 %v9804_v44 }
 0xdfc   : > { %7997 = vmatpush3.bf16.msra.mxu0 %v7996_v18 }
 0xeca   : > { %v3908_v14 = vpop.f32.mrb[22].mxu0 }
 0xecb   : > { %v7599_v15 = vpop.f32.mrb[23].mxu0  ;;  %7609 = vmatmul.mubr.msk.f32.vlgmr.msra.gmra.mrb[22].mxu1 %vm2683_vm0, %v3908_v14 }
 0xecc   : > { %7630 = vmatprep.mubr.msk.f32.mxu1 %vm9805_vm6, %v9806_v45  ;;  %8000 = vmatpush3.bf16.msra.mxu1 %v7999_v22  ;;  %v7114_v15 = vld [vmem:[#allocation20] ss:$0 sm:$0xff]  ;;  %v4177_v22 = vmul.f32 %v7100_v12, %v10824_v29 }
 0xecd   : > { %8001 = vmatprep.subr.bf16.mxu1 %v9804_v44 }
 0xed0   : > { %8003 = vmatpush3.bf16.msra.mxu1 %v8002_v34 }
 0xed1   : > { %8005 = vmatprep.subr.bf16.mxu1 %v8004_v48 }
 0xf9e   : > { %v3992_v26 = vpop.f32.mrb[22].mxu1 }
 0xf9f   : > { %v3993_v27 = vadd.f32 %v7094_v25, %v3992_v26  ;;  %v7610_v28 = vpop.f32.mrb[23].mxu1 }
 0xfa1   : > { %v3996_v31 = vmax.f32 %v3993_v27, 0.0  ;;  %v4176_v27 = vmul.f32 %v7100_v12, %v10818_v23 }
 0xfa3   : > { %7620 = vmatmul.mubr.msk.f32.vlgmr.msra.gmra.mrb[24].mxu0 %vm2683_vm0, %v3996_v31 }
 0xfa4   : > { %7635 = vmatprep.mubr.msk.f32.mxu0 %vm4186_vm7, %v4180_v42 }
0x1076   : > { %v4077_v38 = vpop.f32.mrb[24].mxu0 }
0x1077   : > { %v4078_v39 = vadd.f32 %v7096_v35, %v4077_v38  ;;  %v7621_v40 = vpop.f32.mrb[25].mxu0  ;;  %v4179_v35 = vmul.f32 %v7100_v12, %v10831_v36 }
0x1079   : > { %v4081_v41 = vmax.f32 %v4078_v39, 0.0  ;;  %v4178_v39 = vmul.f32 %v7100_v12, %v10833_v37  ;;  %v4577_v37 = vld [vmem:[#allocation25 + $0x10] sm:$0xff] }
0x107b   : > { %7631 = vmatmul.mubr.msk.f32.vlgmr.msra.gmra.mrb[24].mxu1 %vm2683_vm0, %v4081_v41 }
0x107c   : > { %8007 = vmatpush3.bf16.msra.mxu1 %v8004_v48  ;;  %v4578_v48 = vld [vmem:[#allocation25 + $0x18] sm:$0xff] }
0x107d   : > { %8009 = vmatprep.subr.bf16.mxu1 %v8008_v50  ;;  %v8024_v49 = vpack.c.bf16 %v4578_v48, %v4577_v37  ;;  %v4977_v37 = vld [vmem:[#allocation47 + $0x8] sm:$0xff] }
0x1080   : > { %8011 = vmatpush3.bf16.msra.mxu1 %v8008_v50  ;;  %v7115_v50 = vld [vmem:[#allocation23] ss:$0 sm:$0xff] }
0x1081   : > { %8021 = vmatprep.subr.bf16.mxu1 %v8020_v11 }
0x114e   : > { %v4162_v52 = vpop.f32.mrb[24].mxu1 }
0x114f   : > { %v4163_v53 = vadd.f32 %v7098_v51, %v4162_v52  ;;  %v7632_v54 = vpop.f32.mrb[25].mxu1 }
0x1151   : > { %v4166_v55 = vmax.f32 %v4163_v53, 0.0 }
0x1153   : > { %7633 = vmatprep.subr.msk.mxu0 %vm3337_vm3, %v4166_v55 }
0x1154   : > { %7634 = vmatpush3.msk.msra.mxu0 %vm3337_vm3, %v4166_v55 }
0x1155   : > { %7636 = vmatmul.mubr.msk.f32.vlgmr.msra.gmra.mrb[26].mxu0 %vm4186_vm7, %v4181_v56  ;;  %8013 = vmatprep.subr.bf16.mxu0 %v8012_v63 }
0x1156   : > { %7638 = vmatprep.mubr.msk.f32.mxu0 %vm4186_vm7, %v4182_v57  ;;  %8015 = vmatpush3.bf16.msra.mxu0 %v8012_v63 }
0x1157   : > { %8017 = vmatprep.subr.bf16.mxu0 %v8016_v8 }
0x1159   : > { %7639 = vmatmul.mubr.msk.f32.gmra.mrb[28].mxu0 %vm4186_vm7, %v4183_v58 }
0x115a   : > { %7641 = vmatprep.mubr.msk.f32.mxu0 %vm4186_vm7, %v4184_v59  ;;  %8019 = vmatpush3.bf16.msra.mxu0 %v8016_v8 }
0x115d   : > { %7642 = vmatmul.mubr.msk.f32.gmra.mrb[30].mxu0 %vm4186_vm7, %v4185_v60 }
0x1228   : > { %v7637_v0 = vpop.f32.mrb[26].mxu0 }
0x1229   : > { %v4274_v1 = vpop.f32.mrb[27].mxu0 }
0x122a   : > { %7652 = vmatprep.mubr.msk.f32.mxu1 %vm2683_vm0, %v4274_v1 }
0x122b   : > { %7653 = vmatmul.mubr.msk.f32.vlgmr.msra.gmra.mrb[26].mxu1 %vm2683_vm0, %v7637_v0 }
0x122c   : > { %v7640_v2 = vpop.f32.mrb[28].mxu0  ;;  %8023 = vmatpush3.bf16.msra.mxu1 %v8020_v11 }
0x122d   : > { %v4284_v3 = vpop.f32.mrb[29].mxu0  ;;  %8025 = vmatprep.subr.bf16.mxu1 %v8024_v49 }
0x122e   : > { %7655 = vmatprep.mubr.msk.f32.mxu1 %vm2683_vm0, %v4284_v3 }
0x122f   : > { %7656 = vmatmul.mubr.msk.f32.gmra.mrb[28].mxu1 %vm2683_vm0, %v7640_v2 }
0x1230   : > { %v7643_v4 = vpop.f32.mrb[30].mxu0  ;;  %8027 = vmatpush3.bf16.msra.mxu1 %v8024_v49  ;;  %v7131_v49 = vld [vmem:[#allocation43] ss:$0 sm:$0xff] }
0x1231   : > { %v4294_v5 = vpop.f32.mrb[31].mxu0 }
0x1232   : > { %7658 = vmatprep.mubr.msk.f32.mxu1 %vm2683_vm0, %v4294_v5  ;;  %v4705_v5 = vld [vmem:[%s11271_s8] sm:$0xff] }
0x1233   : > { %7659 = vmatmul.mubr.msk.f32.gmra.mrb[30].mxu1 %vm2683_vm0, %v7643_v4 }
0x12fe   : > { %v7654_v14 = vpop.f32.mrb[26].mxu1 }
0x12ff   : > { %v4421_v17 = vadd.f32 %v7654_v14, %v4175_v13  ;;  %v4391_v18 = vpop.f32.mrb[27].mxu1 }
0x1300   : > { %v4420_v20 = vadd.f32 %v4391_v18, %v4174_v16 }
0x1301   : > { %v4434_v21 = vadd.f32 %v7114_v15, %v4421_v17 }
0x1302   : > { %v4433_v25 = vadd.f32 %v7114_v15, %v4420_v20  ;;  %v7657_v26 = vpop.f32.mrb[28].mxu1 }
0x1303   : > { %v4423_v28 = vadd.f32 %v7657_v26, %v4177_v22  ;;  %v4401_v31 = vpop.f32.mrb[29].mxu1  ;;  %v4440_v34 = vmax.f32 %v4434_v21, 0.0 }
0x1304   : > { %v4439_v32 = vmax.f32 %v4433_v25, 0.0  ;;  %v4422_v33 = vadd.f32 %v4401_v31, %v4176_v27  ;;  %v4788_v31 = vld [vmem:[#allocation41] sm:$0xff] }
0x1305   : > { %v4436_v30 = vadd.f32 %v7114_v15, %v4423_v28 }
0x1306   : > { %v4435_v38 = vadd.f32 %v7114_v15, %v4422_v33  ;;  %v7660_v24 = vpop.f32.mrb[30].mxu1  ;;  %7669 = vmatprep.mubr.msk.f32.mxu0 %vm2683_vm0, %v4439_v32  ;;  %v4789_v32 = vld [vmem:[#allocation41 + $0x8] sm:$0xff] }
0x1307   : > { %v4425_v40 = vadd.f32 %v7660_v24, %v4179_v35  ;;  %v4411_v29 = vpop.f32.mrb[31].mxu1  ;;  %7670 = vmatmul.mubr.msk.f32.vlgmr.msra.gmra.mrb[32].mxu0 %vm2683_vm0, %v4440_v34  ;;  %v4442_v42 = vmax.f32 %v4436_v30, 0.0  ;;  %v8040_v30 = vpack.c.bf16 %v4789_v32, %v4788_v31  ;;  %v4790_v35 = vld [vmem:[#allocation41 + $0x10] sm:$0xff]  ;;  %v4706_v24 = vld [vmem:[%s11271_s8 + $0x8] sm:$0xf] }
0x1308   : > { %v4441_v41 = vmax.f32 %v4435_v38, 0.0  ;;  %v4424_v23 = vadd.f32 %v4411_v29, %v4178_v39  ;;  %v4791_v38 = vld [vmem:[#allocation41 + $0x18] sm:$0xff]  ;;  %v4883_v29 = vld [vmem:[#allocation44 + $0x8] sm:$0xff] }
0x1309   : > { %v4438_v43 = vadd.f32 %v7114_v15, %v4425_v40  ;;  %v8044_v39 = vpack.c.bf16 %v4791_v38, %v4790_v35  ;;  %v4882_v40 = vld [vmem:[#allocation44] sm:$0xff]  ;;  %v5327_v32 = vld [vmem:[#allocation35 + $0x10] sm:$0xff] }
0x130a   : > { %v4437_v46 = vadd.f32 %v7114_v15, %v4424_v23  ;;  %7672 = vmatprep.mubr.msk.f32.mxu0 %vm2683_vm0, %v4441_v41  ;;  %v8048_v41 = vpack.c.bf16 %v4883_v29, %v4882_v40  ;;  %v5438_v35 = vld [vmem:[#allocation38 + $0x8] sm:$0xff]  ;;  %v7140_v40 = vld [vmem:[%s11273_s1] ss:$0 sm:$0xff]  ;;  %s11274_s1 = sld [smem:[#allocation107_spill]] }
0x130b   : > { %7673 = vmatmul.mubr.msk.f32.gmra.mrb[34].mxu0 %vm2683_vm0, %v4442_v42  ;;  %v4444_v47 = vmax.f32 %v4438_v43, 0.0  ;;  %v4884_v43 = vld [vmem:[#allocation44 + $0x10] sm:$0xff] }
0x130c   : > { %v4443_v36 = vmax.f32 %v4437_v46, 0.0  ;;  %8049 = vmatprep.subr.bf16.mxu1 %v8048_v41  ;;  %v4885_v46 = vld [vmem:[#allocation44 + $0x18] sm:$0xff] }
0x130e   : > { %7675 = vmatprep.mubr.msk.f32.mxu0 %vm2683_vm0, %v4443_v36  ;;  %v8052_v36 = vpack.c.bf16 %v4885_v46, %v4884_v43  ;;  %v7150_v43 = vld [vmem:[#allocation34] ss:$0 sm:$0xff] }
0x130f   : > { %7676 = vmatmul.mubr.msk.f32.gmra.mrb[36].mxu0 %vm2683_vm0, %v4444_v47  ;;  %v4976_v47 = vld [vmem:[#allocation47] sm:$0xff] }
0x1310   : > { %7707 = vmatprep.mubr.msk.f32.mxu0 %vm2935_vm1, %v4705_v5  ;;  %v8056_v48 = vpack.c.bf16 %v4977_v37, %v4976_v47 }
0x13da   : > { %v7671_v51 = vpop.f32.mrb[32].mxu0 }
0x13db   : > { %v4546_v52 = vadd.f32 %v7671_v51, %v7115_v50  ;;  %v4540_v53 = vpop.f32.mrb[33].mxu0 }
0x13dc   : > { %v4541_v54 = vadd.f32 %v7115_v50, %v4540_v53 }
0x13dd   : > { %v4570_v57 = vmax.f32 %v4546_v52, 0.0 }
0x13de   : > { %v4569_v55 = vmax.f32 %v4541_v54, 0.0  ;;  %v7674_v56 = vpop.f32.mrb[34].mxu0 }
0x13df   : > { %v4556_v58 = vadd.f32 %v7674_v56, %v7115_v50  ;;  %v4550_v59 = vpop.f32.mrb[35].mxu0  ;;  %v4978_v56 = vld [vmem:[#allocation47 + $0x10] sm:$0xff] }
0x13e0   : > { %v4551_v60 = vadd.f32 %v7115_v50, %v4550_v59  ;;  %7686 = vmatprep.mubr.msk.f32.mxu1 %vm2683_vm0, %v4569_v55  ;;  %v7134_v59 = vld [vmem:[#allocation46] ss:$0 sm:$0xff] }
0x13e1   : > { %7687 = vmatmul.mubr.msk.f32.vlgmr.msra.gmra.mrb[32].mxu1 %vm2683_vm0, %v4570_v57  ;;  %v4572_v63 = vmax.f32 %v4556_v58, 0.0  ;;  %v4979_v57 = vld [vmem:[#allocation47 + $0x18] sm:$0xff] }
0x13e2   : > { %v4571_v61 = vmax.f32 %v4551_v60, 0.0  ;;  %v7677_v62 = vpop.f32.mrb[36].mxu0  ;;  %8051 = vmatpush3.bf16.msra.mxu1 %v8048_v41  ;;  %v8060_v58 = vpack.c.bf16 %v4979_v57, %v4978_v56 }
0x13e3   : > { %v4566_v0 = vadd.f32 %v7677_v62, %v7115_v50  ;;  %v4560_v1 = vpop.f32.mrb[37].mxu0  ;;  %8053 = vmatprep.subr.bf16.mxu1 %v8052_v36 }
0x13e4   : > { %v4561_v2 = vadd.f32 %v7115_v50, %v4560_v1  ;;  %7689 = vmatprep.mubr.msk.f32.mxu1 %vm2683_vm0, %v4571_v61 }
0x13e5   : > { %7690 = vmatmul.mubr.msk.f32.gmra.mrb[34].mxu1 %vm2683_vm0, %v4572_v63  ;;  %v4574_v4 = vmax.f32 %v4566_v0, 0.0 }
0x13e6   : > { %v4573_v3 = vmax.f32 %v4561_v2, 0.0  ;;  %8055 = vmatpush3.bf16.msra.mxu1 %v8052_v36  ;;  %v5101_v2 = vld [vmem:[#allocation8] sm:$0xff] }
0x13e8   : > { %7692 = vmatprep.mubr.msk.f32.mxu1 %vm2683_vm0, %v4573_v3  ;;  %v7137_v3 = vld [vmem:[#allocation49] ss:$0 sm:$0xff] }
0x13e9   : > { %7693 = vmatmul.mubr.msk.f32.gmra.mrb[36].mxu1 %vm2683_vm0, %v4574_v4 }
0x14b4   : > { %v7688_v7 = vpop.f32.mrb[32].mxu1 }
0x14b5   : > { %v4676_v8 = vadd.f32 %v7688_v7, %v7122_v6  ;;  %v4670_v9 = vpop.f32.mrb[33].mxu1 }
0x14b6   : > { %v4671_v10 = vadd.f32 %v7122_v6, %v4670_v9  ;;  %v5205_v9 = vld [vmem:[%s11272_s5] sm:$0xff] }
0x14b7   : > { %v4700_v11 = vmax.f32 %v4676_v8, 0.0 }
0x14b8   : > { %v4699_v12 = vmax.f32 %v4671_v10, 0.0  ;;  %v7691_v13 = vpop.f32.mrb[34].mxu1  ;;  %v5206_v10 = vld [vmem:[%s11272_s5 + $0x8] sm:$0xff] }
0x14b9   : > { %v4686_v14 = vadd.f32 %v7691_v13, %v7122_v6  ;;  %v4680_v15 = vpop.f32.mrb[35].mxu1  ;;  %v8070_v13 = vpack.c.bf16 %v5206_v10, %v5205_v9 }
0x14ba   : > { %v8028_v16 = vpack.c.bf16 %v4700_v11, %v4699_v12  ;;  %v4681_v17 = vadd.f32 %v7122_v6, %v4680_v15  ;;  %v5208_v15 = vld [vmem:[%s11272_s5 + $0x18] sm:$0xff] }
0x14bb   : > { %v4702_v18 = vmax.f32 %v4686_v14, 0.0  ;;  %v5207_v14 = vld [vmem:[%s11272_s5 + $0x10] sm:$0xff] }
0x14bc   : > { %v4701_v20 = vmax.f32 %v4681_v17, 0.0  ;;  %v7694_v21 = vpop.f32.mrb[36].mxu1  ;;  %8029 = vmatprep.subr.bf16.mxu0 %v8028_v16  ;;  %v5103_v17 = vld [vmem:[#allocation8 + $0x10] sm:$0xff] }
0x14bd   : > { %v4696_v22 = vadd.f32 %v7694_v21, %v7122_v6  ;;  %v4690_v25 = vpop.f32.mrb[37].mxu1  ;;  %8031 = vmatpush3.bf16.msra.mxu0 %v8028_v16  ;;  %v5102_v16 = vld [vmem:[#allocation8 + $0x8] sm:$0xff] }
0x14be   : > { %v8032_v26 = vpack.c.bf16 %v4702_v18, %v4701_v20  ;;  %v4691_v27 = vadd.f32 %v7122_v6, %v4690_v25  ;;  %v8074_v18 = vpack.c.bf16 %v5208_v15, %v5207_v14  ;;  %v5104_v20 = vld [vmem:[#allocation8 + $0x18] sm:$0xff]  ;;  %v5623_v15 = vld [vmem:[#allocation50] sm:$0xff] }
0x14bf   : > { %v4704_v28 = vmax.f32 %v4696_v22, 0.0 }
0x14c0   : > { %v4703_v33 = vmax.f32 %v4691_v27, 0.0  ;;  %8033 = vmatprep.subr.bf16.mxu0 %v8032_v26  ;;  %v5325_v27 = vld [vmem:[#allocation35] sm:$0xff] }
0x14c1   : > { %8035 = vmatpush3.bf16.msra.mxu0 %v8032_v26 }
0x14c2   : > { %v8036_v34 = vpack.c.bf16 %v4704_v28, %v4703_v33  ;;  %v5326_v28 = vld [vmem:[#allocation35 + $0x8] sm:$0xff]  ;;  %v5328_v33 = vld [vmem:[#allocation35 + $0x18] sm:$0xff] }
0x14c3   : > { %v8078_v31 = vpack.c.bf16 %v5326_v28, %v5325_v27 }
0x14c4   : > { %8037 = vmatprep.subr.bf16.mxu0 %v8036_v34 }
0x14c5   : > { %8039 = vmatpush3.bf16.msra.mxu0 %v8036_v34  ;;  %v8082_v34 = vpack.c.bf16 %v5328_v33, %v5327_v32 }
0x14c6   : > { %8041 = vmatprep.subr.bf16.mxu0 %v8040_v30 }
0x14c8   : > { %7708 = vmatmul.mubr.msk.f32.vlgmr.msra.gmra.mrb[38].mxu0 %vm2935_vm1, %v4706_v24  ;;  %v5079_v24 = vpop.permute.xlu1 %5078 }
0x14c9   : > { %8043 = vmatpush3.bf16.msra.mxu0 %v8040_v30  ;;  %v5437_v30 = vld [vmem:[#allocation38] sm:$0xff]  ;;  %v5098_v29 = vmul.f32 %v7140_v40, %v5079_v24 }
0x14ca   : > { %8045 = vmatprep.subr.bf16.mxu0 %v8044_v39  ;;  %v8086_v38 = vpack.c.bf16 %v5438_v35, %v5437_v30 }
0x14cd   : > { %8047 = vmatpush3.bf16.msra.mxu0 %v8044_v39  ;;  %v5074_v39 = vpop.permute.xlu0 %5073 }
0x14ce   : > { %8057 = vmatprep.subr.bf16.mxu0 %v8056_v48  ;;  %v5097_v41 = vmul.f32 %v7140_v40, %v5074_v39 }
0x14d1   : > { %v5084_v46 = vpop.permute.xlu0 %5083 }
0x159b   : > { %v7709_v23 = vpop.f32.mrb[38].mxu0 }
0x159c   : > { %v4779_v42 = vpop.f32.mrb[39].mxu0 }
0x159d   : > { %7718 = vmatprep.mubr.msk.f32.mxu0 %vm2683_vm0, %v4779_v42 }
0x159e   : > { %7719 = vmatmul.mubr.msk.f32.vlgmr.msra.gmra.mrb[40].mxu0 %vm2683_vm0, %v7709_v23  ;;  %v5089_v23 = vpop.permute.xlu1 %5088 }
0x159f   : > { %8059 = vmatpush3.bf16.msra.mxu0 %v8056_v48  ;;  %v5100_v48 = vmul.f32 %v7140_v40, %v5089_v23  ;;  %v5709_v23 = vld [vmem:[#allocation53 + $0x8] sm:$0xff] }
0x15a0   : > { %8061 = vmatprep.subr.bf16.mxu0 %v8060_v58 }
0x15a3   : > { %8063 = vmatpush3.bf16.msra.mxu0 %v8060_v58 }
0x15a4   : > { %8079 = vmatprep.subr.bf16.mxu0 %v8078_v31 }
0x1671   : > { %v7720_v50 = vpop.f32.mrb[40].mxu0 }
0x1672   : > { %v4877_v51 = vadd.f32 %v7720_v50, %v7131_v49  ;;  %v4871_v52 = vpop.f32.mrb[41].mxu0  ;;  %v5099_v50 = vmul.f32 %v7140_v40, %v5084_v46 }
0x1673   : > { %v4872_v53 = vadd.f32 %v7131_v49, %v4871_v52 }
0x1674   : > { %v4881_v55 = vmax.f32 %v4877_v51, 0.0 }
0x1675   : > { %v4880_v54 = vmax.f32 %v4872_v53, 0.0 }
0x1677   : > { %7729 = vmatprep.mubr.msk.f32.mxu1 %vm2683_vm0, %v4880_v54 }
0x1678   : > { %7730 = vmatmul.mubr.msk.f32.vlgmr.msra.gmra.mrb[38].mxu1 %vm2683_vm0, %v4881_v55 }
0x1679   : > { %7747 = vmatprep.mubr.msk.f32.mxu1 %vm3318_vm2, %v5101_v2 }
0x174b   : > { %v7731_v60 = vpop.f32.mrb[38].mxu1 }
0x174c   : > { %v4971_v61 = vadd.f32 %v7731_v60, %v7134_v59  ;;  %v4965_v62 = vpop.f32.mrb[39].mxu1 }
0x174d   : > { %v4966_v63 = vadd.f32 %v7134_v59, %v4965_v62  ;;  %v5439_v62 = vld [vmem:[#allocation38 + $0x10] sm:$0xff] }
0x174e   : > { %v4975_v1 = vmax.f32 %v4971_v61, 0.0 }
0x174f   : > { %v4974_v0 = vmax.f32 %v4966_v63, 0.0  ;;  %v5440_v63 = vld [vmem:[#allocation38 + $0x18] sm:$0xff] }
0x1751   : > { %7740 = vmatprep.mubr.msk.f32.mxu0 %vm2683_vm0, %v4974_v0  ;;  %v8090_v0 = vpack.c.bf16 %v5440_v63, %v5439_v62  ;;  %v6051_v63 = vld [vmem:[%s11274_s1] sm:$0xff] }
0x1752   : > { %7741 = vmatmul.mubr.msk.f32.vlgmr.msra.gmra.mrb[42].mxu0 %vm2683_vm0, %v4975_v1  ;;  %v7151_v1 = vld [vmem:[#allocation37] ss:$0 sm:$0xff] }
0x1753   : > { %8081 = vmatpush3.bf16.msra.mxu0 %v8078_v31 }
0x1754   : > { %8083 = vmatprep.subr.bf16.mxu0 %v8082_v34 }
0x1757   : > { %8085 = vmatpush3.bf16.msra.mxu0 %v8082_v34 }
0x1758   : > { %8094 = vmatprep.subr.bf16.mxu0 %v9804_v44 }
0x1825   : > { %v7742_v4 = vpop.f32.mrb[42].mxu0 }
0x1826   : > { %v5065_v5 = vadd.f32 %v7742_v4, %v7137_v3  ;;  %v5059_v6 = vpop.f32.mrb[43].mxu0 }
0x1827   : > { %v5060_v7 = vadd.f32 %v7137_v3, %v5059_v6 }
0x1828   : > { %v5069_v8 = vmax.f32 %v5065_v5, 0.0 }
0x1829   : > { %v5068_v11 = vmax.f32 %v5060_v7, 0.0 }
0x182b   : > { %v11002_v12 = vpack.c.bf16 %v5069_v8, %v5068_v11 }
0x182d   : > { %8066 = vmatprep.subr.msk.bf16.mxu1 %vm10869_vm5, %v11002_v12 }
0x182e   : > { %8069 = vmatpush3.bf16.msk.msra.mxu1 %vm10869_vm5, %v11002_v12 }
0x182f   : > { %8071 = vmatprep.subr.bf16.mxu1 %v8070_v13 }
0x1831   : > { %7748 = vmatmul.mubr.msk.f32.vlgmr.msra.gmra.mrb[40].mxu1 %vm3318_vm2, %v5102_v16  ;;  %v5624_v16 = vld [vmem:[#allocation50 + $0x8] sm:$0xff] }
0x1832   : > { %7750 = vmatprep.mubr.msk.f32.mxu1 %vm3318_vm2, %v5103_v17  ;;  %8073 = vmatpush3.bf16.msra.mxu1 %v8070_v13  ;;  %v5625_v17 = vld [vmem:[#allocation50 + $0x10] sm:$0xff] }
0x1833   : > { %8075 = vmatprep.subr.bf16.mxu1 %v8074_v18 }
0x1835   : > { %7751 = vmatmul.mubr.msk.f32.gmra.mrb[42].mxu1 %vm3318_vm2, %v5104_v20  ;;  %v5626_v20 = vld [vmem:[#allocation50 + $0x18] sm:$0xff] }
0x1836   : > { %8077 = vmatpush3.bf16.msra.mxu1 %v8074_v18  ;;  %v8101_v18 = vpack.c.bf16 %v5624_v16, %v5623_v15  ;;  %v5965_v15 = vld [vmem:[%s11275_s2 + $0x8] sm:$0xff] }
0x1837   : > { %8087 = vmatprep.subr.bf16.mxu1 %v8086_v38 }
0x1904   : > { %v7749_v21 = vpop.f32.mrb[40].mxu1 }
0x1905   : > { %v5186_v22 = vpop.f32.mrb[41].mxu1 }
0x1906   : > { %7761 = vmatprep.mubr.msk.f32.mxu1 %vm2683_vm0, %v5186_v22  ;;  %v7156_v22 = vld [vmem:[#allocation40] ss:$0 sm:$0xff] }
0x1907   : > { %7762 = vmatmul.mubr.msk.f32.vlgmr.msra.gmra.mrb[44].mxu1 %vm2683_vm0, %v7749_v21  ;;  %v8104_v21 = vpack.c.bf16 %v5626_v20, %v5625_v17  ;;  %v6228_v17 = vld [vmem:[#allocation29] sm:$0xff] }
0x1908   : > { %v7752_v25 = vpop.f32.mrb[42].mxu1  ;;  %8089 = vmatpush3.bf16.msra.mxu1 %v8086_v38 }
0x1909   : > { %v5196_v26 = vpop.f32.mrb[43].mxu1  ;;  %8091 = vmatprep.subr.bf16.mxu1 %v8090_v0 }
0x190a   : > { %7764 = vmatprep.mubr.msk.f32.mxu1 %vm2683_vm0, %v5196_v26 }
0x190b   : > { %7765 = vmatmul.mubr.msk.f32.gmra.mrb[46].mxu1 %vm2683_vm0, %v7752_v25 }
0x190c   : > { %8093 = vmatpush3.bf16.msra.mxu1 %v8090_v0  ;;  %v6052_v0 = vld [vmem:[%s11274_s1 + $0x8] sm:$0xff] }
0x190d   : > { %8100 = vmatprep.subr.bf16.mxu1 %v9804_v44 }
0x19da   : > { %v7763_v42 = vpop.f32.mrb[44].mxu1 }
0x19db   : > { %v5307_v36 = vadd.f32 %v7763_v42, %v5098_v29  ;;  %v5287_v47 = vpop.f32.mrb[45].mxu1  ;;  %v5549_v29 = vld [vmem:[#allocation5] sm:$0xf] }
0x19dc   : > { %v5306_v37 = vadd.f32 %v5287_v47, %v5097_v41  ;;  %v5708_v41 = vld [vmem:[#allocation53] sm:$0xff]  ;;  %v5711_v47 = vld [vmem:[#allocation53 + $0x18] sm:$0xff] }
0x19dd   : > { %v5318_v49 = vadd.f32 %v7150_v43, %v5307_v36  ;;  %v8107_v42 = vpack.c.bf16 %v5709_v23, %v5708_v41  ;;  %v5710_v36 = vld [vmem:[#allocation53 + $0x10] sm:$0xff]  ;;  %v6324_v23 = vld [vmem:[#allocation32 + $0x10] sm:$0xff] }
0x19de   : > { %v5317_v51 = vadd.f32 %v7150_v43, %v5306_v37  ;;  %v7766_v52 = vpop.f32.mrb[46].mxu1  ;;  %v8110_v37 = vpack.c.bf16 %v5711_v47, %v5710_v36 }
0x19df   : > { %v5309_v53 = vadd.f32 %v7766_v52, %v5100_v48  ;;  %v5297_v54 = vpop.f32.mrb[47].mxu1  ;;  %v5322_v57 = vmax.f32 %v5318_v49, 0.0  ;;  %v5793_v48 = vld [vmem:[#allocation56] sm:$0xff]  ;;  %v5794_v49 = vld [vmem:[#allocation56 + $0x8] sm:$0xff] }
0x19e0   : > { %v5321_v55 = vmax.f32 %v5317_v51, 0.0  ;;  %v5308_v56 = vadd.f32 %v5297_v54, %v5099_v50  ;;  %v8113_v50 = vpack.c.bf16 %v5794_v49, %v5793_v48  ;;  %v7162_v51 = vld [vmem:[#allocation52] ss:$0 sm:$0xff] }
0x19e1   : > { %v5320_v58 = vadd.f32 %v7150_v43, %v5309_v53 }
0x19e2   : > { %v5319_v59 = vadd.f32 %v7150_v43, %v5308_v56  ;;  %7775 = vmatprep.mubr.msk.f32.mxu0 %vm2683_vm0, %v5321_v55  ;;  %v5796_v56 = vld [vmem:[#allocation56 + $0x18] sm:$0xff] }
0x19e3   : > { %7776 = vmatmul.mubr.msk.f32.vlgmr.msra.gmra.mrb[44].mxu0 %vm2683_vm0, %v5322_v57  ;;  %v5324_v61 = vmax.f32 %v5320_v58, 0.0  ;;  %v7164_v58 = vld [vmem:[#allocation55] ss:$0 sm:$0xff] }
0x19e4   : > { %v5323_v60 = vmax.f32 %v5319_v59, 0.0 }
0x19e6   : > { %7778 = vmatprep.mubr.msk.f32.mxu0 %vm2683_vm0, %v5323_v60 }
0x19e7   : > { %7779 = vmatmul.mubr.msk.f32.gmra.mrb[46].mxu0 %vm2683_vm0, %v5324_v61 }
0x19e8   : > { %7803 = vmatprep.mubr.msk.f32.mxu0 %vm9805_vm6, %v9806_v45 }
0x1ab6   : > { %v7777_v2 = vpop.f32.mrb[44].mxu0 }
0x1ab7   : > { %v5420_v3 = vadd.f32 %v7777_v2, %v7151_v1  ;;  %v5414_v4 = vpop.f32.mrb[45].mxu0  ;;  %v7166_v2 = vld [vmem:[#allocation58] ss:$0 sm:$0xff] }
0x1ab8   : > { %v5415_v5 = vadd.f32 %v7151_v1, %v5414_v4 }
0x1ab9   : > { %v5434_v8 = vmax.f32 %v5420_v3, 0.0 }
0x1aba   : > { %v5433_v6 = vmax.f32 %v5415_v5, 0.0  ;;  %v7780_v7 = vpop.f32.mrb[46].mxu0 }
0x1abb   : > { %v5430_v9 = vadd.f32 %v7780_v7, %v7151_v1  ;;  %v5424_v10 = vpop.f32.mrb[47].mxu0  ;;  %v5879_v7 = vld [vmem:[#allocation10 + $0x8] sm:$0xff] }
0x1abc   : > { %v5425_v11 = vadd.f32 %v7151_v1, %v5424_v10  ;;  %7789 = vmatprep.mubr.msk.f32.mxu1 %vm2683_vm0, %v5433_v6  ;;  %v8124_v1 = vpack.c.bf16 %v6052_v0, %v6051_v63  ;;  %v6053_v10 = vld [vmem:[%s11274_s1 + $0x10] sm:$0xff] }
0x1abd   : > { %7790 = vmatmul.mubr.msk.f32.vlgmr.msra.gmra.mrb[48].mxu1 %vm2683_vm0, %v5434_v8  ;;  %v5436_v14 = vmax.f32 %v5430_v9, 0.0  ;;  %v5968_v8 = vld [vmem:[#allocation7] sm:$0xff]  ;;  %v5969_v9 = vld [vmem:[#allocation7 + $0x8] sm:$0xff] }
0x1abe   : > { %v5435_v13 = vmax.f32 %v5425_v11, 0.0  ;;  %8102 = vmatpush3.bf16.msra.mxu1 %v8101_v18  ;;  %v6054_v11 = vld [vmem:[%s11274_s1 + $0x18] sm:$0xff]  ;;  %s7188_s1 = sshll.u32 %s11277_s12, 4 }
0x1abf   : > { %8103 = vmatprep.subr.bf16.mxu1 %v9804_v44  ;;  %v6229_v18 = vld [vmem:[#allocation29 + $0x8] sm:$0xff] }
0x1ac0   : > { %7792 = vmatprep.mubr.msk.f32.mxu1 %vm2683_vm0, %v5435_v13  ;;  %v8128_v13 = vpack.c.bf16 %v6054_v11, %v6053_v10  ;;  %v8140_v19 = vpack.c.bf16 %v6229_v18, %v6228_v17 }
0x1ac1   : > { %7793 = vmatmul.mubr.msk.f32.gmra.mrb[50].mxu1 %vm2683_vm0, %v5436_v14  ;;  %v5964_v14 = vld [vmem:[%s11275_s2] sm:$0xff] }
0x1ac2   : > { %7814 = vmatprep.mubr.msk.f32.mxu1 %vm9805_vm6, %v9806_v45  ;;  %8105 = vmatpush3.bf16.msra.mxu1 %v8104_v21  ;;  %v8132_v16 = vpack.c.bf16 %v5965_v15, %v5964_v14  ;;  %v5966_v21 = vld [vmem:[%s11275_s2 + $0x10] sm:$0xff] }
0x1ac3   : > { %8112 = vmatprep.subr.bf16.mxu1 %v9804_v44 }
0x1b90   : > { %v7791_v25 = vpop.f32.mrb[48].mxu1 }
0x1b91   : > { %v5532_v26 = vadd.f32 %v7791_v25, %v7156_v22  ;;  %v5526_v27 = vpop.f32.mrb[49].mxu1 }
0x1b92   : > { %v5527_v28 = vadd.f32 %v7156_v22, %v5526_v27 }
0x1b93   : > { %v5546_v31 = vmax.f32 %v5532_v26, 0.0 }
0x1b94   : > { %v5545_v32 = vmax.f32 %v5527_v28, 0.0  ;;  %v7794_v33 = vpop.f32.mrb[50].mxu1  ;;  %v6230_v28 = vld [vmem:[#allocation29 + $0x10] sm:$0xff] }
0x1b95   : > { %v5542_v34 = vadd.f32 %v7794_v33, %v7156_v22  ;;  %v5536_v30 = vpop.f32.mrb[51].mxu1  ;;  %v6322_v33 = vld [vmem:[#allocation32] sm:$0xff] }
0x1b96   : > { %v8095_v35 = vpack.c.bf16 %v5546_v31, %v5545_v32  ;;  %v5537_v38 = vadd.f32 %v7156_v22, %v5536_v30  ;;  %v5967_v22 = vld [vmem:[%s11275_s2 + $0x18] sm:$0xff]  ;;  %v6231_v31 = vld [vmem:[#allocation29 + $0x18] sm:$0xff]  ;;  %s2599_s2 = scalar_lea.vmem %s10158_s19, %s7188_s1 }
0x1b97   : > { %v5548_v24 = vmax.f32 %v5542_v34, 0.0  ;;  %v8136_v27 = vpack.c.bf16 %v5967_v22, %v5966_v21  ;;  %v8144_v32 = vpack.c.bf16 %v6231_v31, %v6230_v28  ;;  %v6323_v34 = vld [vmem:[#allocation32 + $0x8] sm:$0xff] }
0x1b98   : > { %v5547_v39 = vmax.f32 %v5537_v38, 0.0  ;;  %8096 = vmatpush3.bf16.msra.mxu0 %v8095_v35  ;;  %v8148_v30 = vpack.c.bf16 %v6323_v34, %v6322_v33  ;;  %v7178_v35 = vld [vmem:[#allocation28] ss:$0 sm:$0xff] }
0x1b99   : > { %8097 = vmatprep.subr.bf16.mxu0 %v9804_v44 }
0x1b9a   : > { %v8098_v40 = vpack.c.bf16 %v5548_v24, %v5547_v39 }
0x1b9c   : > { %8099 = vmatpush3.bf16.msra.mxu0 %v8098_v40 }
0x1b9d   : > { %8106 = vmatprep.subr.bf16.mxu0 %v9804_v44 }
0x1b9f   : > { %7804 = vmatmul.mubr.msk.f32.vlgmr.msra.gmra.mrb[48].mxu0 %vm2683_vm0, %v5549_v29 }
0x1ba0   : > { %7825 = vmatprep.mubr.msk.f32.mxu0 %vm9805_vm6, %v9806_v45  ;;  %8108 = vmatpush3.bf16.msra.mxu0 %v8107_v42  ;;  %v6325_v42 = vld [vmem:[#allocation32 + $0x18] sm:$0xff] }
0x1ba1   : > { %8109 = vmatprep.subr.bf16.mxu0 %v9804_v44 }
0x1ba4   : > { %8111 = vmatpush3.bf16.msra.mxu0 %v8110_v37 }
0x1c72   : > { %v5619_v43 = vpop.f32.mrb[48].mxu0 }
0x1c73   : > { %v7805_v46 = vpop.f32.mrb[49].mxu0  ;;  %7815 = vmatmul.mubr.msk.f32.vlgmr.msra.gmra.mrb[52].mxu1 %vm2683_vm0, %v5619_v43  ;;  %v8152_v43 = vpack.c.bf16 %v6325_v42, %v6324_v23 }
0x1c74   : > { %7836 = vmatprep.mubr.msk.f32.mxu1 %vm9805_vm6, %v9806_v45  ;;  %8114 = vmatpush3.bf16.msra.mxu1 %v8113_v50  ;;  %v5795_v45 = vld [vmem:[#allocation56 + $0x10] sm:$0xff]  ;;  %v7179_v46 = vld [vmem:[#allocation31] ss:$0 sm:$0xff] }
0x1c75   : > { %8115 = vmatprep.subr.bf16.mxu1 %v9804_v44  ;;  %v8116_v57 = vpack.c.bf16 %v5796_v56, %v5795_v45  ;;  %v5878_v44 = vld [vmem:[#allocation10] sm:$0xff] }
0x1c78   : > { %8117 = vmatpush3.bf16.msra.mxu1 %v8116_v57 }
0x1c79   : > { %8125 = vmatprep.subr.bf16.mxu1 %v8124_v1 }
0x1d46   : > { %v5703_v52 = vpop.f32.mrb[52].mxu1 }
0x1d47   : > { %v5704_v53 = vadd.f32 %v7162_v51, %v5703_v52  ;;  %v7816_v54 = vpop.f32.mrb[53].mxu1  ;;  %v7182_v51 = vld [vmem:[#allocation2] ss:$0 sm:$0xff] }
0x1d49   : > { %v5707_v55 = vmax.f32 %v5704_v53, 0.0 }
0x1d4b   : > { %7826 = vmatmul.mubr.msk.f32.vlgmr.msra.gmra.mrb[50].mxu0 %vm2683_vm0, %v5707_v55 }
0x1d4c   : > { %7841 = vmatprep.mubr.msk.f32.mxu0 %vm4186_vm7, %v5878_v44 }
0x1e1e   : > { %v5788_v59 = vpop.f32.mrb[50].mxu0 }
0x1e1f   : > { %v5789_v60 = vadd.f32 %v7164_v58, %v5788_v59  ;;  %v7827_v61 = vpop.f32.mrb[51].mxu0 }
0x1e21   : > { %v5792_v62 = vmax.f32 %v5789_v60, 0.0 }
0x1e23   : > { %7837 = vmatmul.mubr.msk.f32.vlgmr.msra.gmra.mrb[54].mxu1 %vm2683_vm0, %v5792_v62 }
0x1e24   : > { %8127 = vmatpush3.bf16.msra.mxu1 %v8124_v1 }
0x1e25   : > { %8129 = vmatprep.subr.bf16.mxu1 %v8128_v13 }
0x1e28   : > { %8131 = vmatpush3.bf16.msra.mxu1 %v8128_v13 }
0x1e29   : > { %8133 = vmatprep.subr.bf16.mxu1 %v8132_v16 }
0x1ef6   : > { %v5873_v3 = vpop.f32.mrb[54].mxu1 }
0x1ef7   : > { %v5874_v4 = vadd.f32 %v7166_v2, %v5873_v3  ;;  %v7838_v5 = vpop.f32.mrb[55].mxu1 }
0x1ef9   : > { %v5877_v6 = vmax.f32 %v5874_v4, 0.0 }
0x1efb   : > { %7839 = vmatprep.subr.msk.mxu0 %vm3337_vm3, %v5877_v6 }
0x1efc   : > { %7840 = vmatpush3.msk.msra.mxu0 %vm3337_vm3, %v5877_v6 }
0x1efd   : > { %7842 = vmatmul.mubr.msk.f32.vlgmr.msra.gmra.mrb[52].mxu0 %vm4186_vm7, %v5879_v7  ;;  %8120 = vmatprep.subr.msk.bf16.mxu0 %vm10869_vm5, %v11002_v12 }
0x1efe   : > { %8123 = vmatpush3.bf16.msk.msra.mxu0 %vm10869_vm5, %v11002_v12  ;;  %7848 = vmatprep.mubr.msk.f32.mxu0 %vm3318_vm2, %v5968_v8 }
0x1eff   : > { %8141 = vmatprep.subr.bf16.mxu0 %v8140_v19 }
0x1f01   : > { %7849 = vmatmul.mubr.msk.f32.vlgmr.msra.gmra.mrb[54].mxu0 %vm3318_vm2, %v5969_v9 }
0x1f02   : > { %8143 = vmatpush3.bf16.msra.mxu0 %v8140_v19 }
0x1f03   : > { %8145 = vmatprep.subr.bf16.mxu0 %v8144_v32 }
0x1f06   : > { %8147 = vmatpush3.bf16.msra.mxu0 %v8144_v32 }
0x1f07   : > { %8149 = vmatprep.subr.bf16.mxu0 %v8148_v30 }
0x1fd0   : > { %v7843_v12 = vpop.f32.mrb[52].mxu0 }
0x1fd1   : > { %v5955_v20 = vpop.f32.mrb[53].mxu0 }
0x1fd4   : > { %v7850_v25 = vpop.f32.mrb[54].mxu0 }
0x1fd5   : > { %v6042_v26 = vpop.f32.mrb[55].mxu0 }
0x1fd6   : > { %7859 = vmatprep.mubr.msk.f32.mxu1 %vm2683_vm0, %v6042_v26 }
0x1fd7   : > { %7860 = vmatmul.mubr.msk.f32.vlgmr.msra.gmra.mrb[56].mxu1 %vm2683_vm0, %v7850_v25 }
0x1fd8   : > { %8135 = vmatpush3.bf16.msra.mxu1 %v8132_v16  ;;  %7870 = vmatprep.mubr.msk.f32.mxu1 %vm2683_vm0, %v5955_v20 }
0x1fd9   : > { %8137 = vmatprep.subr.bf16.mxu1 %v8136_v27 }
0x1fdc   : > { %8139 = vmatpush3.bf16.msra.mxu1 %v8136_v27 }
0x1fdf   : > { %7871 = vmatmul.mubr.msk.f32.vlgmr.msra.gmra.mrb[56].mxu1 %vm2683_vm0, %v7843_v12 }
0x20b2   : > { %v7872_v38 = vpop.f32.mrb[56].mxu1 }
0x20b3   : > { %v6225_v24 = vadd.f32 %v7872_v38, %v7178_v35  ;;  %v6208_v39 = vpop.f32.mrb[57].mxu1 }
0x20b4   : > { %v6224_v40 = vadd.f32 %v7178_v35, %v6208_v39 }
0x20b5   : > { %v6227_v41 = vmax.f32 %v6225_v24, 0.0 }
0x20b6   : > { %v6226_v29 = vmax.f32 %v6224_v40, 0.0 }
0x20b8   : > { %7881 = vmatprep.mubr.msk.f32.mxu0 %vm2683_vm0, %v6226_v29 }
0x20b9   : > { %7882 = vmatmul.mubr.msk.f32.vlgmr.msra.gmra.mrb[56].mxu0 %vm2683_vm0, %v6227_v41 }
0x20ba   : > { %8151 = vmatpush3.bf16.msra.mxu0 %v8148_v30 }
0x20bb   : > { %8153 = vmatprep.subr.bf16.mxu0 %v8152_v43 }
0x20be   : > { %8155 = vmatpush3.bf16.msra.mxu0 %v8152_v43 }
0x218c   : > { %v7883_v36 = vpop.f32.mrb[56].mxu0 }
0x218d   : > { %v6317_v47 = vadd.f32 %v7883_v36, %v7179_v46  ;;  %v6311_v37 = vpop.f32.mrb[57].mxu0 }
0x218e   : > { %v6312_v48 = vadd.f32 %v7179_v46, %v6311_v37 }
0x218f   : > { %v6321_v50 = vmax.f32 %v6317_v47, 0.0 }
0x2190   : > { %v6320_v49 = vmax.f32 %v6312_v48, 0.0 }
0x2192   : > { %7892 = vmatprep.mubr.msk.f32.mxu0 %vm2683_vm0, %v6320_v49 }
0x2193   : > { %7893 = vmatmul.mubr.msk.f32.vlgmr.msra.gmra.mrb[58].mxu0 %vm2683_vm0, %v6321_v50 }
0x2266   : > { %v7894_v52 = vpop.f32.mrb[58].mxu0 }
0x2267   : > { %v6411_v53 = vadd.f32 %v7894_v52, %v7182_v51  ;;  %v6405_v54 = vpop.f32.mrb[59].mxu0 }
0x2268   : > { %v6406_v55 = vadd.f32 %v7182_v51, %v6405_v54 }
0x2269   : > { %6416 = vst.msk [vmem:[%s2599_s2 + $0x8] sm:$0xff] %vm6414_vm8, %v6411_v53 }
0x226a   : > { %6415 = vst.msk [vmem:[%s2599_s2] sm:$0xff] %vm6414_vm8, %v6406_v55 }
0x226b PF: > { %s172_s0 = sadd.s32 1, %s9688_s0  }
0x226c   : > { %p169_p3 = scmp.ge.s32.totalorder %s172_s0, 4  }
0x226e   :  { %171 = sbr.rel (!%p169_p3) target bundleno = 156 (0x9c), region = 563 }
0x2275   :  { %6438 = vsyncpa [#allocation4], 1 }
0x2276   :  { %6440 = vsyncpa [#allocation4 + $0x1], 1 }
0x2277   :  { %6441 = vsyncpa [#allocation6], 1 }
0x2278   :  { %6442 = vsyncpa [#allocation9], 1 }
0x2279   :  { %6443 = vsyncpa [#allocation12], 1 }
0x227a   :  { %6444 = vsyncpa [#allocation15], 1 }
0x227b   :  { %6445 = vsyncpa [#allocation18], 1 }
0x227c   :  { %6446 = vsyncpa [#allocation21], 1 }
0x227d   :  { %6447 = vsyncpa [#allocation24], 1 }
0x227e   :  { %6448 = vsyncpa [#allocation27], 1 }
0x227f   :  { %6449 = vsyncpa [#allocation30], 1 }
0x2280   :  { %6450 = vsyncpa [#allocation33], 1 }
0x2281   :  { %6451 = vsyncpa [#allocation36], 1 }
0x2282   :  { %6452 = vsyncpa [#allocation39], 1 }
0x2283   :  { %6453 = vsyncpa [#allocation42], 1 }
0x2284   :  { %6454 = vsyncpa [#allocation45], 1 }
0x2285   :  { %6455 = vsyncpa [#allocation48], 1 }
0x2286   :  { %6456 = vsyncpa [#allocation51], 1 }
0x2287   :  { %6457 = vsyncpa [#allocation54], 1 }
0x2288   :  { %6458 = vsyncpa [#allocation57], 1 }
0x2289   :  { %6459 = vsyncpa [#allocation60], 1 }
0x228a   :  { %6460 = vsyncpa [#allocation63], 1 }

</bundles_post_ra>
